<compile_context>
chip_gen: v5e
topology: v5e:2x2
jax: 0.10.0
libtpu: 0.0.40
codegen_flags: <defaults>
</compile_context>

<pallas_src>
import math
import functools

import jax
import jax.numpy as jnp
from jax import lax
from jax.experimental import pallas as pl
from jax.experimental.pallas import tpu as pltpu


# ------------------------------------------------------------------ helpers --

def _layernorm(x, w, b, eps=1e-5):
    mu = jnp.mean(x, axis=-1, keepdims=True)
    var = jnp.mean((x - mu) ** 2, axis=-1, keepdims=True)
    return (x - mu) * jax.lax.rsqrt(var + eps) * w + b


_TRANS_B_DNUMS = (((1,), (1,)), ((), ()))   # A @ B^T without an explicit transpose


# ------------------------------------------------------------------- kernel --

def _fused_forward_kernel(num_layers, num_heads, head_dim,
                          x_ref, pe_ref, mask_ref,
                          w_in_ref, b_in_ref,
                          ln1w_ref, ln1b_ref, wqkv_ref, bqkv_ref,
                          wo_ref, bo_ref, ln2w_ref, ln2b_ref,
                          w1_ref, b1_ref, w2_ref, b2_ref,
                          w_out_ref, b_out_ref,
                          o_ref):
    f32 = jnp.float32
    bf16 = jnp.bfloat16
    H, hd = num_heads, head_dim
    D = H * hd

    # ---- embed: mlp_in fused with positional-encoding add -------------------
    x = x_ref[...]                                              # (M, slot_dim) f32
    tok = jnp.dot(x.astype(bf16), w_in_ref[...],
                  preferred_element_type=f32)
    tok = tok + b_in_ref[...] + pe_ref[...]                     # (M, D) f32
    # TODO(synk): pos_enc_dropout skipped (inference / eval semantics).

    # Block-diagonal additive attention bias (0 within a sample, -1e30 across).
    attn_bias = mask_ref[...]                                   # (M, M), hoisted
    scale = 1.0 / math.sqrt(hd)

    for l in range(num_layers):                                 # static unroll
        # ---- pre-norm multi-head self-attention ------------------------------
        h1 = _layernorm(tok, ln1w_ref[l], ln1b_ref[l])
        qkv = jnp.dot(h1.astype(bf16), wqkv_ref[l],
                      preferred_element_type=f32) + bqkv_ref[l]  # (M, 3D)
        q = qkv[:, 0 * D:1 * D]
        k = qkv[:, 1 * D:2 * D]
        v = qkv[:, 2 * D:3 * D]

        ctx_heads = []
        for hh in range(H):                                     # static unroll
            sl = slice(hh * hd, (hh + 1) * hd)
            qh = (q[:, sl] * scale).astype(bf16)
            kh = k[:, sl].astype(bf16)
            vh = v[:, sl].astype(bf16)
            # scores = qh @ kh^T  (transposed-B contraction, no XLU transpose)
            s = lax.dot_general(qh, kh, _TRANS_B_DNUMS,
                                preferred_element_type=f32) + attn_bias   # (M, M)
            s = s - jnp.max(s, axis=-1, keepdims=True)
            p = jnp.exp(s)
            p = p * pl.reciprocal(jnp.sum(p, axis=-1, keepdims=True), approx=True)
            ctx_heads.append(jnp.dot(p.astype(bf16), vh,
                                     preferred_element_type=f32))
        ctx = jnp.concatenate(ctx_heads, axis=-1)                # (M, D)
        attn = jnp.dot(ctx.astype(bf16), wo_ref[l],
                       preferred_element_type=f32) + bo_ref[l]
        tok = tok + attn

        # ---- pre-norm MLP -----------------------------------------------------
        h2 = _layernorm(tok, ln2w_ref[l], ln2b_ref[l])
        m = jnp.dot(h2.astype(bf16), w1_ref[l],
                    preferred_element_type=f32) + b1_ref[l]
        # TODO(synk): TransformerEncoderBlock source not provided; assuming a
        #             norm_first block with a GELU (tanh approx) MLP.
        m = jax.nn.gelu(m)
        m = jnp.dot(m.astype(bf16), w2_ref[l],
                    preferred_element_type=f32) + b2_ref[l]
        tok = tok + m

    # ---- head: mlp_out --------------------------------------------------------
    out = jnp.dot(tok.astype(bf16), w_out_ref[...],
                  preferred_element_type=f32) + b_out_ref[...]
    o_ref[...] = out


# ------------------------------------------------------------------ wrapper --

def _full_spec(shape):
    n = len(shape)
    return pl.BlockSpec(shape, lambda i, _n=n: (0,) * _n)


def fused_forward(x_flat, pe_tiled, mask, params, *, num_heads, num_layers):
    M, slot_dim = x_flat.shape
    D = params["w_in"].shape[1]
    head_dim = D // num_heads
    kern = functools.partial(_fused_forward_kernel, num_layers, num_heads, head_dim)

    operands = [
        x_flat, pe_tiled, mask,
        params["w_in"], params["b_in"],
        params["ln1_w"], params["ln1_b"], params["wqkv"], params["bqkv"],
        params["wo"], params["bo"], params["ln2_w"], params["ln2_b"],
        params["w1"], params["b1"], params["w2"], params["b2"],
        params["w_out"], params["b_out"],
    ]
    return pl.pallas_call(
        kern,
        out_shape=jax.ShapeDtypeStruct((M, slot_dim), jnp.float32),
        grid=(1,),
        in_specs=[_full_spec(a.shape) for a in operands],
        out_specs=_full_spec((M, slot_dim)),
        compiler_params=pltpu.CompilerParams(dimension_semantics=("arbitrary",)),
    )(*operands)


# ---------------------------------------------------------------- the model --

def sinusoidal_pe(max_len, d_model):
    pos = jnp.arange(max_len, dtype=jnp.float32)[:, None]
    div = jnp.exp(jnp.arange(0, d_model, 2, dtype=jnp.float32)
                  * (-math.log(10000.0) / d_model))
    pe = jnp.zeros((max_len, d_model), jnp.float32)
    pe = pe.at[:, 0::2].set(jnp.sin(pos * div))
    pe = pe.at[:, 1::2].set(jnp.cos(pos * div))
    return pe


def init_params(key, slot_dim, token_dim, hidden_dim, num_layers):
    NL, D, Dh = num_layers, token_dim, hidden_dim

    def kaiming(k, fan_in, shape, dtype=jnp.bfloat16):
        return (jax.random.normal(k, shape, jnp.float32)
                * math.sqrt(2.0 / fan_in)).astype(dtype)

    ks = jax.random.split(key, 6)
    return {
        # matmul weights stored bf16 (MXU-native); biases / LN params stay f32
        "w_in": kaiming(ks[0], slot_dim, (slot_dim, D)),
        "b_in": jnp.zeros((1, D), jnp.float32),
        "w_out": kaiming(ks[1], D, (D, slot_dim)),
        "b_out": jnp.zeros((1, slot_dim), jnp.float32),
        # per-layer weights stacked on a leading layer axis
        "ln1_w": jnp.ones((NL, 1, D), jnp.float32),
        "ln1_b": jnp.zeros((NL, 1, D), jnp.float32),
        "wqkv": kaiming(ks[2], D, (NL, D, 3 * D)),          # fused Q|K|V
        "bqkv": jnp.zeros((NL, 1, 3 * D), jnp.float32),
        "wo": kaiming(ks[3], D, (NL, D, D)),
        "bo": jnp.zeros((NL, 1, D), jnp.float32),
        "ln2_w": jnp.ones((NL, 1, D), jnp.float32),
        "ln2_b": jnp.zeros((NL, 1, D), jnp.float32),
        "w1": kaiming(ks[4], D, (NL, D, Dh)),
        "b1": jnp.zeros((NL, 1, Dh), jnp.float32),
        "w2": kaiming(ks[5], Dh, (NL, Dh, D)),
        "b2": jnp.zeros((NL, 1, D), jnp.float32),
    }


def vanilla_transformer_predictor(inputs, params, *, num_heads, num_layers,
                                  residual=False):
    """inputs: (B, num_imgs, num_slots, slot_dim) -> same shape."""
    B, T, S, slot_dim = inputs.shape
    D = params["w_in"].shape[1]
    L = T * S
    M = B * L

    # Per-time-step sinusoidal code repeated across slots (time-major, slot-minor
    # flattening), tiled over the batch samples folded into the M dimension.
    pe = sinusoidal_pe(T, D)                        # (T, D)
    pe_seq = jnp.repeat(pe, S, axis=0)              # (L, D)
    pe_tiled = jnp.tile(pe_seq, (B, 1))             # (M, D)

    # Block-diagonal attention bias so samples folded into M stay independent.
    sample_id = jnp.repeat(jnp.arange(B, dtype=jnp.int32), L)        # (M,)
    mask = jnp.where(sample_id[:, None] == sample_id[None, :],
                     0.0, -1e30).astype(jnp.float32)                  # (M, M)

    x_flat = inputs.reshape(M, slot_dim)
    out = fused_forward(x_flat, pe_tiled, mask, params,
                        num_heads=num_heads, num_layers=num_layers)   # (M, slot_dim)
    out = out.reshape(B, T, S, slot_dim)
    if residual:
        out = out + inputs
    return out


# --------------------------------------------------------------------- main --

if __name__ == "__main__":
    B = 2
    num_imgs = 5          # == input_buffer_size default
    num_slots = 4
    slot_dim = 32
    token_dim = 128       # module default
    hidden_dim = 256      # module default
    n_heads = 4
    num_layers = 2

    key = jax.random.PRNGKey(0)
    k_param, k_x = jax.random.split(key)
    params = init_params(k_param, slot_dim, token_dim, hidden_dim, num_layers)
    x = jax.random.normal(k_x, (B, num_imgs, num_slots, slot_dim), jnp.float32)

    fwd = jax.jit(functools.partial(vanilla_transformer_predictor,
                                    num_heads=n_heads, num_layers=num_layers,
                                    residual=False))
    out = jax.block_until_ready(fwd(x, params))

    assert out.shape == (B, num_imgs, num_slots, slot_dim), out.shape
    assert jnp.all(jnp.isfinite(out))
    print("KERNEL_OK")
</pallas_src>

<mosaic_0001>
module attributes {stable_mosaic.version = 11 : i64} {
  func.func @_fused_forward_kernel(%arg0: i32, %arg1: memref<40x32xf32, #tpu.memory_space<vmem>>, %arg2: memref<40x128xf32, #tpu.memory_space<vmem>>, %arg3: memref<40x40xf32, #tpu.memory_space<vmem>>, %arg4: memref<32x128xbf16, #tpu.memory_space<vmem>>, %arg5: memref<1x128xf32, #tpu.memory_space<vmem>>, %arg6: memref<2x1x128xf32, #tpu.memory_space<vmem>>, %arg7: memref<2x1x128xf32, #tpu.memory_space<vmem>>, %arg8: memref<2x128x384xbf16, #tpu.memory_space<vmem>>, %arg9: memref<2x1x384xf32, #tpu.memory_space<vmem>>, %arg10: memref<2x128x128xbf16, #tpu.memory_space<vmem>>, %arg11: memref<2x1x128xf32, #tpu.memory_space<vmem>>, %arg12: memref<2x1x128xf32, #tpu.memory_space<vmem>>, %arg13: memref<2x1x128xf32, #tpu.memory_space<vmem>>, %arg14: memref<2x128x256xbf16, #tpu.memory_space<vmem>>, %arg15: memref<2x1x256xf32, #tpu.memory_space<vmem>>, %arg16: memref<2x256x128xbf16, #tpu.memory_space<vmem>>, %arg17: memref<2x1x128xf32, #tpu.memory_space<vmem>>, %arg18: memref<128x32xbf16, #tpu.memory_space<vmem>>, %arg19: memref<1x32xf32, #tpu.memory_space<vmem>>, %arg20: memref<40x32xf32, #tpu.memory_space<vmem>>) attributes {dimension_semantics = [#tpu.dimension_semantics<arbitrary>], iteration_bounds = array<i64: 1>, scalar_prefetch = 0 : i64, scratch_operands = 0 : i64, tpu.core_type = #tpu.core_type<tc>, window_params = [{pipeline_mode = #tpu.pipeline_mode<synchronous>, transform_indices = @transform_0, window_bounds = array<i64: 40, 32>}, {pipeline_mode = #tpu.pipeline_mode<synchronous>, transform_indices = @transform_1, window_bounds = array<i64: 40, 128>}, {pipeline_mode = #tpu.pipeline_mode<synchronous>, transform_indices = @transform_2, window_bounds = array<i64: 40, 40>}, {pipeline_mode = #tpu.pipeline_mode<synchronous>, transform_indices = @transform_3, window_bounds = array<i64: 32, 128>}, {pipeline_mode = #tpu.pipeline_mode<synchronous>, transform_indices = @transform_4, window_bounds = array<i64: 1, 128>}, {pipeline_mode = #tpu.pipeline_mode<synchronous>, transform_indices = @transform_5, window_bounds = array<i64: 2, 1, 128>}, {pipeline_mode = #tpu.pipeline_mode<synchronous>, transform_indices = @transform_6, window_bounds = array<i64: 2, 1, 128>}, {pipeline_mode = #tpu.pipeline_mode<synchronous>, transform_indices = @transform_7, window_bounds = array<i64: 2, 128, 384>}, {pipeline_mode = #tpu.pipeline_mode<synchronous>, transform_indices = @transform_8, window_bounds = array<i64: 2, 1, 384>}, {pipeline_mode = #tpu.pipeline_mode<synchronous>, transform_indices = @transform_9, window_bounds = array<i64: 2, 128, 128>}, {pipeline_mode = #tpu.pipeline_mode<synchronous>, transform_indices = @transform_10, window_bounds = array<i64: 2, 1, 128>}, {pipeline_mode = #tpu.pipeline_mode<synchronous>, transform_indices = @transform_11, window_bounds = array<i64: 2, 1, 128>}, {pipeline_mode = #tpu.pipeline_mode<synchronous>, transform_indices = @transform_12, window_bounds = array<i64: 2, 1, 128>}, {pipeline_mode = #tpu.pipeline_mode<synchronous>, transform_indices = @transform_13, window_bounds = array<i64: 2, 128, 256>}, {pipeline_mode = #tpu.pipeline_mode<synchronous>, transform_indices = @transform_14, window_bounds = array<i64: 2, 1, 256>}, {pipeline_mode = #tpu.pipeline_mode<synchronous>, transform_indices = @transform_15, window_bounds = array<i64: 2, 256, 128>}, {pipeline_mode = #tpu.pipeline_mode<synchronous>, transform_indices = @transform_16, window_bounds = array<i64: 2, 1, 128>}, {pipeline_mode = #tpu.pipeline_mode<synchronous>, transform_indices = @transform_17, window_bounds = array<i64: 128, 32>}, {pipeline_mode = #tpu.pipeline_mode<synchronous>, transform_indices = @transform_18, window_bounds = array<i64: 1, 32>}, {pipeline_mode = #tpu.pipeline_mode<synchronous>, transform_indices = @transform_19, window_bounds = array<i64: 40, 32>}]} {
    %c0 = arith.constant 0 : index
    %c0_0 = arith.constant 0 : index
    %0 = vector.load %arg1[%c0, %c0_0] : memref<40x32xf32, #tpu.memory_space<vmem>>, vector<40x32xf32>
    %1 = arith.truncf %0 : vector<40x32xf32> to vector<40x32xbf16>
    %c0_1 = arith.constant 0 : index
    %c0_2 = arith.constant 0 : index
    %2 = vector.load %arg4[%c0_1, %c0_2] : memref<32x128xbf16, #tpu.memory_space<vmem>>, vector<32x128xbf16>
    %cst = arith.constant dense<0.000000e+00> : vector<40x128xf32>
    %3 = tpu.matmul %1, %2, %cst {dimension_numbers = #tpu.dot_dimension_numbers<[1], [0], [0], [1], [0, 0, 1, 1], [], []>} : vector<40x32xbf16>, vector<32x128xbf16>, vector<40x128xf32> -> vector<40x128xf32>
    %c0_3 = arith.constant 0 : index
    %c0_4 = arith.constant 0 : index
    %4 = vector.load %arg5[%c0_3, %c0_4] : memref<1x128xf32, #tpu.memory_space<vmem>>, vector<1x128xf32>
    %5 = vector.broadcast %4 : vector<1x128xf32> to vector<40x128xf32>
    %6 = arith.addf %3, %5 : vector<40x128xf32>
    %c0_5 = arith.constant 0 : index
    %c0_6 = arith.constant 0 : index
    %7 = vector.load %arg2[%c0_5, %c0_6] : memref<40x128xf32, #tpu.memory_space<vmem>>, vector<40x128xf32>
    %8 = arith.addf %6, %7 : vector<40x128xf32>
    %c0_7 = arith.constant 0 : index
    %c0_8 = arith.constant 0 : index
    %9 = vector.load %arg3[%c0_7, %c0_8] : memref<40x40xf32, #tpu.memory_space<vmem>>, vector<40x40xf32>
    %c0_9 = arith.constant 0 : index
    %c0_10 = arith.constant 0 : index
    %c0_11 = arith.constant 0 : index
    %10 = vector.load %arg6[%c0_9, %c0_10, %c0_11] : memref<2x1x128xf32, #tpu.memory_space<vmem>>, vector<1x1x128xf32>
    %11 = vector.shape_cast %10 : vector<1x1x128xf32> to vector<1x128xf32>
    %c0_12 = arith.constant 0 : index
    %c0_13 = arith.constant 0 : index
    %c0_14 = arith.constant 0 : index
    %12 = vector.load %arg7[%c0_12, %c0_13, %c0_14] : memref<2x1x128xf32, #tpu.memory_space<vmem>>, vector<1x1x128xf32>
    %13 = vector.shape_cast %12 : vector<1x1x128xf32> to vector<1x128xf32>
    %cst_15 = arith.constant dense<0.000000e+00> : vector<40xf32>
    %14 = vector.multi_reduction <add>, %8, %cst_15 [1] : vector<40x128xf32> to vector<40xf32>
    %15 = vector.shape_cast %14 : vector<40xf32> to vector<40x1xf32>
    %cst_16 = arith.constant 1.280000e+02 : f32
    %16 = vector.broadcast %cst_16 : f32 to vector<40x1xf32>
    %17 = arith.divf %15, %16 : vector<40x1xf32>
    %18 = vector.broadcast %17 : vector<40x1xf32> to vector<40x128xf32>
    %19 = arith.subf %8, %18 : vector<40x128xf32>
    %20 = arith.mulf %19, %19 : vector<40x128xf32>
    %cst_17 = arith.constant dense<0.000000e+00> : vector<40xf32>
    %21 = vector.multi_reduction <add>, %20, %cst_17 [1] : vector<40x128xf32> to vector<40xf32>
    %22 = vector.shape_cast %21 : vector<40xf32> to vector<40x1xf32>
    %cst_18 = arith.constant 1.280000e+02 : f32
    %23 = vector.broadcast %cst_18 : f32 to vector<40x1xf32>
    %24 = arith.divf %22, %23 : vector<40x1xf32>
    %25 = vector.broadcast %17 : vector<40x1xf32> to vector<40x128xf32>
    %26 = arith.subf %8, %25 : vector<40x128xf32>
    %cst_19 = arith.constant 9.99999974E-6 : f32
    %27 = vector.broadcast %cst_19 : f32 to vector<40x1xf32>
    %28 = arith.addf %24, %27 : vector<40x1xf32>
    %29 = math.rsqrt %28 : vector<40x1xf32>
    %30 = vector.broadcast %29 : vector<40x1xf32> to vector<40x128xf32>
    %31 = arith.mulf %26, %30 : vector<40x128xf32>
    %32 = vector.broadcast %11 : vector<1x128xf32> to vector<40x128xf32>
    %33 = arith.mulf %31, %32 : vector<40x128xf32>
    %34 = vector.broadcast %13 : vector<1x128xf32> to vector<40x128xf32>
    %35 = arith.addf %33, %34 : vector<40x128xf32>
    %36 = arith.truncf %35 : vector<40x128xf32> to vector<40x128xbf16>
    %c0_20 = arith.constant 0 : index
    %c0_21 = arith.constant 0 : index
    %c0_22 = arith.constant 0 : index
    %37 = vector.load %arg8[%c0_20, %c0_21, %c0_22] : memref<2x128x384xbf16, #tpu.memory_space<vmem>>, vector<1x128x384xbf16>
    %38 = vector.shape_cast %37 : vector<1x128x384xbf16> to vector<128x384xbf16>
    %cst_23 = arith.constant dense<0.000000e+00> : vector<40x384xf32>
    %39 = tpu.matmul %36, %38, %cst_23 {dimension_numbers = #tpu.dot_dimension_numbers<[1], [0], [0], [1], [0, 0, 1, 1], [], []>} : vector<40x128xbf16>, vector<128x384xbf16>, vector<40x384xf32> -> vector<40x384xf32>
    %c0_24 = arith.constant 0 : index
    %c0_25 = arith.constant 0 : index
    %c0_26 = arith.constant 0 : index
    %40 = vector.load %arg9[%c0_24, %c0_25, %c0_26] : memref<2x1x384xf32, #tpu.memory_space<vmem>>, vector<1x1x384xf32>
    %41 = vector.shape_cast %40 : vector<1x1x384xf32> to vector<1x384xf32>
    %42 = vector.broadcast %41 : vector<1x384xf32> to vector<40x384xf32>
    %43 = arith.addf %39, %42 : vector<40x384xf32>
    %44 = vector.extract_strided_slice %43 {offsets = [0, 0], sizes = [40, 128], strides = [1, 1]} : vector<40x384xf32> to vector<40x128xf32>
    %45 = vector.extract_strided_slice %43 {offsets = [0, 128], sizes = [40, 128], strides = [1, 1]} : vector<40x384xf32> to vector<40x128xf32>
    %46 = vector.extract_strided_slice %43 {offsets = [0, 256], sizes = [40, 128], strides = [1, 1]} : vector<40x384xf32> to vector<40x128xf32>
    %47 = vector.extract_strided_slice %44 {offsets = [0, 0], sizes = [40, 32], strides = [1, 1]} : vector<40x128xf32> to vector<40x32xf32>
    %cst_27 = arith.constant 0.176776692 : f32
    %48 = vector.broadcast %cst_27 : f32 to vector<40x32xf32>
    %49 = arith.mulf %47, %48 : vector<40x32xf32>
    %50 = arith.truncf %49 : vector<40x32xf32> to vector<40x32xbf16>
    %51 = vector.extract_strided_slice %45 {offsets = [0, 0], sizes = [40, 32], strides = [1, 1]} : vector<40x128xf32> to vector<40x32xf32>
    %52 = arith.truncf %51 : vector<40x32xf32> to vector<40x32xbf16>
    %53 = vector.extract_strided_slice %46 {offsets = [0, 0], sizes = [40, 32], strides = [1, 1]} : vector<40x128xf32> to vector<40x32xf32>
    %54 = arith.truncf %53 : vector<40x32xf32> to vector<40x32xbf16>
    %cst_28 = arith.constant dense<0.000000e+00> : vector<40x40xf32>
    %55 = tpu.matmul %50, %52, %cst_28 {dimension_numbers = #tpu.dot_dimension_numbers<[1], [1], [0], [0], [0, 0, 1, 0], [], []>} : vector<40x32xbf16>, vector<40x32xbf16>, vector<40x40xf32> -> vector<40x40xf32>
    %56 = arith.addf %55, %9 : vector<40x40xf32>
    %cst_29 = arith.constant dense<0xFF800000> : vector<40xf32>
    %57 = vector.multi_reduction <maximumf>, %56, %cst_29 [1] : vector<40x40xf32> to vector<40xf32>
    %58 = vector.shape_cast %57 : vector<40xf32> to vector<40x1xf32>
    %59 = vector.broadcast %58 : vector<40x1xf32> to vector<40x40xf32>
    %60 = arith.subf %56, %59 : vector<40x40xf32>
    %61 = math.exp %60 : vector<40x40xf32>
    %cst_30 = arith.constant dense<0.000000e+00> : vector<40xf32>
    %62 = vector.multi_reduction <add>, %61, %cst_30 [1] : vector<40x40xf32> to vector<40xf32>
    %63 = vector.shape_cast %62 : vector<40xf32> to vector<40x1xf32>
    %64 = tpu.reciprocal %63 {approx = true} : vector<40x1xf32> -> vector<40x1xf32>
    %65 = vector.broadcast %64 : vector<40x1xf32> to vector<40x40xf32>
    %66 = arith.mulf %61, %65 : vector<40x40xf32>
    %67 = arith.truncf %66 : vector<40x40xf32> to vector<40x40xbf16>
    %cst_31 = arith.constant dense<0.000000e+00> : vector<40x32xf32>
    %68 = tpu.matmul %67, %54, %cst_31 {dimension_numbers = #tpu.dot_dimension_numbers<[1], [0], [0], [1], [0, 0, 1, 1], [], []>} : vector<40x40xbf16>, vector<40x32xbf16>, vector<40x32xf32> -> vector<40x32xf32>
    %69 = vector.extract_strided_slice %44 {offsets = [0, 32], sizes = [40, 32], strides = [1, 1]} : vector<40x128xf32> to vector<40x32xf32>
    %cst_32 = arith.constant 0.176776692 : f32
    %70 = vector.broadcast %cst_32 : f32 to vector<40x32xf32>
    %71 = arith.mulf %69, %70 : vector<40x32xf32>
    %72 = arith.truncf %71 : vector<40x32xf32> to vector<40x32xbf16>
    %73 = vector.extract_strided_slice %45 {offsets = [0, 32], sizes = [40, 32], strides = [1, 1]} : vector<40x128xf32> to vector<40x32xf32>
    %74 = arith.truncf %73 : vector<40x32xf32> to vector<40x32xbf16>
    %75 = vector.extract_strided_slice %46 {offsets = [0, 32], sizes = [40, 32], strides = [1, 1]} : vector<40x128xf32> to vector<40x32xf32>
    %76 = arith.truncf %75 : vector<40x32xf32> to vector<40x32xbf16>
    %cst_33 = arith.constant dense<0.000000e+00> : vector<40x40xf32>
    %77 = tpu.matmul %72, %74, %cst_33 {dimension_numbers = #tpu.dot_dimension_numbers<[1], [1], [0], [0], [0, 0, 1, 0], [], []>} : vector<40x32xbf16>, vector<40x32xbf16>, vector<40x40xf32> -> vector<40x40xf32>
    %78 = arith.addf %77, %9 : vector<40x40xf32>
    %cst_34 = arith.constant dense<0xFF800000> : vector<40xf32>
    %79 = vector.multi_reduction <maximumf>, %78, %cst_34 [1] : vector<40x40xf32> to vector<40xf32>
    %80 = vector.shape_cast %79 : vector<40xf32> to vector<40x1xf32>
    %81 = vector.broadcast %80 : vector<40x1xf32> to vector<40x40xf32>
    %82 = arith.subf %78, %81 : vector<40x40xf32>
    %83 = math.exp %82 : vector<40x40xf32>
    %cst_35 = arith.constant dense<0.000000e+00> : vector<40xf32>
    %84 = vector.multi_reduction <add>, %83, %cst_35 [1] : vector<40x40xf32> to vector<40xf32>
    %85 = vector.shape_cast %84 : vector<40xf32> to vector<40x1xf32>
    %86 = tpu.reciprocal %85 {approx = true} : vector<40x1xf32> -> vector<40x1xf32>
    %87 = vector.broadcast %86 : vector<40x1xf32> to vector<40x40xf32>
    %88 = arith.mulf %83, %87 : vector<40x40xf32>
    %89 = arith.truncf %88 : vector<40x40xf32> to vector<40x40xbf16>
    %cst_36 = arith.constant dense<0.000000e+00> : vector<40x32xf32>
    %90 = tpu.matmul %89, %76, %cst_36 {dimension_numbers = #tpu.dot_dimension_numbers<[1], [0], [0], [1], [0, 0, 1, 1], [], []>} : vector<40x40xbf16>, vector<40x32xbf16>, vector<40x32xf32> -> vector<40x32xf32>
    %91 = vector.extract_strided_slice %44 {offsets = [0, 64], sizes = [40, 32], strides = [1, 1]} : vector<40x128xf32> to vector<40x32xf32>
    %cst_37 = arith.constant 0.176776692 : f32
    %92 = vector.broadcast %cst_37 : f32 to vector<40x32xf32>
    %93 = arith.mulf %91, %92 : vector<40x32xf32>
    %94 = arith.truncf %93 : vector<40x32xf32> to vector<40x32xbf16>
    %95 = vector.extract_strided_slice %45 {offsets = [0, 64], sizes = [40, 32], strides = [1, 1]} : vector<40x128xf32> to vector<40x32xf32>
    %96 = arith.truncf %95 : vector<40x32xf32> to vector<40x32xbf16>
    %97 = vector.extract_strided_slice %46 {offsets = [0, 64], sizes = [40, 32], strides = [1, 1]} : vector<40x128xf32> to vector<40x32xf32>
    %98 = arith.truncf %97 : vector<40x32xf32> to vector<40x32xbf16>
    %cst_38 = arith.constant dense<0.000000e+00> : vector<40x40xf32>
    %99 = tpu.matmul %94, %96, %cst_38 {dimension_numbers = #tpu.dot_dimension_numbers<[1], [1], [0], [0], [0, 0, 1, 0], [], []>} : vector<40x32xbf16>, vector<40x32xbf16>, vector<40x40xf32> -> vector<40x40xf32>
    %100 = arith.addf %99, %9 : vector<40x40xf32>
    %cst_39 = arith.constant dense<0xFF800000> : vector<40xf32>
    %101 = vector.multi_reduction <maximumf>, %100, %cst_39 [1] : vector<40x40xf32> to vector<40xf32>
    %102 = vector.shape_cast %101 : vector<40xf32> to vector<40x1xf32>
    %103 = vector.broadcast %102 : vector<40x1xf32> to vector<40x40xf32>
    %104 = arith.subf %100, %103 : vector<40x40xf32>
    %105 = math.exp %104 : vector<40x40xf32>
    %cst_40 = arith.constant dense<0.000000e+00> : vector<40xf32>
    %106 = vector.multi_reduction <add>, %105, %cst_40 [1] : vector<40x40xf32> to vector<40xf32>
    %107 = vector.shape_cast %106 : vector<40xf32> to vector<40x1xf32>
    %108 = tpu.reciprocal %107 {approx = true} : vector<40x1xf32> -> vector<40x1xf32>
    %109 = vector.broadcast %108 : vector<40x1xf32> to vector<40x40xf32>
    %110 = arith.mulf %105, %109 : vector<40x40xf32>
    %111 = arith.truncf %110 : vector<40x40xf32> to vector<40x40xbf16>
    %cst_41 = arith.constant dense<0.000000e+00> : vector<40x32xf32>
    %112 = tpu.matmul %111, %98, %cst_41 {dimension_numbers = #tpu.dot_dimension_numbers<[1], [0], [0], [1], [0, 0, 1, 1], [], []>} : vector<40x40xbf16>, vector<40x32xbf16>, vector<40x32xf32> -> vector<40x32xf32>
    %113 = vector.extract_strided_slice %44 {offsets = [0, 96], sizes = [40, 32], strides = [1, 1]} : vector<40x128xf32> to vector<40x32xf32>
    %cst_42 = arith.constant 0.176776692 : f32
    %114 = vector.broadcast %cst_42 : f32 to vector<40x32xf32>
    %115 = arith.mulf %113, %114 : vector<40x32xf32>
    %116 = arith.truncf %115 : vector<40x32xf32> to vector<40x32xbf16>
    %117 = vector.extract_strided_slice %45 {offsets = [0, 96], sizes = [40, 32], strides = [1, 1]} : vector<40x128xf32> to vector<40x32xf32>
    %118 = arith.truncf %117 : vector<40x32xf32> to vector<40x32xbf16>
    %119 = vector.extract_strided_slice %46 {offsets = [0, 96], sizes = [40, 32], strides = [1, 1]} : vector<40x128xf32> to vector<40x32xf32>
    %120 = arith.truncf %119 : vector<40x32xf32> to vector<40x32xbf16>
    %cst_43 = arith.constant dense<0.000000e+00> : vector<40x40xf32>
    %121 = tpu.matmul %116, %118, %cst_43 {dimension_numbers = #tpu.dot_dimension_numbers<[1], [1], [0], [0], [0, 0, 1, 0], [], []>} : vector<40x32xbf16>, vector<40x32xbf16>, vector<40x40xf32> -> vector<40x40xf32>
    %122 = arith.addf %121, %9 : vector<40x40xf32>
    %cst_44 = arith.constant dense<0xFF800000> : vector<40xf32>
    %123 = vector.multi_reduction <maximumf>, %122, %cst_44 [1] : vector<40x40xf32> to vector<40xf32>
    %124 = vector.shape_cast %123 : vector<40xf32> to vector<40x1xf32>
    %125 = vector.broadcast %124 : vector<40x1xf32> to vector<40x40xf32>
    %126 = arith.subf %122, %125 : vector<40x40xf32>
    %127 = math.exp %126 : vector<40x40xf32>
    %cst_45 = arith.constant dense<0.000000e+00> : vector<40xf32>
    %128 = vector.multi_reduction <add>, %127, %cst_45 [1] : vector<40x40xf32> to vector<40xf32>
    %129 = vector.shape_cast %128 : vector<40xf32> to vector<40x1xf32>
    %130 = tpu.reciprocal %129 {approx = true} : vector<40x1xf32> -> vector<40x1xf32>
    %131 = vector.broadcast %130 : vector<40x1xf32> to vector<40x40xf32>
    %132 = arith.mulf %127, %131 : vector<40x40xf32>
    %133 = arith.truncf %132 : vector<40x40xf32> to vector<40x40xbf16>
    %cst_46 = arith.constant dense<0.000000e+00> : vector<40x32xf32>
    %134 = tpu.matmul %133, %120, %cst_46 {dimension_numbers = #tpu.dot_dimension_numbers<[1], [0], [0], [1], [0, 0, 1, 1], [], []>} : vector<40x40xbf16>, vector<40x32xbf16>, vector<40x32xf32> -> vector<40x32xf32>
    %135 = tpu.concatenate %68, %90, %112, %134 in 1 : vector<40x32xf32>, vector<40x32xf32>, vector<40x32xf32>, vector<40x32xf32> -> vector<40x128xf32>
    %136 = arith.truncf %135 : vector<40x128xf32> to vector<40x128xbf16>
    %c0_47 = arith.constant 0 : index
    %c0_48 = arith.constant 0 : index
    %c0_49 = arith.constant 0 : index
    %137 = vector.load %arg10[%c0_47, %c0_48, %c0_49] : memref<2x128x128xbf16, #tpu.memory_space<vmem>>, vector<1x128x128xbf16>
    %138 = vector.shape_cast %137 : vector<1x128x128xbf16> to vector<128x128xbf16>
    %cst_50 = arith.constant dense<0.000000e+00> : vector<40x128xf32>
    %139 = tpu.matmul %136, %138, %cst_50 {dimension_numbers = #tpu.dot_dimension_numbers<[1], [0], [0], [1], [0, 0, 1, 1], [], []>} : vector<40x128xbf16>, vector<128x128xbf16>, vector<40x128xf32> -> vector<40x128xf32>
    %c0_51 = arith.constant 0 : index
    %c0_52 = arith.constant 0 : index
    %c0_53 = arith.constant 0 : index
    %140 = vector.load %arg11[%c0_51, %c0_52, %c0_53] : memref<2x1x128xf32, #tpu.memory_space<vmem>>, vector<1x1x128xf32>
    %141 = vector.shape_cast %140 : vector<1x1x128xf32> to vector<1x128xf32>
    %142 = vector.broadcast %141 : vector<1x128xf32> to vector<40x128xf32>
    %143 = arith.addf %139, %142 : vector<40x128xf32>
    %144 = arith.addf %8, %143 : vector<40x128xf32>
    %c0_54 = arith.constant 0 : index
    %c0_55 = arith.constant 0 : index
    %c0_56 = arith.constant 0 : index
    %145 = vector.load %arg12[%c0_54, %c0_55, %c0_56] : memref<2x1x128xf32, #tpu.memory_space<vmem>>, vector<1x1x128xf32>
    %146 = vector.shape_cast %145 : vector<1x1x128xf32> to vector<1x128xf32>
    %c0_57 = arith.constant 0 : index
    %c0_58 = arith.constant 0 : index
    %c0_59 = arith.constant 0 : index
    %147 = vector.load %arg13[%c0_57, %c0_58, %c0_59] : memref<2x1x128xf32, #tpu.memory_space<vmem>>, vector<1x1x128xf32>
    %148 = vector.shape_cast %147 : vector<1x1x128xf32> to vector<1x128xf32>
    %cst_60 = arith.constant dense<0.000000e+00> : vector<40xf32>
    %149 = vector.multi_reduction <add>, %144, %cst_60 [1] : vector<40x128xf32> to vector<40xf32>
    %150 = vector.shape_cast %149 : vector<40xf32> to vector<40x1xf32>
    %cst_61 = arith.constant 1.280000e+02 : f32
    %151 = vector.broadcast %cst_61 : f32 to vector<40x1xf32>
    %152 = arith.divf %150, %151 : vector<40x1xf32>
    %153 = vector.broadcast %152 : vector<40x1xf32> to vector<40x128xf32>
    %154 = arith.subf %144, %153 : vector<40x128xf32>
    %155 = arith.mulf %154, %154 : vector<40x128xf32>
    %cst_62 = arith.constant dense<0.000000e+00> : vector<40xf32>
    %156 = vector.multi_reduction <add>, %155, %cst_62 [1] : vector<40x128xf32> to vector<40xf32>
    %157 = vector.shape_cast %156 : vector<40xf32> to vector<40x1xf32>
    %cst_63 = arith.constant 1.280000e+02 : f32
    %158 = vector.broadcast %cst_63 : f32 to vector<40x1xf32>
    %159 = arith.divf %157, %158 : vector<40x1xf32>
    %160 = vector.broadcast %152 : vector<40x1xf32> to vector<40x128xf32>
    %161 = arith.subf %144, %160 : vector<40x128xf32>
    %cst_64 = arith.constant 9.99999974E-6 : f32
    %162 = vector.broadcast %cst_64 : f32 to vector<40x1xf32>
    %163 = arith.addf %159, %162 : vector<40x1xf32>
    %164 = math.rsqrt %163 : vector<40x1xf32>
    %165 = vector.broadcast %164 : vector<40x1xf32> to vector<40x128xf32>
    %166 = arith.mulf %161, %165 : vector<40x128xf32>
    %167 = vector.broadcast %146 : vector<1x128xf32> to vector<40x128xf32>
    %168 = arith.mulf %166, %167 : vector<40x128xf32>
    %169 = vector.broadcast %148 : vector<1x128xf32> to vector<40x128xf32>
    %170 = arith.addf %168, %169 : vector<40x128xf32>
    %171 = arith.truncf %170 : vector<40x128xf32> to vector<40x128xbf16>
    %c0_65 = arith.constant 0 : index
    %c0_66 = arith.constant 0 : index
    %c0_67 = arith.constant 0 : index
    %172 = vector.load %arg14[%c0_65, %c0_66, %c0_67] : memref<2x128x256xbf16, #tpu.memory_space<vmem>>, vector<1x128x256xbf16>
    %173 = vector.shape_cast %172 : vector<1x128x256xbf16> to vector<128x256xbf16>
    %cst_68 = arith.constant dense<0.000000e+00> : vector<40x256xf32>
    %174 = tpu.matmul %171, %173, %cst_68 {dimension_numbers = #tpu.dot_dimension_numbers<[1], [0], [0], [1], [0, 0, 1, 1], [], []>} : vector<40x128xbf16>, vector<128x256xbf16>, vector<40x256xf32> -> vector<40x256xf32>
    %c0_69 = arith.constant 0 : index
    %c0_70 = arith.constant 0 : index
    %c0_71 = arith.constant 0 : index
    %175 = vector.load %arg15[%c0_69, %c0_70, %c0_71] : memref<2x1x256xf32, #tpu.memory_space<vmem>>, vector<1x1x256xf32>
    %176 = vector.shape_cast %175 : vector<1x1x256xf32> to vector<1x256xf32>
    %177 = vector.broadcast %176 : vector<1x256xf32> to vector<40x256xf32>
    %178 = arith.addf %174, %177 : vector<40x256xf32>
    %179 = arith.mulf %178, %178 : vector<40x256xf32>
    %180 = arith.mulf %178, %179 : vector<40x256xf32>
    %cst_72 = arith.constant 4.471500e-02 : f32
    %181 = vector.broadcast %cst_72 : f32 to vector<40x256xf32>
    %182 = arith.mulf %181, %180 : vector<40x256xf32>
    %183 = arith.addf %178, %182 : vector<40x256xf32>
    %cst_73 = arith.constant 0.797884583 : f32
    %184 = vector.broadcast %cst_73 : f32 to vector<40x256xf32>
    %185 = arith.mulf %184, %183 : vector<40x256xf32>
    %186 = math.tanh %185 : vector<40x256xf32>
    %cst_74 = arith.constant 1.000000e+00 : f32
    %187 = vector.broadcast %cst_74 : f32 to vector<40x256xf32>
    %188 = arith.addf %187, %186 : vector<40x256xf32>
    %cst_75 = arith.constant 5.000000e-01 : f32
    %189 = vector.broadcast %cst_75 : f32 to vector<40x256xf32>
    %190 = arith.mulf %189, %188 : vector<40x256xf32>
    %191 = arith.mulf %178, %190 : vector<40x256xf32>
    %192 = arith.truncf %191 : vector<40x256xf32> to vector<40x256xbf16>
    %c0_76 = arith.constant 0 : index
    %c0_77 = arith.constant 0 : index
    %c0_78 = arith.constant 0 : index
    %193 = vector.load %arg16[%c0_76, %c0_77, %c0_78] : memref<2x256x128xbf16, #tpu.memory_space<vmem>>, vector<1x256x128xbf16>
    %194 = vector.shape_cast %193 : vector<1x256x128xbf16> to vector<256x128xbf16>
    %cst_79 = arith.constant dense<0.000000e+00> : vector<40x128xf32>
    %195 = tpu.matmul %192, %194, %cst_79 {dimension_numbers = #tpu.dot_dimension_numbers<[1], [0], [0], [1], [0, 0, 1, 1], [], []>} : vector<40x256xbf16>, vector<256x128xbf16>, vector<40x128xf32> -> vector<40x128xf32>
    %c0_80 = arith.constant 0 : index
    %c0_81 = arith.constant 0 : index
    %c0_82 = arith.constant 0 : index
    %196 = vector.load %arg17[%c0_80, %c0_81, %c0_82] : memref<2x1x128xf32, #tpu.memory_space<vmem>>, vector<1x1x128xf32>
    %197 = vector.shape_cast %196 : vector<1x1x128xf32> to vector<1x128xf32>
    %198 = vector.broadcast %197 : vector<1x128xf32> to vector<40x128xf32>
    %199 = arith.addf %195, %198 : vector<40x128xf32>
    %200 = arith.addf %144, %199 : vector<40x128xf32>
    %c1 = arith.constant 1 : index
    %c0_83 = arith.constant 0 : index
    %c0_84 = arith.constant 0 : index
    %201 = vector.load %arg6[%c1, %c0_83, %c0_84] : memref<2x1x128xf32, #tpu.memory_space<vmem>>, vector<1x1x128xf32>
    %202 = vector.shape_cast %201 : vector<1x1x128xf32> to vector<1x128xf32>
    %c1_85 = arith.constant 1 : index
    %c0_86 = arith.constant 0 : index
    %c0_87 = arith.constant 0 : index
    %203 = vector.load %arg7[%c1_85, %c0_86, %c0_87] : memref<2x1x128xf32, #tpu.memory_space<vmem>>, vector<1x1x128xf32>
    %204 = vector.shape_cast %203 : vector<1x1x128xf32> to vector<1x128xf32>
    %cst_88 = arith.constant dense<0.000000e+00> : vector<40xf32>
    %205 = vector.multi_reduction <add>, %200, %cst_88 [1] : vector<40x128xf32> to vector<40xf32>
    %206 = vector.shape_cast %205 : vector<40xf32> to vector<40x1xf32>
    %cst_89 = arith.constant 1.280000e+02 : f32
    %207 = vector.broadcast %cst_89 : f32 to vector<40x1xf32>
    %208 = arith.divf %206, %207 : vector<40x1xf32>
    %209 = vector.broadcast %208 : vector<40x1xf32> to vector<40x128xf32>
    %210 = arith.subf %200, %209 : vector<40x128xf32>
    %211 = arith.mulf %210, %210 : vector<40x128xf32>
    %cst_90 = arith.constant dense<0.000000e+00> : vector<40xf32>
    %212 = vector.multi_reduction <add>, %211, %cst_90 [1] : vector<40x128xf32> to vector<40xf32>
    %213 = vector.shape_cast %212 : vector<40xf32> to vector<40x1xf32>
    %cst_91 = arith.constant 1.280000e+02 : f32
    %214 = vector.broadcast %cst_91 : f32 to vector<40x1xf32>
    %215 = arith.divf %213, %214 : vector<40x1xf32>
    %216 = vector.broadcast %208 : vector<40x1xf32> to vector<40x128xf32>
    %217 = arith.subf %200, %216 : vector<40x128xf32>
    %cst_92 = arith.constant 9.99999974E-6 : f32
    %218 = vector.broadcast %cst_92 : f32 to vector<40x1xf32>
    %219 = arith.addf %215, %218 : vector<40x1xf32>
    %220 = math.rsqrt %219 : vector<40x1xf32>
    %221 = vector.broadcast %220 : vector<40x1xf32> to vector<40x128xf32>
    %222 = arith.mulf %217, %221 : vector<40x128xf32>
    %223 = vector.broadcast %202 : vector<1x128xf32> to vector<40x128xf32>
    %224 = arith.mulf %222, %223 : vector<40x128xf32>
    %225 = vector.broadcast %204 : vector<1x128xf32> to vector<40x128xf32>
    %226 = arith.addf %224, %225 : vector<40x128xf32>
    %227 = arith.truncf %226 : vector<40x128xf32> to vector<40x128xbf16>
    %c1_93 = arith.constant 1 : index
    %c0_94 = arith.constant 0 : index
    %c0_95 = arith.constant 0 : index
    %228 = vector.load %arg8[%c1_93, %c0_94, %c0_95] : memref<2x128x384xbf16, #tpu.memory_space<vmem>>, vector<1x128x384xbf16>
    %229 = vector.shape_cast %228 : vector<1x128x384xbf16> to vector<128x384xbf16>
    %cst_96 = arith.constant dense<0.000000e+00> : vector<40x384xf32>
    %230 = tpu.matmul %227, %229, %cst_96 {dimension_numbers = #tpu.dot_dimension_numbers<[1], [0], [0], [1], [0, 0, 1, 1], [], []>} : vector<40x128xbf16>, vector<128x384xbf16>, vector<40x384xf32> -> vector<40x384xf32>
    %c1_97 = arith.constant 1 : index
    %c0_98 = arith.constant 0 : index
    %c0_99 = arith.constant 0 : index
    %231 = vector.load %arg9[%c1_97, %c0_98, %c0_99] : memref<2x1x384xf32, #tpu.memory_space<vmem>>, vector<1x1x384xf32>
    %232 = vector.shape_cast %231 : vector<1x1x384xf32> to vector<1x384xf32>
    %233 = vector.broadcast %232 : vector<1x384xf32> to vector<40x384xf32>
    %234 = arith.addf %230, %233 : vector<40x384xf32>
    %235 = vector.extract_strided_slice %234 {offsets = [0, 0], sizes = [40, 128], strides = [1, 1]} : vector<40x384xf32> to vector<40x128xf32>
    %236 = vector.extract_strided_slice %234 {offsets = [0, 128], sizes = [40, 128], strides = [1, 1]} : vector<40x384xf32> to vector<40x128xf32>
    %237 = vector.extract_strided_slice %234 {offsets = [0, 256], sizes = [40, 128], strides = [1, 1]} : vector<40x384xf32> to vector<40x128xf32>
    %238 = vector.extract_strided_slice %235 {offsets = [0, 0], sizes = [40, 32], strides = [1, 1]} : vector<40x128xf32> to vector<40x32xf32>
    %cst_100 = arith.constant 0.176776692 : f32
    %239 = vector.broadcast %cst_100 : f32 to vector<40x32xf32>
    %240 = arith.mulf %238, %239 : vector<40x32xf32>
    %241 = arith.truncf %240 : vector<40x32xf32> to vector<40x32xbf16>
    %242 = vector.extract_strided_slice %236 {offsets = [0, 0], sizes = [40, 32], strides = [1, 1]} : vector<40x128xf32> to vector<40x32xf32>
    %243 = arith.truncf %242 : vector<40x32xf32> to vector<40x32xbf16>
    %244 = vector.extract_strided_slice %237 {offsets = [0, 0], sizes = [40, 32], strides = [1, 1]} : vector<40x128xf32> to vector<40x32xf32>
    %245 = arith.truncf %244 : vector<40x32xf32> to vector<40x32xbf16>
    %cst_101 = arith.constant dense<0.000000e+00> : vector<40x40xf32>
    %246 = tpu.matmul %241, %243, %cst_101 {dimension_numbers = #tpu.dot_dimension_numbers<[1], [1], [0], [0], [0, 0, 1, 0], [], []>} : vector<40x32xbf16>, vector<40x32xbf16>, vector<40x40xf32> -> vector<40x40xf32>
    %247 = arith.addf %246, %9 : vector<40x40xf32>
    %cst_102 = arith.constant dense<0xFF800000> : vector<40xf32>
    %248 = vector.multi_reduction <maximumf>, %247, %cst_102 [1] : vector<40x40xf32> to vector<40xf32>
    %249 = vector.shape_cast %248 : vector<40xf32> to vector<40x1xf32>
    %250 = vector.broadcast %249 : vector<40x1xf32> to vector<40x40xf32>
    %251 = arith.subf %247, %250 : vector<40x40xf32>
    %252 = math.exp %251 : vector<40x40xf32>
    %cst_103 = arith.constant dense<0.000000e+00> : vector<40xf32>
    %253 = vector.multi_reduction <add>, %252, %cst_103 [1] : vector<40x40xf32> to vector<40xf32>
    %254 = vector.shape_cast %253 : vector<40xf32> to vector<40x1xf32>
    %255 = tpu.reciprocal %254 {approx = true} : vector<40x1xf32> -> vector<40x1xf32>
    %256 = vector.broadcast %255 : vector<40x1xf32> to vector<40x40xf32>
    %257 = arith.mulf %252, %256 : vector<40x40xf32>
    %258 = arith.truncf %257 : vector<40x40xf32> to vector<40x40xbf16>
    %cst_104 = arith.constant dense<0.000000e+00> : vector<40x32xf32>
    %259 = tpu.matmul %258, %245, %cst_104 {dimension_numbers = #tpu.dot_dimension_numbers<[1], [0], [0], [1], [0, 0, 1, 1], [], []>} : vector<40x40xbf16>, vector<40x32xbf16>, vector<40x32xf32> -> vector<40x32xf32>
    %260 = vector.extract_strided_slice %235 {offsets = [0, 32], sizes = [40, 32], strides = [1, 1]} : vector<40x128xf32> to vector<40x32xf32>
    %cst_105 = arith.constant 0.176776692 : f32
    %261 = vector.broadcast %cst_105 : f32 to vector<40x32xf32>
    %262 = arith.mulf %260, %261 : vector<40x32xf32>
    %263 = arith.truncf %262 : vector<40x32xf32> to vector<40x32xbf16>
    %264 = vector.extract_strided_slice %236 {offsets = [0, 32], sizes = [40, 32], strides = [1, 1]} : vector<40x128xf32> to vector<40x32xf32>
    %265 = arith.truncf %264 : vector<40x32xf32> to vector<40x32xbf16>
    %266 = vector.extract_strided_slice %237 {offsets = [0, 32], sizes = [40, 32], strides = [1, 1]} : vector<40x128xf32> to vector<40x32xf32>
    %267 = arith.truncf %266 : vector<40x32xf32> to vector<40x32xbf16>
    %cst_106 = arith.constant dense<0.000000e+00> : vector<40x40xf32>
    %268 = tpu.matmul %263, %265, %cst_106 {dimension_numbers = #tpu.dot_dimension_numbers<[1], [1], [0], [0], [0, 0, 1, 0], [], []>} : vector<40x32xbf16>, vector<40x32xbf16>, vector<40x40xf32> -> vector<40x40xf32>
    %269 = arith.addf %268, %9 : vector<40x40xf32>
    %cst_107 = arith.constant dense<0xFF800000> : vector<40xf32>
    %270 = vector.multi_reduction <maximumf>, %269, %cst_107 [1] : vector<40x40xf32> to vector<40xf32>
    %271 = vector.shape_cast %270 : vector<40xf32> to vector<40x1xf32>
    %272 = vector.broadcast %271 : vector<40x1xf32> to vector<40x40xf32>
    %273 = arith.subf %269, %272 : vector<40x40xf32>
    %274 = math.exp %273 : vector<40x40xf32>
    %cst_108 = arith.constant dense<0.000000e+00> : vector<40xf32>
    %275 = vector.multi_reduction <add>, %274, %cst_108 [1] : vector<40x40xf32> to vector<40xf32>
    %276 = vector.shape_cast %275 : vector<40xf32> to vector<40x1xf32>
    %277 = tpu.reciprocal %276 {approx = true} : vector<40x1xf32> -> vector<40x1xf32>
    %278 = vector.broadcast %277 : vector<40x1xf32> to vector<40x40xf32>
    %279 = arith.mulf %274, %278 : vector<40x40xf32>
    %280 = arith.truncf %279 : vector<40x40xf32> to vector<40x40xbf16>
    %cst_109 = arith.constant dense<0.000000e+00> : vector<40x32xf32>
    %281 = tpu.matmul %280, %267, %cst_109 {dimension_numbers = #tpu.dot_dimension_numbers<[1], [0], [0], [1], [0, 0, 1, 1], [], []>} : vector<40x40xbf16>, vector<40x32xbf16>, vector<40x32xf32> -> vector<40x32xf32>
    %282 = vector.extract_strided_slice %235 {offsets = [0, 64], sizes = [40, 32], strides = [1, 1]} : vector<40x128xf32> to vector<40x32xf32>
    %cst_110 = arith.constant 0.176776692 : f32
    %283 = vector.broadcast %cst_110 : f32 to vector<40x32xf32>
    %284 = arith.mulf %282, %283 : vector<40x32xf32>
    %285 = arith.truncf %284 : vector<40x32xf32> to vector<40x32xbf16>
    %286 = vector.extract_strided_slice %236 {offsets = [0, 64], sizes = [40, 32], strides = [1, 1]} : vector<40x128xf32> to vector<40x32xf32>
    %287 = arith.truncf %286 : vector<40x32xf32> to vector<40x32xbf16>
    %288 = vector.extract_strided_slice %237 {offsets = [0, 64], sizes = [40, 32], strides = [1, 1]} : vector<40x128xf32> to vector<40x32xf32>
    %289 = arith.truncf %288 : vector<40x32xf32> to vector<40x32xbf16>
    %cst_111 = arith.constant dense<0.000000e+00> : vector<40x40xf32>
    %290 = tpu.matmul %285, %287, %cst_111 {dimension_numbers = #tpu.dot_dimension_numbers<[1], [1], [0], [0], [0, 0, 1, 0], [], []>} : vector<40x32xbf16>, vector<40x32xbf16>, vector<40x40xf32> -> vector<40x40xf32>
    %291 = arith.addf %290, %9 : vector<40x40xf32>
    %cst_112 = arith.constant dense<0xFF800000> : vector<40xf32>
    %292 = vector.multi_reduction <maximumf>, %291, %cst_112 [1] : vector<40x40xf32> to vector<40xf32>
    %293 = vector.shape_cast %292 : vector<40xf32> to vector<40x1xf32>
    %294 = vector.broadcast %293 : vector<40x1xf32> to vector<40x40xf32>
    %295 = arith.subf %291, %294 : vector<40x40xf32>
    %296 = math.exp %295 : vector<40x40xf32>
    %cst_113 = arith.constant dense<0.000000e+00> : vector<40xf32>
    %297 = vector.multi_reduction <add>, %296, %cst_113 [1] : vector<40x40xf32> to vector<40xf32>
    %298 = vector.shape_cast %297 : vector<40xf32> to vector<40x1xf32>
    %299 = tpu.reciprocal %298 {approx = true} : vector<40x1xf32> -> vector<40x1xf32>
    %300 = vector.broadcast %299 : vector<40x1xf32> to vector<40x40xf32>
    %301 = arith.mulf %296, %300 : vector<40x40xf32>
    %302 = arith.truncf %301 : vector<40x40xf32> to vector<40x40xbf16>
    %cst_114 = arith.constant dense<0.000000e+00> : vector<40x32xf32>
    %303 = tpu.matmul %302, %289, %cst_114 {dimension_numbers = #tpu.dot_dimension_numbers<[1], [0], [0], [1], [0, 0, 1, 1], [], []>} : vector<40x40xbf16>, vector<40x32xbf16>, vector<40x32xf32> -> vector<40x32xf32>
    %304 = vector.extract_strided_slice %235 {offsets = [0, 96], sizes = [40, 32], strides = [1, 1]} : vector<40x128xf32> to vector<40x32xf32>
    %cst_115 = arith.constant 0.176776692 : f32
    %305 = vector.broadcast %cst_115 : f32 to vector<40x32xf32>
    %306 = arith.mulf %304, %305 : vector<40x32xf32>
    %307 = arith.truncf %306 : vector<40x32xf32> to vector<40x32xbf16>
    %308 = vector.extract_strided_slice %236 {offsets = [0, 96], sizes = [40, 32], strides = [1, 1]} : vector<40x128xf32> to vector<40x32xf32>
    %309 = arith.truncf %308 : vector<40x32xf32> to vector<40x32xbf16>
    %310 = vector.extract_strided_slice %237 {offsets = [0, 96], sizes = [40, 32], strides = [1, 1]} : vector<40x128xf32> to vector<40x32xf32>
    %311 = arith.truncf %310 : vector<40x32xf32> to vector<40x32xbf16>
    %cst_116 = arith.constant dense<0.000000e+00> : vector<40x40xf32>
    %312 = tpu.matmul %307, %309, %cst_116 {dimension_numbers = #tpu.dot_dimension_numbers<[1], [1], [0], [0], [0, 0, 1, 0], [], []>} : vector<40x32xbf16>, vector<40x32xbf16>, vector<40x40xf32> -> vector<40x40xf32>
    %313 = arith.addf %312, %9 : vector<40x40xf32>
    %cst_117 = arith.constant dense<0xFF800000> : vector<40xf32>
    %314 = vector.multi_reduction <maximumf>, %313, %cst_117 [1] : vector<40x40xf32> to vector<40xf32>
    %315 = vector.shape_cast %314 : vector<40xf32> to vector<40x1xf32>
    %316 = vector.broadcast %315 : vector<40x1xf32> to vector<40x40xf32>
    %317 = arith.subf %313, %316 : vector<40x40xf32>
    %318 = math.exp %317 : vector<40x40xf32>
    %cst_118 = arith.constant dense<0.000000e+00> : vector<40xf32>
    %319 = vector.multi_reduction <add>, %318, %cst_118 [1] : vector<40x40xf32> to vector<40xf32>
    %320 = vector.shape_cast %319 : vector<40xf32> to vector<40x1xf32>
    %321 = tpu.reciprocal %320 {approx = true} : vector<40x1xf32> -> vector<40x1xf32>
    %322 = vector.broadcast %321 : vector<40x1xf32> to vector<40x40xf32>
    %323 = arith.mulf %318, %322 : vector<40x40xf32>
    %324 = arith.truncf %323 : vector<40x40xf32> to vector<40x40xbf16>
    %cst_119 = arith.constant dense<0.000000e+00> : vector<40x32xf32>
    %325 = tpu.matmul %324, %311, %cst_119 {dimension_numbers = #tpu.dot_dimension_numbers<[1], [0], [0], [1], [0, 0, 1, 1], [], []>} : vector<40x40xbf16>, vector<40x32xbf16>, vector<40x32xf32> -> vector<40x32xf32>
    %326 = tpu.concatenate %259, %281, %303, %325 in 1 : vector<40x32xf32>, vector<40x32xf32>, vector<40x32xf32>, vector<40x32xf32> -> vector<40x128xf32>
    %327 = arith.truncf %326 : vector<40x128xf32> to vector<40x128xbf16>
    %c1_120 = arith.constant 1 : index
    %c0_121 = arith.constant 0 : index
    %c0_122 = arith.constant 0 : index
    %328 = vector.load %arg10[%c1_120, %c0_121, %c0_122] : memref<2x128x128xbf16, #tpu.memory_space<vmem>>, vector<1x128x128xbf16>
    %329 = vector.shape_cast %328 : vector<1x128x128xbf16> to vector<128x128xbf16>
    %cst_123 = arith.constant dense<0.000000e+00> : vector<40x128xf32>
    %330 = tpu.matmul %327, %329, %cst_123 {dimension_numbers = #tpu.dot_dimension_numbers<[1], [0], [0], [1], [0, 0, 1, 1], [], []>} : vector<40x128xbf16>, vector<128x128xbf16>, vector<40x128xf32> -> vector<40x128xf32>
    %c1_124 = arith.constant 1 : index
    %c0_125 = arith.constant 0 : index
    %c0_126 = arith.constant 0 : index
    %331 = vector.load %arg11[%c1_124, %c0_125, %c0_126] : memref<2x1x128xf32, #tpu.memory_space<vmem>>, vector<1x1x128xf32>
    %332 = vector.shape_cast %331 : vector<1x1x128xf32> to vector<1x128xf32>
    %333 = vector.broadcast %332 : vector<1x128xf32> to vector<40x128xf32>
    %334 = arith.addf %330, %333 : vector<40x128xf32>
    %335 = arith.addf %200, %334 : vector<40x128xf32>
    %c1_127 = arith.constant 1 : index
    %c0_128 = arith.constant 0 : index
    %c0_129 = arith.constant 0 : index
    %336 = vector.load %arg12[%c1_127, %c0_128, %c0_129] : memref<2x1x128xf32, #tpu.memory_space<vmem>>, vector<1x1x128xf32>
    %337 = vector.shape_cast %336 : vector<1x1x128xf32> to vector<1x128xf32>
    %c1_130 = arith.constant 1 : index
    %c0_131 = arith.constant 0 : index
    %c0_132 = arith.constant 0 : index
    %338 = vector.load %arg13[%c1_130, %c0_131, %c0_132] : memref<2x1x128xf32, #tpu.memory_space<vmem>>, vector<1x1x128xf32>
    %339 = vector.shape_cast %338 : vector<1x1x128xf32> to vector<1x128xf32>
    %cst_133 = arith.constant dense<0.000000e+00> : vector<40xf32>
    %340 = vector.multi_reduction <add>, %335, %cst_133 [1] : vector<40x128xf32> to vector<40xf32>
    %341 = vector.shape_cast %340 : vector<40xf32> to vector<40x1xf32>
    %cst_134 = arith.constant 1.280000e+02 : f32
    %342 = vector.broadcast %cst_134 : f32 to vector<40x1xf32>
    %343 = arith.divf %341, %342 : vector<40x1xf32>
    %344 = vector.broadcast %343 : vector<40x1xf32> to vector<40x128xf32>
    %345 = arith.subf %335, %344 : vector<40x128xf32>
    %346 = arith.mulf %345, %345 : vector<40x128xf32>
    %cst_135 = arith.constant dense<0.000000e+00> : vector<40xf32>
    %347 = vector.multi_reduction <add>, %346, %cst_135 [1] : vector<40x128xf32> to vector<40xf32>
    %348 = vector.shape_cast %347 : vector<40xf32> to vector<40x1xf32>
    %cst_136 = arith.constant 1.280000e+02 : f32
    %349 = vector.broadcast %cst_136 : f32 to vector<40x1xf32>
    %350 = arith.divf %348, %349 : vector<40x1xf32>
    %351 = vector.broadcast %343 : vector<40x1xf32> to vector<40x128xf32>
    %352 = arith.subf %335, %351 : vector<40x128xf32>
    %cst_137 = arith.constant 9.99999974E-6 : f32
    %353 = vector.broadcast %cst_137 : f32 to vector<40x1xf32>
    %354 = arith.addf %350, %353 : vector<40x1xf32>
    %355 = math.rsqrt %354 : vector<40x1xf32>
    %356 = vector.broadcast %355 : vector<40x1xf32> to vector<40x128xf32>
    %357 = arith.mulf %352, %356 : vector<40x128xf32>
    %358 = vector.broadcast %337 : vector<1x128xf32> to vector<40x128xf32>
    %359 = arith.mulf %357, %358 : vector<40x128xf32>
    %360 = vector.broadcast %339 : vector<1x128xf32> to vector<40x128xf32>
    %361 = arith.addf %359, %360 : vector<40x128xf32>
    %362 = arith.truncf %361 : vector<40x128xf32> to vector<40x128xbf16>
    %c1_138 = arith.constant 1 : index
    %c0_139 = arith.constant 0 : index
    %c0_140 = arith.constant 0 : index
    %363 = vector.load %arg14[%c1_138, %c0_139, %c0_140] : memref<2x128x256xbf16, #tpu.memory_space<vmem>>, vector<1x128x256xbf16>
    %364 = vector.shape_cast %363 : vector<1x128x256xbf16> to vector<128x256xbf16>
    %cst_141 = arith.constant dense<0.000000e+00> : vector<40x256xf32>
    %365 = tpu.matmul %362, %364, %cst_141 {dimension_numbers = #tpu.dot_dimension_numbers<[1], [0], [0], [1], [0, 0, 1, 1], [], []>} : vector<40x128xbf16>, vector<128x256xbf16>, vector<40x256xf32> -> vector<40x256xf32>
    %c1_142 = arith.constant 1 : index
    %c0_143 = arith.constant 0 : index
    %c0_144 = arith.constant 0 : index
    %366 = vector.load %arg15[%c1_142, %c0_143, %c0_144] : memref<2x1x256xf32, #tpu.memory_space<vmem>>, vector<1x1x256xf32>
    %367 = vector.shape_cast %366 : vector<1x1x256xf32> to vector<1x256xf32>
    %368 = vector.broadcast %367 : vector<1x256xf32> to vector<40x256xf32>
    %369 = arith.addf %365, %368 : vector<40x256xf32>
    %370 = arith.mulf %369, %369 : vector<40x256xf32>
    %371 = arith.mulf %369, %370 : vector<40x256xf32>
    %cst_145 = arith.constant 4.471500e-02 : f32
    %372 = vector.broadcast %cst_145 : f32 to vector<40x256xf32>
    %373 = arith.mulf %372, %371 : vector<40x256xf32>
    %374 = arith.addf %369, %373 : vector<40x256xf32>
    %cst_146 = arith.constant 0.797884583 : f32
    %375 = vector.broadcast %cst_146 : f32 to vector<40x256xf32>
    %376 = arith.mulf %375, %374 : vector<40x256xf32>
    %377 = math.tanh %376 : vector<40x256xf32>
    %cst_147 = arith.constant 1.000000e+00 : f32
    %378 = vector.broadcast %cst_147 : f32 to vector<40x256xf32>
    %379 = arith.addf %378, %377 : vector<40x256xf32>
    %cst_148 = arith.constant 5.000000e-01 : f32
    %380 = vector.broadcast %cst_148 : f32 to vector<40x256xf32>
    %381 = arith.mulf %380, %379 : vector<40x256xf32>
    %382 = arith.mulf %369, %381 : vector<40x256xf32>
    %383 = arith.truncf %382 : vector<40x256xf32> to vector<40x256xbf16>
    %c1_149 = arith.constant 1 : index
    %c0_150 = arith.constant 0 : index
    %c0_151 = arith.constant 0 : index
    %384 = vector.load %arg16[%c1_149, %c0_150, %c0_151] : memref<2x256x128xbf16, #tpu.memory_space<vmem>>, vector<1x256x128xbf16>
    %385 = vector.shape_cast %384 : vector<1x256x128xbf16> to vector<256x128xbf16>
    %cst_152 = arith.constant dense<0.000000e+00> : vector<40x128xf32>
    %386 = tpu.matmul %383, %385, %cst_152 {dimension_numbers = #tpu.dot_dimension_numbers<[1], [0], [0], [1], [0, 0, 1, 1], [], []>} : vector<40x256xbf16>, vector<256x128xbf16>, vector<40x128xf32> -> vector<40x128xf32>
    %c1_153 = arith.constant 1 : index
    %c0_154 = arith.constant 0 : index
    %c0_155 = arith.constant 0 : index
    %387 = vector.load %arg17[%c1_153, %c0_154, %c0_155] : memref<2x1x128xf32, #tpu.memory_space<vmem>>, vector<1x1x128xf32>
    %388 = vector.shape_cast %387 : vector<1x1x128xf32> to vector<1x128xf32>
    %389 = vector.broadcast %388 : vector<1x128xf32> to vector<40x128xf32>
    %390 = arith.addf %386, %389 : vector<40x128xf32>
    %391 = arith.addf %335, %390 : vector<40x128xf32>
    %392 = arith.truncf %391 : vector<40x128xf32> to vector<40x128xbf16>
    %c0_156 = arith.constant 0 : index
    %c0_157 = arith.constant 0 : index
    %393 = vector.load %arg18[%c0_156, %c0_157] : memref<128x32xbf16, #tpu.memory_space<vmem>>, vector<128x32xbf16>
    %cst_158 = arith.constant dense<0.000000e+00> : vector<40x32xf32>
    %394 = tpu.matmul %392, %393, %cst_158 {dimension_numbers = #tpu.dot_dimension_numbers<[1], [0], [0], [1], [0, 0, 1, 1], [], []>} : vector<40x128xbf16>, vector<128x32xbf16>, vector<40x32xf32> -> vector<40x32xf32>
    %c0_159 = arith.constant 0 : index
    %c0_160 = arith.constant 0 : index
    %395 = vector.load %arg19[%c0_159, %c0_160] : memref<1x32xf32, #tpu.memory_space<vmem>>, vector<1x32xf32>
    %396 = vector.broadcast %395 : vector<1x32xf32> to vector<40x32xf32>
    %397 = arith.addf %394, %396 : vector<40x32xf32>
    %c0_161 = arith.constant 0 : index
    %c0_162 = arith.constant 0 : index
    %398 = vector.load %arg20[%c0_161, %c0_162] : memref<40x32xf32, #tpu.memory_space<vmem>>, vector<40x32xf32>
    tpu.vector_store %arg20[%c0_161, %c0_162], %397 {strides = array<i32>} : memref<40x32xf32, #tpu.memory_space<vmem>>, vector<40x32xf32>,
    return
  }
  func.func @transform_0(%arg0: i32) -> (i32, i32) {
    %c0_i32 = arith.constant 0 : i32
    %c0_i32_0 = arith.constant 0 : i32
    %c0_i32_1 = arith.constant 0 : i32
    return %c0_i32, %c0_i32_0 : i32, i32
  }
  func.func @transform_1(%arg0: i32) -> (i32, i32) {
    %c0_i32 = arith.constant 0 : i32
    %c0_i32_0 = arith.constant 0 : i32
    %c0_i32_1 = arith.constant 0 : i32
    return %c0_i32, %c0_i32_0 : i32, i32
  }
  func.func @transform_2(%arg0: i32) -> (i32, i32) {
    %c0_i32 = arith.constant 0 : i32
    %c0_i32_0 = arith.constant 0 : i32
    %c0_i32_1 = arith.constant 0 : i32
    return %c0_i32, %c0_i32_0 : i32, i32
  }
  func.func @transform_3(%arg0: i32) -> (i32, i32) {
    %c0_i32 = arith.constant 0 : i32
    %c0_i32_0 = arith.constant 0 : i32
    %c0_i32_1 = arith.constant 0 : i32
    return %c0_i32, %c0_i32_0 : i32, i32
  }
  func.func @transform_4(%arg0: i32) -> (i32, i32) {
    %c0_i32 = arith.constant 0 : i32
    %c0_i32_0 = arith.constant 0 : i32
    %c0_i32_1 = arith.constant 0 : i32
    return %c0_i32, %c0_i32_0 : i32, i32
  }
  func.func @transform_5(%arg0: i32) -> (i32, i32, i32) {
    %c0_i32 = arith.constant 0 : i32
    %c0_i32_0 = arith.constant 0 : i32
    %c0_i32_1 = arith.constant 0 : i32
    %c0_i32_2 = arith.constant 0 : i32
    return %c0_i32, %c0_i32_0, %c0_i32_1 : i32, i32, i32
  }
  func.func @transform_6(%arg0: i32) -> (i32, i32, i32) {
    %c0_i32 = arith.constant 0 : i32
    %c0_i32_0 = arith.constant 0 : i32
    %c0_i32_1 = arith.constant 0 : i32
    %c0_i32_2 = arith.constant 0 : i32
    return %c0_i32, %c0_i32_0, %c0_i32_1 : i32, i32, i32
  }
  func.func @transform_7(%arg0: i32) -> (i32, i32, i32) {
    %c0_i32 = arith.constant 0 : i32
    %c0_i32_0 = arith.constant 0 : i32
    %c0_i32_1 = arith.constant 0 : i32
    %c0_i32_2 = arith.constant 0 : i32
    return %c0_i32, %c0_i32_0, %c0_i32_1 : i32, i32, i32
  }
  func.func @transform_8(%arg0: i32) -> (i32, i32, i32) {
    %c0_i32 = arith.constant 0 : i32
    %c0_i32_0 = arith.constant 0 : i32
    %c0_i32_1 = arith.constant 0 : i32
    %c0_i32_2 = arith.constant 0 : i32
    return %c0_i32, %c0_i32_0, %c0_i32_1 : i32, i32, i32
  }
  func.func @transform_9(%arg0: i32) -> (i32, i32, i32) {
    %c0_i32 = arith.constant 0 : i32
    %c0_i32_0 = arith.constant 0 : i32
    %c0_i32_1 = arith.constant 0 : i32
    %c0_i32_2 = arith.constant 0 : i32
    return %c0_i32, %c0_i32_0, %c0_i32_1 : i32, i32, i32
  }
  func.func @transform_10(%arg0: i32) -> (i32, i32, i32) {
    %c0_i32 = arith.constant 0 : i32
    %c0_i32_0 = arith.constant 0 : i32
    %c0_i32_1 = arith.constant 0 : i32
    %c0_i32_2 = arith.constant 0 : i32
    return %c0_i32, %c0_i32_0, %c0_i32_1 : i32, i32, i32
  }
  func.func @transform_11(%arg0: i32) -> (i32, i32, i32) {
    %c0_i32 = arith.constant 0 : i32
    %c0_i32_0 = arith.constant 0 : i32
    %c0_i32_1 = arith.constant 0 : i32
    %c0_i32_2 = arith.constant 0 : i32
    return %c0_i32, %c0_i32_0, %c0_i32_1 : i32, i32, i32
  }
  func.func @transform_12(%arg0: i32) -> (i32, i32, i32) {
    %c0_i32 = arith.constant 0 : i32
    %c0_i32_0 = arith.constant 0 : i32
    %c0_i32_1 = arith.constant 0 : i32
    %c0_i32_2 = arith.constant 0 : i32
    return %c0_i32, %c0_i32_0, %c0_i32_1 : i32, i32, i32
  }
  func.func @transform_13(%arg0: i32) -> (i32, i32, i32) {
    %c0_i32 = arith.constant 0 : i32
    %c0_i32_0 = arith.constant 0 : i32
    %c0_i32_1 = arith.constant 0 : i32
    %c0_i32_2 = arith.constant 0 : i32
    return %c0_i32, %c0_i32_0, %c0_i32_1 : i32, i32, i32
  }
  func.func @transform_14(%arg0: i32) -> (i32, i32, i32) {
    %c0_i32 = arith.constant 0 : i32
    %c0_i32_0 = arith.constant 0 : i32
    %c0_i32_1 = arith.constant 0 : i32
    %c0_i32_2 = arith.constant 0 : i32
    return %c0_i32, %c0_i32_0, %c0_i32_1 : i32, i32, i32
  }
  func.func @transform_15(%arg0: i32) -> (i32, i32, i32) {
    %c0_i32 = arith.constant 0 : i32
    %c0_i32_0 = arith.constant 0 : i32
    %c0_i32_1 = arith.constant 0 : i32
    %c0_i32_2 = arith.constant 0 : i32
    return %c0_i32, %c0_i32_0, %c0_i32_1 : i32, i32, i32
  }
  func.func @transform_16(%arg0: i32) -> (i32, i32, i32) {
    %c0_i32 = arith.constant 0 : i32
    %c0_i32_0 = arith.constant 0 : i32
    %c0_i32_1 = arith.constant 0 : i32
    %c0_i32_2 = arith.constant 0 : i32
    return %c0_i32, %c0_i32_0, %c0_i32_1 : i32, i32, i32
  }
  func.func @transform_17(%arg0: i32) -> (i32, i32) {
    %c0_i32 = arith.constant 0 : i32
    %c0_i32_0 = arith.constant 0 : i32
    %c0_i32_1 = arith.constant 0 : i32
    return %c0_i32, %c0_i32_0 : i32, i32
  }
  func.func @transform_18(%arg0: i32) -> (i32, i32) {
    %c0_i32 = arith.constant 0 : i32
    %c0_i32_0 = arith.constant 0 : i32
    %c0_i32_1 = arith.constant 0 : i32
    return %c0_i32, %c0_i32_0 : i32, i32
  }
  func.func @transform_19(%arg0: i32) -> (i32, i32) {
    %c0_i32 = arith.constant 0 : i32
    %c0_i32_0 = arith.constant 0 : i32
    %c0_i32_1 = arith.constant 0 : i32
    return %c0_i32, %c0_i32_0 : i32, i32
  }
}

</mosaic_0001>

<bundles_post_ra>
// kernel: tile.7
= control target key start
LH: loop header
LB: loop body
LE: loop exit
PB: predicated region body
PF: predicated region fallthrough
CT: control target
= control target key end

     0   :  { %s80_s0 = inlined_call_operand.vmem [shape: f32[2,20,128], index: 0, kind: input, shape index: {}]   ;;  %s81_s1 = inlined_call_operand.vmem [shape: f32[40,128], index: 1, kind: output, shape index: {}]  }
   0x1   :  { %v2_v0 = vld [vmem:[%s80_s0] sm:$0xff]   ;;  %v24_v1 = vld [vmem:[%s80_s0 + $0x8] sm:$0xff]   ;;  %v26_v2 = vld [vmem:[%s80_s0 + $0x10] sm:$0xf]  }
   0x2   :  { %3 = vst [vmem:[%s81_s1] sm:$0xff] %v2_v0   ;;  %v28_v3 = vld [vmem:[%s80_s0 + $0x18] sm:$0xff]   ;;  %v30_v4 = vld [vmem:[%s80_s0 + $0x20] sm:$0xff]   ;;  %v32_v5 = vld [vmem:[%s80_s0 + $0x28] sm:$0xf]  }
   0x3   :  { %25 = vst [vmem:[%s81_s1 + $0x8] sm:$0xff] %v24_v1  }
   0x4   :  { %27 = vst [vmem:[%s81_s1 + $0x10] sm:$0xf] %v26_v2  }
   0x5   :  { %29 = vst [vmem:[%s81_s1 + $0x14] sm:$0xff] %v28_v3  }
   0x6   :  { %31 = vst [vmem:[%s81_s1 + $0x1c] sm:$0xff] %v30_v4  }
   0x7   :  { %33 = vst [vmem:[%s81_s1 + $0x24] sm:$0xf] %v32_v5  }

// kernel: eq.8
= control target key start
LH: loop header
LB: loop body
LE: loop exit
PB: predicated region body
PF: predicated region fallthrough
CT: control target
= control target key end

     0   :  { %vm7_vm0 = vcmask 162816   ;;  %vm13_vm1 = vcmask 326816   ;;  %s39_s0 = inlined_call_operand.vmem [shape: s32[2,20], index: 0, kind: input, shape index: {}]   ;;  %s40_s1 = inlined_call_operand.vmem [shape: s32[40], index: 1, kind: output, shape index: {}]  }
   0x1   :  { %v4_v0 = vld [vmem:[%s39_s0] sm:$0x3]  ;;  %s22_s0 = smov 20  }
   0x2   :  { %5 = vst [vmem:[#allocation1] sm:$0x3] %v4_v0 }
   0x9   :  { %v10_v1 = vld [vmem:[#allocation1 + $0x1] sm:$0x1]   ;;  %v6_v2 = vld [vmem:[#allocation1] sm:$0x1]  }
   0xa   :  { %11 = vrot.lane.b32.xlu0 %v10_v1, %s22_s0  ;;  %8 = vst.msk [vmem:[#allocation0] sm:$0x1] %vm7_vm0, %v6_v2  }
  0x7c   :  { %v12_v3 = vpop.permute.xlu0 %11  }
  0x7d   :  { %14 = vst.msk [vmem:[#allocation0] sm:$0x1] %vm13_vm1, %v12_v3  }
  0x84   :  { %v17_v4 = vld [vmem:[#allocation0] sm:$0x1] }
  0x85   :  { %20 = vst [vmem:[%s40_s1] sm:$0x1] %v17_v4 }

// kernel: vanilla_transformer_predictor.1
= control target key start
LH: loop header
LB: loop body
LE: loop exit
PB: predicated region body
PF: predicated region fallthrough
CT: control target
= control target key end

     0   :  { %s6598_s0 = inlined_call_operand.vmem [shape: f32[40,32], index: 0, kind: input, shape index: {}]   ;;  %s6599_s1 = inlined_call_operand.vmem [shape: f32[40,128], index: 1, kind: input, shape index: {}]   ;;  %s6600_s2 = inlined_call_operand.vmem [shape: f32[40,40], index: 2, kind: input, shape index: {}]   ;;  %s6601_s3 = inlined_call_operand.vmem [shape: bf16[32,128], index: 3, kind: input, shape index: {}]   ;;  %s6602_s4 = inlined_call_operand.vmem [shape: f32[1,128], index: 4, kind: input, shape index: {}]   ;;  %s6603_s5 = inlined_call_operand.vmem [shape: f32[2,1,128], index: 5, kind: input, shape index: {}]   ;;  %s6604_s6 = inlined_call_operand.vmem [shape: f32[2,1,128], index: 6, kind: input, shape index: {}]   ;;  %s6605_s7 = inlined_call_operand.vmem [shape: bf16[2,128,384], index: 7, kind: input, shape index: {}]   ;;  %s6606_s8 = inlined_call_operand.vmem [shape: f32[2,1,384], index: 8, kind: input, shape index: {}]   ;;  %s6607_s9 = inlined_call_operand.vmem [shape: bf16[2,128,128], index: 9, kind: input, shape index: {}]   ;;  %s6608_s10 = inlined_call_operand.vmem [shape: f32[2,1,128], index: 10, kind: input, shape index: {}]   ;;  %s6609_s11 = inlined_call_operand.vmem [shape: f32[2,1,128], index: 11, kind: input, shape index: {}]   ;;  %s6610_s12 = inlined_call_operand.vmem [shape: f32[2,1,128], index: 12, kind: input, shape index: {}]   ;;  %s6611_s13 = inlined_call_operand.hbm [shape: bf16[2,128,256], index: 13, kind: input, shape index: {}]   ;;  %s6612_s14 = inlined_call_operand.vmem [shape: f32[2,1,256], index: 14, kind: input, shape index: {}]   ;;  %s6613_s15 = inlined_call_operand.hbm [shape: bf16[2,256,128], index: 15, kind: input, shape index: {}]   ;;  %s6614_s16 = inlined_call_operand.vmem [shape: f32[2,1,128], index: 16, kind: input, shape index: {}]   ;;  %s6615_s17 = inlined_call_operand.vmem [shape: bf16[128,32], index: 17, kind: input, shape index: {}]   ;;  %s6616_s18 = inlined_call_operand.vmem [shape: f32[1,32], index: 18, kind: input, shape index: {}]   ;;  %s6617_s19 = inlined_call_operand.hbm [shape: f32[40,32], index: 19, kind: output, shape index: {}]  }
   0x1   :  { %6622 = sst [smem:[#allocation11_spill]] %s6598_s0 }
   0x2   :  { %6623 = sst [smem:[#allocation12_spill]] %s6599_s1 }
   0x3   :  { %6624 = sst [smem:[#allocation13_spill]] %s6600_s2 }
   0x4   :  { %6625 = sst [smem:[#allocation14_spill]] %s6601_s3 }
   0x5   :  { %24 = vsyncpa [#allocation3], 0 }
   0x6   :  { %25 = vsyncpa [#allocation6], 0 }
   0x7   :  { %26 = vsyncpa [#allocation4], 0  ;;  %s57_s20 = sshll.u32 %s6611_s13, 4  ;;  %s4929_s21 = smov [#allocation2]   ;;  %s58_s20 = int_to_ptr.hbm [resolvable:$true] %s57_s20 }
   0x8   :  { %s59_s1 = sshll.u32 %s4929_s21, 4  ;;  %s72_s23 = sshll.u32 %s6613_s15, 4  ;;  %s60_s1 = int_to_ptr.vmem [resolvable:$true] %s59_s1  ;;  %s73_s23 = int_to_ptr.hbm [resolvable:$true] %s72_s23 }
   0x9   :  { %s4930_s24 = smov 128   ;;  %s4931_s25 = smov 8  }
   0xa   :  { %65 = dma.hbm_to_vmem [thread:$0]  %s58_s20, 4096, %s60_s1, [#allocation3], %s4930_s24, %s4930_s24, %s4931_s25  }
   0xb   :  { %s4932_s3 = smov [#allocation5]   ;;  %s4933_s27 = smov 64  }
   0xc   :  { %s74_s26 = sshll.u32 %s4932_s3, 4  ;;  %s4934_s13 = smov 4   ;;  %s75_s26 = int_to_ptr.vmem [resolvable:$true] %s74_s26 }
   0xd   :  { %80 = dma.hbm_to_vmem [thread:$0]  %s73_s23, 4096, %s75_s26, [#allocation6], %s4933_s27, %s4933_s27, %s4934_s13  }
   0xe   :  { %4923 = dma.done.wait [#allocation3], 4096  }
   0xf   :  { %4924 = vsyncadd [#allocation3], 4294963200 }
  0x10   :  { %4925 = dma.done.wait [#allocation6], 4096  }
  0x11   :  { %4926 = vsyncadd [#allocation6], 4294963200  ;;  %s6626_s29 = sld [smem:[#allocation14_spill]]  ;;  %vm124_vm0 = vcmask 261120   ;;  %v4590_v11 = vld [vmem:[%s6602_s4] ss:$0 sm:$0xff] }
  0x12   :  { %s6627_s1 = sld [smem:[#allocation11_spill]]  ;;  %v4935_v32 = vmov 128.0   ;;  %v3809_v59 = vld [vmem:[%s6605_s7 + $0xa8] sm:$0xf]  ;;  %v4395_v60 = vld [vmem:[%s6605_s7 + $0xb0] sm:$0xf0] }
  0x13   :  { %s6628_s21 = sld [smem:[#allocation12_spill]]  ;;  %4604 = vrcp.f32 %v4935_v32  ;;  %v3810_v61 = vor.u32 %v4395_v60, %v3809_v59  ;;  %v3797_v62 = vld [vmem:[%s6605_s7 + $0x90] sm:$0xf]  ;;  %v4392_v63 = vld [vmem:[%s6605_s7 + $0x98] sm:$0xf0]  ;;  %s4936_s3 = smov 96  }
  0x14   :  { %v3725_v32 = vld [vmem:[%s6605_s7] sm:$0xf]  ;;  %v4381_v59 = vld [vmem:[%s6605_s7 + $0x40] sm:$0xf0]  ;;  %s4937_s26 = smov 32   ;;  %s6631_s28 = sld [smem:[#allocation13_spill]] }
  0x15   :  { %4509 = vmatpush.bf16.msra.mxu2 %v3810_v61  ;;  %468 = vmatpush.bf16.msra.mxu1 %v3810_v61  ;;  %s3698_s2 = sshll.u32 %s6617_s19, 4  ;;  %s3699_s2 = int_to_ptr.hbm [resolvable:$true] %s3698_s2 }
  0x17   :  { %v4372_v0 = vld [vmem:[%s6626_s29 + $0x8] sm:$0xff]  ;;  %v4371_v1 = vld [vmem:[%s6626_s29] sm:$0xff] }
  0x18   :  { %v96_v2 = vld [vmem:[%s6627_s1] sm:$0xff]  ;;  %140 = vmatpush.bf16.msra.mxu0 %v4372_v0  ;;  %v97_v3 = vld [vmem:[%s6627_s1 + $0x8] sm:$0xff]  ;;  %v98_v5 = vld [vmem:[%s6627_s1 + $0x10] sm:$0xff]  ;;  %v3798_v0 = vor.u32 %v4392_v63, %v3797_v62 }
  0x19   :  { %v101_v4 = vpack.c.bf16 %v97_v3, %v96_v2  ;;  %v99_v6 = vld [vmem:[%s6627_s1 + $0x18] sm:$0xff]  ;;  %v100_v8 = vld [vmem:[%s6627_s1 + $0x20] sm:$0xff]  ;;  %v158_v13 = vld [vmem:[%s6628_s21 + $0x8] sm:$0xff]  ;;  %v4605_v33 = vpop.eup %4604 }
  0x1a   :  { %v102_v7 = vpack.c.bf16 %v99_v6, %v98_v5  ;;  %v103_v9 = vpack.c.bf16 %v100_v8, %v100_v8  ;;  %v159_v17 = vld [vmem:[%s6628_s21 + $0x10] sm:$0xff]  ;;  %v160_v21 = vld [vmem:[%s6628_s21 + $0x18] sm:$0xff]  ;;  %v161_v25 = vld [vmem:[%s6628_s21 + $0x20] sm:$0xff]  ;;  %v185_v34 = vmul.f32 128.0, %v4605_v33  ;;  %vm189_vm1 = vweird.f32 %v4605_v33  ;;  %4510 = vmatpush.bf16.msra.mxu2 %v3798_v0  ;;  %469 = vmatpush.bf16.msra.mxu1 %v3798_v0 }
  0x1b   :  { %v157_v29 = vld [vmem:[%s6628_s21] sm:$0xff]  ;;  %v4386_v5 = vld [vmem:[%s6605_s7 + $0x68] sm:$0xf0]  ;;  %v4383_v8 = vld [vmem:[%s6605_s7 + $0x50] sm:$0xf0] }
  0x1c   :  { %141 = vmatpush.bf16.msra.mxu0 %v4371_v1  ;;  %v186_v35 = vsub.f32 1.0, %v185_v34  ;;  %v3785_v1 = vld [vmem:[%s6605_s7 + $0x78] sm:$0xf]  ;;  %v4389_v2 = vld [vmem:[%s6605_s7 + $0x80] sm:$0xf0] }
  0x1d   :  { %v3786_v3 = vor.u32 %v4389_v2, %v3785_v1  ;;  %v3781_v34 = vld [vmem:[%s6605_s7 + $0x68] sm:$0xf]  ;;  %v4388_v63 = vld [vmem:[%s6605_s7 + $0x7c] sm:$0xf]  ;;  %v3745_v1 = vld [vmem:[%s6605_s7 + $0x20] sm:$0xf] }
  0x1e   :  { %v187_v36 = vmul.f32 %v4605_v33, %v186_v35  ;;  %v3787_v0 = vld [vmem:[%s6605_s7 + $0x84] sm:$0xf0] }
  0x1f   :  { %3720 = vmatmul.msk.bf16.vlgmr.msra.gmra.mxu0 %vm124_vm0, %v101_v4  ;;  %4511 = vmatpush.bf16.msra.mxu2 %v3786_v3  ;;  %v3773_v4 = vld [vmem:[%s6605_s7 + $0x60] sm:$0xf]  ;;  %v3790_v2 = vor.u32 %v4388_v63, %v3787_v0 }
  0x20   :  { %v188_v37 = vadd.f32 %v4605_v33, %v187_v36  ;;  %470 = vmatpush.bf16.msra.mxu1 %v3786_v3  ;;  %v3774_v6 = vor.u32 %v4386_v5, %v3773_v4  ;;  %v4378_v3 = vld [vmem:[%s6605_s7 + $0x28] sm:$0xf0]  ;;  %v4385_v4 = vld [vmem:[%s6605_s7 + $0x64] sm:$0xf]  ;;  %v3775_v5 = vld [vmem:[%s6605_s7 + $0x6c] sm:$0xf0] }
  0x21   :  { %v4592_v63 = vld [vmem:[%s6604_s6] ss:$0 sm:$0xff] }
  0x22   :  { %v5107_v38 = vsel %vm189_vm1, %v4605_v33, %v188_v37  ;;  %v4374_v33 = vld [vmem:[%s6605_s7 + $0x8] sm:$0xf0]  ;;  %v4387_v37 = vld [vmem:[%s6605_s7 + $0x70] sm:$0xf0] }
  0x23   :  { %4512 = vmatpush.bf16.msra.mxu2 %v3774_v6  ;;  %v3726_v36 = vor.u32 %v4374_v33, %v3725_v32 }
  0x24   :  { %471 = vmatpush.bf16.msra.mxu1 %v3774_v6 }
  0x2f   :  { %3721 = vmatmul.msk.bf16.gmra.mxu0 %vm124_vm0, %v102_v7  ;;  %v3761_v7 = vld [vmem:[%s6605_s7 + $0x48] sm:$0xf] }
  0x3f   :  { %3722 = vmatmul.msk.bf16.gmra.mxu0 %vm124_vm0, %v103_v9  ;;  %v3817_v9 = vld [vmem:[%s6605_s7 + $0xb0] sm:$0xf] }
  0x9c   :  { %v143_v10 = vpop.f32.mrf.mxu0 }
  0x9d   :  { %v144_v28 = vadd.f32 %v4590_v11, %v143_v10  ;;  %v3762_v10 = vor.u32 %v4383_v8, %v3761_v7 }
  0x9f   :  { %v5104_v31 = vadd.f32 %v157_v29, %v144_v28  ;;  %4513 = vmatpush.bf16.msra.mxu2 %v3762_v10  ;;  %472 = vmatpush.bf16.msra.mxu1 %v3762_v10  ;;  %v3733_v10 = vld [vmem:[%s6605_s7 + $0x8] sm:$0xf] }
  0xa4   :  { %v145_v12 = vpop.f32.mrf.mxu0 }
  0xa5   :  { %v146_v14 = vadd.f32 %v4590_v11, %v145_v12 }
  0xa7   :  { %v5080_v15 = vadd.f32 %v158_v13, %v146_v14  ;;  %v3749_v13 = vld [vmem:[%s6605_s7 + $0x30] sm:$0xf]  ;;  %v4380_v14 = vld [vmem:[%s6605_s7 + $0x38] sm:$0xf0] }
  0xa9   :  { %176 = vadd.xlane.f32.xlu2 %v5080_v15 }
  0xac   :  { %v148_v16 = vpop.f32.mrf.mxu0 }
  0xad   :  { %v149_v18 = vadd.f32 %v4590_v11, %v148_v16  ;;  %v3805_v16 = vld [vmem:[%s6605_s7 + $0x98] sm:$0xf] }
  0xaf   :  { %v5086_v19 = vadd.f32 %v159_v17, %v149_v18  ;;  %v3750_v17 = vor.u32 %v4380_v14, %v3749_v13  ;;  %v4393_v18 = vld [vmem:[%s6605_s7 + $0xa0] sm:$0xf0]  ;;  %v3778_v14 = vor.u32 %v4385_v4, %v3775_v5 }
  0xb1   :  { %178 = vadd.xlane.f32.xlu0 %v5086_v19  ;;  %4514 = vmatpush.bf16.msra.mxu2 %v3750_v17 }
  0xb2   :  { %473 = vmatpush.bf16.msra.mxu1 %v3750_v17 }
  0xb4   :  { %v150_v20 = vpop.f32.mrf.mxu0 }
  0xb5   :  { %v151_v22 = vadd.f32 %v4590_v11, %v150_v20  ;;  %v3806_v20 = vor.u32 %v4393_v18, %v3805_v16 }
  0xb7   :  { %v5092_v23 = vadd.f32 %v160_v21, %v151_v22  ;;  %v3737_v21 = vld [vmem:[%s6605_s7 + $0x18] sm:$0xf]  ;;  %v4377_v22 = vld [vmem:[%s6605_s7 + $0x20] sm:$0xf0] }
  0xb9   :  { %180 = vadd.xlane.f32.xlu0 %v5092_v23 }
  0xbc   :  { %v153_v24 = vpop.f32.mrf.mxu0 }
  0xbd   :  { %v154_v26 = vadd.f32 %v4590_v11, %v153_v24  ;;  %v4396_v11 = vld [vmem:[%s6605_s7 + $0xb8] sm:$0xf0]  ;;  %v3793_v24 = vld [vmem:[%s6605_s7 + $0x80] sm:$0xf] }
  0xbe   :  { %v3818_v12 = vor.u32 %v4396_v11, %v3817_v9  ;;  %v3746_v9 = vor.u32 %v4378_v3, %v3745_v1  ;;  %v4375_v11 = vld [vmem:[%s6605_s7 + $0x10] sm:$0xf0] }
  0xbf   :  { %v5098_v27 = vadd.f32 %v161_v25, %v154_v26  ;;  %v3738_v25 = vor.u32 %v4377_v22, %v3737_v21  ;;  %v4390_v26 = vld [vmem:[%s6605_s7 + $0x88] sm:$0xf0]  ;;  %v3734_v17 = vor.u32 %v4375_v11, %v3733_v10 }
  0xc0   :  { %514 = vmatpush.bf16.msra.mxu3 %v3818_v12  ;;  %v3794_v29 = vor.u32 %v4390_v26, %v3793_v24  ;;  %v4382_v26 = vld [vmem:[%s6605_s7 + $0x4c] sm:$0xf] }
  0xc1   :  { %182 = vadd.xlane.f32.xlu1 %v5098_v27  ;;  %4515 = vmatpush.bf16.msra.mxu2 %v3738_v25 }
  0xc2   :  { %474 = vmatpush.bf16.msra.mxu1 %v3738_v25 }
  0xc4   :  { %v155_v30 = vpop.f32.mrf.mxu0  ;;  %515 = vmatpush.bf16.msra.mxu3 %v3806_v20 }
  0xc5   :  { %4516 = vmatpush.bf16.msra.mxu2 %v3726_v36 }
  0xc6   :  { %475 = vmatpush.bf16.msra.mxu1 %v3726_v36  ;;  %v3751_v36 = vld [vmem:[%s6605_s7 + $0x3c] sm:$0xf0] }
  0xc8   :  { %516 = vmatpush.bf16.msra.mxu3 %v3794_v29 }
  0xc9   :  { %174 = vadd.xlane.f32.xlu1 %v5104_v31 }
 0x11c   :  { %v177_v45 = vpop.xlane.xlu2 %176 }
 0x11d   :  { %v192_v47 = vmul.f32 %v5107_v38, %v177_v45  ;;  %v4384_v45 = vld [vmem:[%s6605_s7 + $0x58] sm:$0xf0] }
 0x11f   :  { %v5124_v51 = vsub.f32 %v5080_v15, %v192_v47 }
 0x121   :  { %v202_v53 = vmul.f32 %v5124_v51, %v5124_v51 }
 0x124   :  { %v179_v39 = vpop.xlane.xlu0 %178 }
 0x125   :  { %v193_v40 = vmul.f32 %v5107_v38, %v179_v39  ;;  %v3782_v39 = vor.u32 %v4387_v37, %v3781_v34 }
 0x127   :  { %v5111_v41 = vsub.f32 %v5086_v19, %v193_v40  ;;  %517 = vmatpush.bf16.msra.mxu3 %v3782_v39  ;;  %v4394_v40 = vld [vmem:[%s6605_s7 + $0xac] sm:$0xf] }
 0x129   :  { %v203_v42 = vmul.f32 %v5111_v41, %v5111_v41 }
 0x12b   :  { %210 = vadd.xlane.f32.xlu2 %v203_v42  ;;  %v3811_v42 = vld [vmem:[%s6605_s7 + $0xb4] sm:$0xf0] }
 0x12c   :  { %v181_v43 = vpop.xlane.xlu0 %180 }
 0x12d   :  { %v194_v44 = vmul.f32 %v5107_v38, %v181_v43  ;;  %v3769_v43 = vld [vmem:[%s6605_s7 + $0x50] sm:$0xf] }
 0x12f   :  { %v5117_v46 = vsub.f32 %v5092_v23, %v194_v44  ;;  %v3814_v44 = vor.u32 %v4394_v40, %v3811_v42  ;;  %v4376_v42 = vld [vmem:[%s6605_s7 + $0x1c] sm:$0xf] }
 0x131   :  { %v204_v48 = vmul.f32 %v5117_v46, %v5117_v46  ;;  %491 = vmatpush.bf16.msrb.mxu2 %v3814_v44 }
 0x133   :  { %212 = vadd.xlane.f32.xlu0 %v204_v48  ;;  %v3770_v48 = vor.u32 %v4384_v45, %v3769_v43  ;;  %v3739_v43 = vld [vmem:[%s6605_s7 + $0x24] sm:$0xf0] }
 0x134   :  { %v183_v49 = vpop.xlane.xlu1 %182 }
 0x135   :  { %v195_v50 = vmul.f32 %v5107_v38, %v183_v49  ;;  %518 = vmatpush.bf16.msra.mxu3 %v3770_v48  ;;  %v4591_v48 = vld [vmem:[%s6603_s5] ss:$0 sm:$0xff] }
 0x137   :  { %v5127_v52 = vsub.f32 %v5098_v27, %v195_v50  ;;  %v4391_v50 = vld [vmem:[%s6605_s7 + $0x94] sm:$0xf] }
 0x139   :  { %v205_v54 = vmul.f32 %v5127_v52, %v5127_v52 }
 0x13b   :  { %208 = vadd.xlane.f32.xlu0 %v202_v53  ;;  %214 = vadd.xlane.f32.xlu1 %v205_v54  ;;  %v3799_v53 = vld [vmem:[%s6605_s7 + $0x9c] sm:$0xf0]  ;;  %v3757_v54 = vld [vmem:[%s6605_s7 + $0x38] sm:$0xf] }
 0x13c   :  { %v175_v55 = vpop.xlane.xlu1 %174  ;;  %v3758_v61 = vor.u32 %v4381_v59, %v3757_v54 }
 0x13d   :  { %v191_v56 = vmul.f32 %v5107_v38, %v175_v55 }
 0x13e   :  { %519 = vmatpush.bf16.msra.mxu3 %v3758_v61 }
 0x13f   :  { %v5135_v57 = vsub.f32 %v5104_v31, %v191_v56 }
 0x141   :  { %v201_v58 = vmul.f32 %v5135_v57, %v5135_v57 }
 0x142   :  { %520 = vmatpush.bf16.msra.mxu3 %v3746_v9 }
 0x143   :  { %206 = vadd.xlane.f32.xlu2 %v201_v58  ;;  %v3802_v58 = vor.u32 %v4391_v50, %v3799_v53 }
 0x145   :  { %492 = vmatpush.bf16.msrb.mxu2 %v3802_v58 }
 0x146   :  { %521 = vmatpush.bf16.msra.mxu3 %v3734_v17 }
 0x149   :  { %493 = vmatpush.bf16.msrb.mxu2 %v3790_v2 }
 0x14d   :  { %494 = vmatpush.bf16.msrb.mxu2 %v3778_v14 }
 0x19e   :  { %v211_v28 = vpop.xlane.xlu2 %210 }
 0x19f   :  { %v218_v30 = vmul.f32 %v211_v28, %v5107_v38  ;;  %v3763_v28 = vld [vmem:[%s6605_s7 + $0x54] sm:$0xf0] }
 0x1a1   :  { %v5209_v35 = vadd.f32 1e-05, %v218_v30  ;;  %v3766_v30 = vor.u32 %v4382_v26, %v3763_v28 }
 0x1a3   :  { %4606 = vrsqrt.f32 %v5209_v35  ;;  %vm252_vm3 = vweird.f32 %v5209_v35  ;;  %495 = vmatpush.bf16.msrb.mxu2 %v3766_v30 }
 0x1a6   :  { %v213_v47 = vpop.xlane.xlu0 %212 }
 0x1a7   :  { %v219_v49 = vmul.f32 %v213_v47, %v5107_v38 }
 0x1a9   :  { %v4607_v55 = vpop.eup %4606  ;;  %v5237_v56 = vadd.f32 1e-05, %v219_v49 }
 0x1aa   :  { %v247_v60 = vmul.f32 %v4607_v55, %v5209_v35  ;;  %vm253_vm2 = vweird.f32 %v4607_v55  ;;  %v4379_v35 = vld [vmem:[%s6605_s7 + $0x34] sm:$0xf] }
 0x1ab   :  { %4608 = vrsqrt.f32 %v5237_v56  ;;  %vm5284_vm4 = vmor %vm252_vm3, %vm253_vm2  ;;  %v3754_v39 = vor.u32 %v4379_v35, %v3751_v36  ;;  %vm262_vm6 = vweird.f32 %v5237_v56  ;;  %vm660_vm2 = vcmask 1043456  }
 0x1ac   :  { %v248_v62 = vmul.f32 %v4607_v55, %v247_v60  ;;  %v3727_v60 = vld [vmem:[%s6605_s7 + $0xc] sm:$0xf0]  ;;  %vm592_vm3 = vcmask 326656  }
 0x1ad   :  { %496 = vmatpush.bf16.msrb.mxu2 %v3754_v39 }
 0x1ae   :  { %v249_v6 = vmul.f32 0.5, %v248_v62  ;;  %v209_v7 = vpop.xlane.xlu0 %208  ;;  %v215_v8 = vpop.xlane.xlu1 %214 }
 0x1af   :  { %v217_v12 = vmul.f32 %v209_v7, %v5107_v38  ;;  %v220_v13 = vmul.f32 %v215_v8, %v5107_v38 }
 0x1b0   :  { %v250_v16 = vsub.f32 1.5, %v249_v6 }
 0x1b1   :  { %v4609_v18 = vpop.eup %4608  ;;  %v5270_v20 = vadd.f32 1e-05, %v217_v12  ;;  %v5272_v21 = vadd.f32 1e-05, %v220_v13 }
 0x1b2   :  { %v251_v22 = vmul.f32 %v4607_v55, %v250_v16  ;;  %v257_v24 = vmul.f32 %v4609_v18, %v5237_v56  ;;  %vm263_vm5 = vweird.f32 %v4609_v18 }
 0x1b3   :  { %4610 = vrsqrt.f32 %v5270_v20  ;;  %vm264_vm7 = vmor %vm262_vm6, %vm263_vm5  ;;  %vm272_vm10 = vweird.f32 %v5272_v21  ;;  %vm242_vm11 = vweird.f32 %v5270_v20  ;;  %vm1229_vm5 = vcmask 785408  }
 0x1b4   :  { %v258_v25 = vmul.f32 %v4609_v18, %v257_v24  ;;  %4612 = vrsqrt.f32 %v5272_v21  ;;  %v255_v32 = vsel %vm5284_vm4, %v4607_v55, %v251_v22  ;;  %v3742_v55 = vor.u32 %v4376_v42, %v3739_v43  ;;  %v332_v42 = vld [vmem:[%s6606_s8] sm:$0x7] }
 0x1b5   :  { %v278_v47 = vmul.f32 %v255_v32, %v5111_v41  ;;  %v4373_v41 = vld [vmem:[%s6605_s7 + $0x4] sm:$0xf]  ;;  %v335_v43 = vperm.slane %v332_v42, 1  ;;  %vm1223_vm4 = vcmask 523264  }
 0x1b6   :  { %v259_v33 = vmul.f32 0.5, %v258_v25  ;;  %v207_v34 = vpop.xlane.xlu2 %206  ;;  %497 = vmatpush.bf16.msrb.mxu2 %v3742_v55  ;;  %v3730_v3 = vor.u32 %v4373_v41, %v3727_v60 }
 0x1b7   :  { %v216_v37 = vmul.f32 %v207_v34, %v5107_v38  ;;  %v286_v62 = vmul.f32 %v4591_v48, %v278_v47 }
 0x1b8   :  { %v260_v40 = vsub.f32 1.5, %v259_v33 }
 0x1b9   :  { %v4611_v44 = vpop.eup %4610  ;;  %v221_v45 = vadd.f32 1e-05, %v216_v37  ;;  %v294_v7 = vadd.f32 %v4592_v63, %v286_v62 }
 0x1ba   :  { %v4613_v49 = vpop.eup %4612  ;;  %v261_v50 = vmul.f32 %v4609_v18, %v260_v40  ;;  %v237_v53 = vmul.f32 %v4611_v44, %v5270_v20  ;;  %vm243_vm9 = vweird.f32 %v4611_v44  ;;  %498 = vmatpush.bf16.msrb.mxu2 %v3730_v3 }
 0x1bb   :  { %v267_v54 = vmul.f32 %v4613_v49, %v5272_v21  ;;  %4614 = vrsqrt.f32 %v221_v45  ;;  %vm273_vm8 = vweird.f32 %v4613_v49  ;;  %vm244_vm13 = vmor %vm242_vm11, %vm243_vm9  ;;  %vm232_vm15 = vweird.f32 %v221_v45 }
 0x1bc   :  { %v265_v58 = vsel %vm264_vm7, %v4609_v18, %v261_v50  ;;  %v238_v59 = vmul.f32 %v4611_v44, %v237_v53  ;;  %vm274_vm12 = vmor %vm272_vm10, %vm273_vm8  ;;  %v336_v53 = vperm.slane %v332_v42, 2 }
 0x1bd   :  { %v268_v61 = vmul.f32 %v4613_v49, %v267_v54  ;;  %v279_v56 = vmul.f32 %v265_v58, %v5117_v46 }
 0x1be   :  { %v239_v0 = vmul.f32 0.5, %v238_v59 }
 0x1bf   :  { %v269_v1 = vmul.f32 0.5, %v268_v61  ;;  %v287_v2 = vmul.f32 %v4591_v48, %v279_v56  ;;  %v334_v56 = vperm.slane %v332_v42, 0 }
 0x1c0   :  { %v240_v4 = vsub.f32 1.5, %v239_v0 }
 0x1c1   :  { %v4615_v5 = vpop.eup %4614  ;;  %v270_v6 = vsub.f32 1.5, %v269_v1  ;;  %v295_v8 = vadd.f32 %v4592_v63, %v287_v2 }
 0x1c2   :  { %v241_v9 = vmul.f32 %v4611_v44, %v240_v4  ;;  %v227_v10 = vmul.f32 %v4615_v5, %v221_v45  ;;  %vm233_vm14 = vweird.f32 %v4615_v5 }
 0x1c3   :  { %v271_v46 = vmul.f32 %v4613_v49, %v270_v6  ;;  %v298_v11 = vpack.c.bf16 %v295_v8, %v294_v7  ;;  %vm234_vm1 = vmor %vm232_vm15, %vm233_vm14 }
 0x1c4   :  { %v228_v12 = vmul.f32 %v4615_v5, %v227_v10  ;;  %v245_v14 = vsel %vm244_vm13, %v4611_v44, %v241_v9 }
 0x1c5   :  { %481 = vmatmul.bf16.vlgmr.msra.gmra.mxu2 %v298_v11  ;;  %v275_v13 = vsel %vm274_vm12, %v4613_v49, %v271_v46  ;;  %v277_v22 = vmul.f32 %v245_v14, %v5124_v51 }
 0x1c6   :  { %v229_v16 = vmul.f32 0.5, %v228_v12  ;;  %v280_v17 = vmul.f32 %v275_v13, %v5127_v52 }
 0x1c7   :  { %v285_v26 = vmul.f32 %v4591_v48, %v277_v22 }
 0x1c8   :  { %v230_v18 = vsub.f32 1.5, %v229_v16  ;;  %v288_v21 = vmul.f32 %v4591_v48, %v280_v17 }
 0x1c9   :  { %v293_v32 = vadd.f32 %v4592_v63, %v285_v26 }
 0x1ca   :  { %v231_v24 = vmul.f32 %v4615_v5, %v230_v18  ;;  %v296_v29 = vadd.f32 %v4592_v63, %v288_v21 }
 0x1cc   :  { %v235_v25 = vsel %vm234_vm1, %v4615_v5, %v231_v24  ;;  %v299_v34 = vpack.c.bf16 %v296_v29, %v296_v29 }
 0x1cd   :  { %v276_v20 = vmul.f32 %v235_v25, %v5135_v57 }
 0x1cf   :  { %v284_v28 = vmul.f32 %v4591_v48, %v276_v20 }
 0x1d1   :  { %v292_v30 = vadd.f32 %v4592_v63, %v284_v28 }
 0x1d3   :  { %v297_v33 = vpack.c.bf16 %v293_v32, %v292_v30 }
 0x1d5   :  { %476 = vmatmul.bf16.vlgmr.msra.gmra.mxu1 %v297_v33  ;;  %486 = vmatmul.bf16.gmra.mxu2 %v299_v34 }
 0x1d6   :  { %522 = vmatmul.bf16.vlgmr.msra.gmra.mxu3 %v297_v33 }
 0x1e5   :  { %499 = vmatmul.bf16.vlgmr.msrb.gmra.mxu2 %v297_v33 }
 0x1e6   :  { %527 = vmatmul.bf16.gmra.mxu3 %v298_v11 }
 0x1f5   :  { %504 = vmatmul.bf16.gmra.mxu2 %v298_v11 }
 0x1f6   :  { %532 = vmatmul.bf16.gmra.mxu3 %v299_v34 }
 0x205   :  { %509 = vmatmul.bf16.gmra.mxu2 %v299_v34 }
 0x248   :  { %v482_v51 = vpop.f32.mrf.mxu2 }
 0x249   :  { %v483_v18 = vadd.f32 %v482_v51, %v334_v56 }
 0x24b   :  { %v539_v20 = vmul.f32 0.17677669, %v483_v18 }
 0x250   :  { %v484_v52 = vpop.f32.mrf.mxu2 }
 0x251   :  { %v485_v13 = vadd.f32 %v484_v52, %v334_v56 }
 0x252   :  { %v477_v50 = vpop.f32.mrf.mxu1 }
 0x253   :  { %v478_v8 = vadd.f32 %v477_v50, %v334_v56  ;;  %v540_v24 = vmul.f32 0.17677669, %v485_v13 }
 0x255   :  { %v537_v11 = vmul.f32 0.17677669, %v478_v8  ;;  %v543_v26 = vpack.c.bf16 %v540_v24, %v539_v20  ;;  %v5428_v24 = vld [vmem:[%s6631_s28 + $0x20] sm:$0xff] }
 0x258   :  { %v487_v35 = vpop.f32.mrf.mxu2 }
 0x259   :  { %v523_v36 = vpop.f32.mrf.mxu3  ;;  %v488_v17 = vadd.f32 %v487_v35, %v334_v56 }
 0x25a   :  { %v479_v62 = vpop.f32.mrf.mxu1  ;;  %v524_v5 = vadd.f32 %v523_v36, %v336_v53 }
 0x25b   :  { %v480_v6 = vadd.f32 %v479_v62, %v334_v56  ;;  %v541_v21 = vmul.f32 0.17677669, %v488_v17 }
 0x25d   :  { %v538_v10 = vmul.f32 0.17677669, %v480_v6  ;;  %v544_v28 = vpack.c.bf16 %v541_v21, %v541_v21 }
 0x25f   :  { %v542_v14 = vpack.c.bf16 %v538_v10, %v537_v11 }
 0x260   :  { %v489_v57 = vpop.f32.mrf.mxu2 }
 0x261   :  { %v525_v37 = vpop.f32.mrf.mxu3 }
 0x262   :  { %v526_v0 = vadd.f32 %v525_v37, %v336_v53 }
 0x264   :  { %v5336_v9 = vpack.c.bf16 %v526_v0, %v524_v5 }
 0x268   :  { %v500_v39 = vpop.f32.mrf.mxu2 }
 0x269   :  { %v528_v40 = vpop.f32.mrf.mxu3  ;;  %v501_v45 = vadd.f32 %v500_v39, %v335_v43 }
 0x26a   :  { %v529_v61 = vadd.f32 %v528_v40, %v336_v53 }
 0x270   :  { %v502_v44 = vpop.f32.mrf.mxu2 }
 0x271   :  { %v503_v47 = vadd.f32 %v502_v44, %v335_v43  ;;  %v530_v48 = vpop.f32.mrf.mxu3 }
 0x272   :  { %v531_v41 = vadd.f32 %v530_v48, %v336_v53 }
 0x273   :  { %v545_v49 = vpack.c.bf16 %v503_v47, %v501_v45 }
 0x274   :  { %v5333_v1 = vpack.c.bf16 %v531_v41, %v529_v61 }
 0x275   :  { %699 = vrot.lane.b32.xlu0 %v545_v49, %s4936_s3  ;;  %v561_v30 = vsel %vm124_vm0, %v545_v49, 0 }
 0x278   :  { %v505_v54 = vpop.f32.mrf.mxu2 }
 0x279   :  { %v533_v55 = vpop.f32.mrf.mxu3  ;;  %v506_v2 = vadd.f32 %v505_v54, %v335_v43 }
 0x27a   :  { %v534_v58 = vadd.f32 %v533_v55, %v336_v53  ;;  %v5378_v55 = vld [vmem:[%s6631_s28] sm:$0xff] }
 0x27c   :  { %v5329_v59 = vpack.c.bf16 %v534_v58, %v534_v58 }
 0x27e   :  { %v662_v60 = vsel %vm660_vm2, %v5329_v59, 0 }
 0x27f   :  { %669 = vmatpush.bf16.msrb.mxu1 %v662_v60 }
 0x280   :  { %v507_v63 = vpop.f32.mrf.mxu2 }
 0x281   :  { %v508_v3 = vadd.f32 %v507_v63, %v335_v43  ;;  %v535_v4 = vpop.f32.mrf.mxu3 }
 0x283   :  { %v546_v7 = vpack.c.bf16 %v508_v3, %v506_v2  ;;  %670 = vmatpush.bf16.msrb.mxu1 %v5333_v1  ;;  %v5392_v3 = vld [vmem:[%s6631_s28 + $0x8] sm:$0xff] }
 0x285   :  { %701 = vrot.lane.b32.xlu2 %v546_v7, %s4936_s3  ;;  %v564_v29 = vsel %vm124_vm0, %v546_v7, 0 }
 0x287   :  { %671 = vmatpush.bf16.msrb.mxu1 %v5336_v9 }
 0x288   :  { %v510_v46 = vpop.f32.mrf.mxu2 }
 0x289   :  { %v511_v12 = vadd.f32 %v510_v46, %v335_v43  ;;  %v5403_v46 = vld [vmem:[%s6631_s28 + $0x10] sm:$0xff] }
 0x28b   :  { %v547_v16 = vpack.c.bf16 %v511_v12, %v511_v12 }
 0x28d   :  { %703 = vrot.lane.b32.xlu1 %v547_v16, %s4936_s3  ;;  %690 = vrot.lane.b32.xlu2 %v542_v14, %s4936_s3  ;;  %v567_v22 = vsel %vm124_vm0, %v547_v16, 0 }
 0x28e   :  { %1014 = vrot.lane.b32.xlu0 %v547_v16, %s4937_s26  ;;  %574 = vmatpush.bf16.xpose.msrb.mxu0 %v567_v22 }
 0x290   :  { %v512_v25 = vpop.f32.mrf.mxu2 }
 0x295   :  { %692 = vrot.lane.b32.xlu1 %v543_v26, %s4936_s3  ;;  %1012 = vrot.lane.b32.xlu2 %v546_v7, %s4937_s26 }
 0x296   :  { %694 = vrot.lane.b32.xlu0 %v544_v28, %s4936_s3  ;;  %575 = vmatpush.bf16.xpose.msrb.mxu0 %v564_v29 }
 0x29d   :  { %858 = vrot.lane.b32.xlu1 %v546_v7, %s4933_s27  ;;  %1010 = vrot.lane.b32.xlu2 %v545_v49, %s4937_s26 }
 0x29e   :  { %1004 = vrot.lane.b32.xlu0 %v542_v14, %s4937_s26  ;;  %576 = vmatpush.bf16.xpose.msrb.mxu0 %v561_v30 }
 0x2a5   :  { %850 = vrot.lane.b32.xlu1 %v542_v14, %s4933_s27  ;;  %856 = vrot.lane.b32.xlu2 %v545_v49, %s4933_s27 }
 0x2a6   :  { %3819 = vmatmul.msk.bf16.vlgmr.msrb.gmra.mxu0 %vm124_vm0, %v542_v14  ;;  %1006 = vrot.lane.b32.xlu0 %v543_v26, %s4937_s26 }
 0x2ad   :  { %852 = vrot.lane.b32.xlu2 %v543_v26, %s4933_s27  ;;  %1008 = vrot.lane.b32.xlu1 %v544_v28, %s4937_s26 }
 0x2ae   :  { %854 = vrot.lane.b32.xlu0 %v544_v28, %s4933_s27 }
 0x2b5   :  { %809 = vrot.lane.b32.xlu2 %v5333_v1, %s4936_s3  ;;  %860 = vrot.lane.b32.xlu1 %v547_v16, %s4933_s27  ;;  %v5415_v16 = vld [vmem:[%s6631_s28 + $0x18] sm:$0xff] }
 0x2b6   :  { %3820 = vmatmul.msk.bf16.gmra.mxu0 %vm124_vm0, %v543_v26  ;;  %811 = vrot.lane.b32.xlu0 %v5329_v59, %s4936_s3 }
 0x2be   :  { %807 = vrot.lane.b32.xlu0 %v5336_v9, %s4936_s3 }
 0x2c6   :  { %3821 = vmatmul.msk.bf16.gmra.mxu0 %vm124_vm0, %v544_v28 }
 0x2df   :  { %v702_v32 = vpop.permute.xlu2 %701 }
 0x2e0   :  { %v718_v39 = vsel %vm124_vm0, %v702_v32, 0 }
 0x2e7   :  { %v700_v33 = vpop.permute.xlu0 %699  ;;  %v691_v34 = vpop.permute.xlu2 %690 }
 0x2e8   :  { %v715_v44 = vsel %vm124_vm0, %v700_v33, 0 }
 0x2ef   :  { %v1013_v36 = vpop.permute.xlu2 %1012 }
 0x2f0   :  { %v1029_v50 = vsel %vm124_vm0, %v1013_v36, 0 }
 0x2f7   :  { %v1011_v40 = vpop.permute.xlu2 %1010 }
 0x2f8   :  { %v1026_v58 = vsel %vm124_vm0, %v1011_v40, 0 }
 0x2ff   :  { %v704_v51 = vpop.permute.xlu1 %703  ;;  %v857_v49 = vpop.permute.xlu2 %856 }
 0x300   :  { %v721_v52 = vsel %vm124_vm0, %v704_v51, 0  ;;  %v1015_v35 = vpop.permute.xlu0 %1014  ;;  %v872_v14 = vsel %vm124_vm0, %v857_v49, 0 }
 0x301   :  { %728 = vmatpush.bf16.xpose.msra.mxu2 %v721_v52  ;;  %4517 = vmatpush.bf16.xpose.msrb.mxu3 %v721_v52  ;;  %v1032_v45 = vsel %vm124_vm0, %v1015_v35, 0 }
 0x307   :  { %v693_v57 = vpop.permute.xlu1 %692  ;;  %v853_v41 = vpop.permute.xlu2 %852 }
 0x308   :  { %v695_v37 = vpop.permute.xlu0 %694 }
 0x309   :  { %729 = vmatpush.bf16.xpose.msra.mxu2 %v718_v39  ;;  %4518 = vmatpush.bf16.xpose.msrb.mxu3 %v718_v39 }
 0x30f   :  { %v859_v42 = vpop.permute.xlu1 %858  ;;  %v810_v6 = vpop.permute.xlu2 %809 }
 0x310   :  { %v1005_v43 = vpop.permute.xlu0 %1004  ;;  %v875_v10 = vsel %vm124_vm0, %v859_v42, 0 }
 0x311   :  { %730 = vmatpush.bf16.xpose.msra.mxu2 %v715_v44  ;;  %4519 = vmatpush.bf16.xpose.msrb.mxu3 %v715_v44 }
 0x317   :  { %v851_v47 = vpop.permute.xlu1 %850 }
 0x318   :  { %v1007_v48 = vpop.permute.xlu0 %1006  ;;  %3825 = vmatmul.msk.bf16.vlgmr.msra.gmra.mxu2 %vm124_vm0, %v691_v34  ;;  %3827 = vmatmul.msk.bf16.vlgmr.msrb.gmra.mxu3 %vm124_vm0, %v695_v37 }
 0x319   :  { %1039 = vmatpush.bf16.xpose.msrb.mxu2 %v1032_v45 }
 0x31f   :  { %v1009_v53 = vpop.permute.xlu1 %1008 }
 0x320   :  { %v855_v54 = vpop.permute.xlu0 %854 }
 0x321   :  { %1040 = vmatpush.bf16.xpose.msrb.mxu2 %v1029_v50 }
 0x323   :  { %v578_v60 = vpop.f32.mrf.mxu0 }
 0x324   :  { %v5382_v61 = vadd.f32 %v578_v60, %v5378_v55 }
 0x326   :  { %v593_v56 = vsel %vm592_vm3, %v5382_v61, -inf }
 0x327   :  { %594 = vmax.xlane.f32.xlu0 %v593_v56  ;;  %v861_v62 = vpop.permute.xlu1 %860 }
 0x328   :  { %v878_v63 = vsel %vm124_vm0, %v861_v62, 0  ;;  %v812_v0 = vpop.permute.xlu0 %811  ;;  %3826 = vmatmul.msk.bf16.gmra.mxu2 %vm124_vm0, %v693_v57 }
 0x329   :  { %1041 = vmatpush.bf16.xpose.msrb.mxu2 %v1026_v58  ;;  %v825_v2 = vsel %vm660_vm2, %v812_v0, 0  ;;  %885 = vmatpush.bf16.xpose.msra.mxu0 %v878_v63 }
 0x32a   :  { %832 = vmatpush.bf16.msra.mxu3 %v825_v2 }
 0x32b   :  { %v580_v4 = vpop.f32.mrf.mxu0 }
 0x32c   :  { %v5395_v5 = vadd.f32 %v580_v4, %v5392_v3 }
 0x32e   :  { %833 = vmatpush.bf16.msra.mxu3 %v810_v6  ;;  %v596_v7 = vsel %vm592_vm3, %v5395_v5, -inf }
 0x32f   :  { %597 = vmax.xlane.f32.xlu2 %v596_v7 }
 0x330   :  { %v808_v8 = vpop.permute.xlu0 %807 }
 0x331   :  { %886 = vmatpush.bf16.xpose.msra.mxu0 %v875_v10 }
 0x332   :  { %834 = vmatpush.bf16.msra.mxu3 %v808_v8 }
 0x333   :  { %v583_v11 = vpop.f32.mrf.mxu0 }
 0x334   :  { %v5406_v12 = vadd.f32 %v583_v11, %v5403_v46 }
 0x336   :  { %v599_v13 = vsel %vm592_vm3, %v5406_v12, -inf }
 0x337   :  { %600 = vmax.xlane.f32.xlu2 %v599_v13 }
 0x338   :  { %3837 = vmatmul.msk.bf16.vlgmr.msrb.gmra.mxu2 %vm124_vm0, %v1005_v43 }
 0x339   :  { %887 = vmatpush.bf16.xpose.msra.mxu0 %v872_v14 }
 0x33b   :  { %v585_v17 = vpop.f32.mrf.mxu0  ;;  %1117 = vrot.lane.b32.xlu0 %v5333_v1, %s4937_s26 }
 0x33c   :  { %v5420_v18 = vadd.f32 %v585_v17, %v5415_v16 }
 0x33e   :  { %v602_v22 = vsel %vm592_vm3, %v5420_v18, -inf }
 0x33f   :  { %603 = vmax.xlane.f32.xlu1 %v602_v22 }
 0x340   :  { %3831 = vmatmul.msk.bf16.vlgmr.msra.gmra.mxu0 %vm124_vm0, %v851_v47 }
 0x343   :  { %v588_v21 = vpop.f32.mrf.mxu0 }
 0x344   :  { %v589_v25 = vadd.f32 %v588_v21, %v5428_v24 }
 0x346   :  { %v605_v20 = vsel %vm592_vm3, %v589_v25, -inf }
 0x347   :  { %606 = vmax.xlane.f32.xlu2 %v605_v20 }
 0x348   :  { %3838 = vmatmul.msk.bf16.gmra.mxu2 %vm124_vm0, %v1007_v48 }
 0x34b   :  { %v590_v26 = vpop.f32.mrf.mxu0 }
 0x350   :  { %3832 = vmatmul.msk.bf16.gmra.mxu0 %vm124_vm0, %v853_v41 }
 0x358   :  { %965 = vrot.lane.b32.xlu1 %v5329_v59, %s4933_s27  ;;  %3839 = vmatmul.msk.bf16.gmra.mxu2 %vm124_vm0, %v1009_v53 }
 0x360   :  { %3833 = vmatmul.msk.bf16.gmra.mxu0 %vm124_vm0, %v855_v54 }
 0x39b   :  { %v732_v28 = vpop.f32.mrf.mxu2  ;;  %v742_v29 = vpop.f32.mrf.mxu3 }
 0x39c   :  { %v5439_v30 = vadd.f32 %v742_v29, %v5428_v24  ;;  %v5456_v50 = vadd.f32 %v732_v28, %v5378_v55 }
 0x39e   :  { %v758_v32 = vsel %vm592_vm3, %v5439_v30, -inf  ;;  %v746_v62 = vsel %vm592_vm3, %v5456_v50, -inf }
 0x39f   :  { %759 = vmax.xlane.f32.xlu0 %v758_v32 }
 0x3a2   :  { %v598_v51 = vpop.xlane.xlu2 %597 }
 0x3a3   :  { %v734_v33 = vpop.f32.mrf.mxu2  ;;  %v744_v34 = vpop.f32.mrf.mxu3  ;;  %v609_v60 = vsub.f32 %v5395_v5, %v598_v51 }
 0x3a4   :  { %v5475_v7 = vadd.f32 %v734_v33, %v5392_v3 }
 0x3a5   :  { %v615_v2 = vmul.f32 1.442695, %v609_v60 }
 0x3a6   :  { %v749_v10 = vsel %vm592_vm3, %v5475_v7, -inf }
 0x3aa   :  { %v601_v35 = vpop.xlane.xlu2 %600 }
 0x3ab   :  { %v737_v52 = vpop.f32.mrf.mxu2  ;;  %v610_v26 = vsub.f32 %v5406_v12, %v601_v35 }
 0x3ad   :  { %v617_v29 = vmul.f32 1.442695, %v610_v26 }
 0x3b2   :  { %v604_v48 = vpop.xlane.xlu1 %603 }
 0x3b3   :  { %v739_v36 = vpop.f32.mrf.mxu2  ;;  %v611_v51 = vsub.f32 %v5420_v18, %v604_v48 }
 0x3b4   :  { %v5444_v57 = vadd.f32 %v739_v36, %v5415_v16 }
 0x3b5   :  { %v619_v12 = vmul.f32 1.442695, %v611_v51 }
 0x3b6   :  { %v755_v37 = vsel %vm592_vm3, %v5444_v57, -inf }
 0x3b7   :  { %756 = vmax.xlane.f32.xlu0 %v755_v37 }
 0x3ba   :  { %v607_v39 = vpop.xlane.xlu2 %606 }
 0x3bb   :  { %v612_v40 = vsub.f32 %v589_v25, %v607_v39  ;;  %v5448_v42 = vpop.f32.mrf.mxu2  ;;  %v5493_v25 = vadd.f32 %v737_v52, %v5403_v46 }
 0x3bd   :  { %v621_v43 = vmul.f32 1.442695, %v612_v40  ;;  %v889_v44 = vpop.f32.mrf.mxu0  ;;  %v752_v28 = vsel %vm592_vm3, %v5493_v25, -inf  ;;  %v5519_v40 = vadd.f32 %v5448_v42, %v5378_v55 }
 0x3be   :  { %v5451_v45 = vadd.f32 %v889_v44, %v5378_v55 }
 0x3bf   :  { %4616 = vpow2.f32 %v621_v43  ;;  %v1057_v43 = vsel %vm592_vm3, %v5519_v40, -inf }
 0x3c0   :  { %v903_v47 = vsel %vm592_vm3, %v5451_v45, -inf  ;;  %4618 = vpow2.f32 %v615_v2 }
 0x3c1   :  { %904 = vmax.xlane.f32.xlu2 %v903_v47  ;;  %4620 = vpow2.f32 %v617_v29 }
 0x3c2   :  { %4622 = vpow2.f32 %v619_v12 }
 0x3c3   :  { %v1045_v49 = vpop.f32.mrf.mxu2 }
 0x3c4   :  { %v5471_v63 = vadd.f32 %v1045_v49, %v5392_v3 }
 0x3c5   :  { %v5458_v53 = vpop.eup %4616  ;;  %v891_v54 = vpop.f32.mrf.mxu0 }
 0x3c6   :  { %v5461_v58 = vadd.f32 %v891_v54, %v5392_v3  ;;  %v635_v41 = vsel %vm592_vm3, %v5458_v53, 0.0  ;;  %v1060_v8 = vsel %vm592_vm3, %v5471_v63, -inf  ;;  %v5484_v14 = vpop.eup %4618 }
 0x3c7   :  { %636 = vadd.xlane.f32.xlu0 %v635_v41  ;;  %v626_v22 = vsel %vm592_vm3, %v5484_v14, 0.0  ;;  %v5508_v35 = vpop.eup %4620 }
 0x3c8   :  { %v906_v56 = vsel %vm592_vm3, %v5461_v58, -inf  ;;  %v5512_v36 = vpop.eup %4622 }
 0x3c9   :  { %907 = vmax.xlane.f32.xlu1 %v906_v56  ;;  %747 = vmax.xlane.f32.xlu2 %v746_v62  ;;  %v632_v18 = vsel %vm592_vm3, %v5512_v36, 0.0 }
 0x3ca   :  { %v966_v0 = vpop.permute.xlu1 %965 }
 0x3cb   :  { %v979_v4 = vsel %vm660_vm2, %v966_v0, 0  ;;  %v1048_v6 = vpop.f32.mrf.mxu2 }
 0x3cc   :  { %986 = vmatpush.bf16.msra.mxu1 %v979_v4  ;;  %v5524_v44 = vadd.f32 %v1048_v6, %v5403_v46 }
 0x3cd   :  { %v894_v5 = vpop.f32.mrf.mxu0 }
 0x3ce   :  { %v5533_v55 = vadd.f32 %v894_v5, %v5403_v46 }
 0x3cf   :  { %1061 = vmax.xlane.f32.xlu0 %v1060_v8 }
 0x3d0   :  { %v909_v42 = vsel %vm592_vm3, %v5533_v55, -inf }
 0x3d1   :  { %750 = vmax.xlane.f32.xlu1 %v749_v10 }
 0x3d3   :  { %v1050_v11 = vpop.f32.mrf.mxu2 }
 0x3d4   :  { %v5482_v13 = vadd.f32 %v1050_v11, %v5415_v16 }
 0x3d5   :  { %v896_v17 = vpop.f32.mrf.mxu0 }
 0x3d6   :  { %v1066_v3 = vsel %vm592_vm3, %v5482_v13, -inf  ;;  %v5503_v33 = vadd.f32 %v896_v17, %v5415_v16  ;;  %v595_v16 = vpop.xlane.xlu0 %594 }
 0x3d7   :  { %1067 = vmax.xlane.f32.xlu0 %v1066_v3  ;;  %v608_v37 = vsub.f32 %v5382_v61, %v595_v16  ;;  %v1063_v61 = vsel %vm592_vm3, %v5524_v44, -inf }
 0x3d8   :  { %v912_v52 = vsel %vm592_vm3, %v5503_v33, -inf }
 0x3d9   :  { %627 = vadd.xlane.f32.xlu1 %v626_v22  ;;  %v613_v39 = vmul.f32 1.442695, %v608_v37 }
 0x3db   :  { %v5490_v21 = vpop.f32.mrf.mxu2  ;;  %4624 = vpow2.f32 %v613_v39 }
 0x3dd   :  { %v5495_v20 = vpop.f32.mrf.mxu0 }
 0x3de   :  { %v1118_v49 = vpop.permute.xlu0 %1117 }
 0x3e1   :  { %753 = vmax.xlane.f32.xlu1 %v752_v28  ;;  %1119 = vrot.lane.b32.xlu2 %v5329_v59, %s4937_s26  ;;  %v629_v59 = vsel %vm592_vm3, %v5508_v35, 0.0  ;;  %v5526_v47 = vpop.eup %4624 }
 0x3e2   :  { %v623_v48 = vsel %vm592_vm3, %v5526_v47, 0.0 }
 0x3e3   :  { %v1055_v32 = vpop.f32.mrf.mxu2 }
 0x3e5   :  { %v901_v34 = vpop.f32.mrf.mxu0 }
 0x3e9   :  { %913 = vmax.xlane.f32.xlu1 %v912_v52 }
 0x3f1   :  { %630 = vadd.xlane.f32.xlu1 %v629_v59 }
 0x3f9   :  { %633 = vadd.xlane.f32.xlu1 %v632_v18 }
 0x401   :  { %1058 = vmax.xlane.f32.xlu1 %v1057_v43 }
 0x409   :  { %1064 = vmax.xlane.f32.xlu1 %v1063_v61 }
 0x40a   :  { %624 = vadd.xlane.f32.xlu2 %v623_v48 }
 0x412   :  { %910 = vmax.xlane.f32.xlu2 %v909_v42  ;;  %v760_v54 = vpop.xlane.xlu0 %759 }
 0x413   :  { %v765_v62 = vsub.f32 %v5439_v30, %v760_v54 }
 0x415   :  { %v774_v4 = vmul.f32 1.442695, %v765_v62 }
 0x42a   :  { %v757_v41 = vpop.xlane.xlu0 %756 }
 0x42b   :  { %v764_v61 = vsub.f32 %v5444_v57, %v757_v41 }
 0x42d   :  { %v772_v42 = vmul.f32 1.442695, %v764_v61 }
 0x434   :  { %v905_v60 = vpop.xlane.xlu2 %904 }
 0x435   :  { %v918_v56 = vsub.f32 %v5451_v45, %v905_v60 }
 0x437   :  { %v923_v0 = vmul.f32 1.442695, %v918_v56 }
 0x439   :  { %4626 = vpow2.f32 %v923_v0 }
 0x43a   :  { %v5539_v2 = vpop.xlane.xlu0 %636  ;;  %4628 = vpow2.f32 %v774_v4 }
 0x43c   :  { %v908_v6 = vpop.xlane.xlu1 %907  ;;  %v748_v46 = vpop.xlane.xlu2 %747 }
 0x43d   :  { %v919_v5 = vsub.f32 %v5461_v58, %v908_v6  ;;  %v761_v8 = vsub.f32 %v5456_v50, %v748_v46 }
 0x43f   :  { %v5543_v10 = vpop.eup %4626  ;;  %v925_v11 = vmul.f32 1.442695, %v919_v5  ;;  %v766_v17 = vmul.f32 1.442695, %v761_v8 }
 0x440   :  { %v933_v45 = vsel %vm592_vm3, %v5543_v10, 0.0  ;;  %v5548_v28 = vpop.eup %4628 }
 0x441   :  { %4630 = vpow2.f32 %v925_v11  ;;  %934 = vadd.xlane.f32.xlu1 %v933_v45 }
 0x442   :  { %4632 = vpow2.f32 %v766_v17  ;;  %v1062_v30 = vpop.xlane.xlu0 %1061 }
 0x443   :  { %v1073_v3 = vsub.f32 %v5471_v63, %v1062_v30  ;;  %v788_v63 = vsel %vm592_vm3, %v5548_v28, 0.0 }
 0x444   :  { %v751_v22 = vpop.xlane.xlu1 %750  ;;  %v1120_v26 = vpop.permute.xlu2 %1119 }
 0x445   :  { %v1079_v58 = vmul.f32 1.442695, %v1073_v3  ;;  %v762_v50 = vsub.f32 %v5475_v7, %v751_v22  ;;  %v1133_v29 = vsel %vm660_vm2, %v1120_v26, 0 }
 0x446   :  { %1140 = vmatpush.bf16.msrb.mxu3 %v1133_v29 }
 0x447   :  { %v5552_v32 = vpop.eup %4630  ;;  %4634 = vpow2.f32 %v1079_v58  ;;  %v768_v34 = vmul.f32 1.442695, %v762_v50 }
 0x448   :  { %v5554_v51 = vpop.eup %4632  ;;  %v936_v52 = vsel %vm592_vm3, %v5552_v32, 0.0 }
 0x449   :  { %4636 = vpow2.f32 %v768_v34  ;;  %937 = vadd.xlane.f32.xlu0 %v936_v52  ;;  %789 = vadd.xlane.f32.xlu1 %v788_v63  ;;  %v776_v7 = vsel %vm592_vm3, %v5554_v51, 0.0 }
 0x44a   :  { %777 = vadd.xlane.f32.xlu2 %v776_v7  ;;  %1141 = vmatpush.bf16.msrb.mxu3 %v1118_v49 }
 0x44c   :  { %v628_v12 = vpop.xlane.xlu1 %627 }
 0x44d   :  { %v5562_v59 = vpop.eup %4634 }
 0x44e   :  { %v1090_v37 = vsel %vm592_vm3, %v5562_v59, 0.0 }
 0x44f   :  { %v5564_v16 = vpop.eup %4636 }
 0x450   :  { %v779_v18 = vsel %vm592_vm3, %v5564_v16, 0.0 }
 0x451   :  { %1091 = vadd.xlane.f32.xlu0 %v1090_v37  ;;  %780 = vadd.xlane.f32.xlu1 %v779_v18 }
 0x454   :  { %v754_v39 = vpop.xlane.xlu1 %753 }
 0x455   :  { %v763_v43 = vsub.f32 %v5493_v25, %v754_v39 }
 0x457   :  { %v770_v48 = vmul.f32 1.442695, %v763_v43  ;;  %v1068_v43 = vpop.xlane.xlu0 %1067 }
 0x458   :  { %v1075_v61 = vsub.f32 %v5482_v13, %v1068_v43 }
 0x459   :  { %4638 = vpow2.f32 %v770_v48 }
 0x45a   :  { %4640 = vpow2.f32 %v772_v42  ;;  %v1083_v42 = vmul.f32 1.442695, %v1075_v61 }
 0x45c   :  { %v914_v49 = vpop.xlane.xlu1 %913 }
 0x45d   :  { %v921_v58 = vsub.f32 %v5503_v33, %v914_v49 }
 0x45f   :  { %v5572_v54 = vpop.eup %4638 }
 0x460   :  { %v782_v60 = vsel %vm592_vm3, %v5572_v54, 0.0  ;;  %v5578_v62 = vpop.eup %4640 }
 0x461   :  { %783 = vadd.xlane.f32.xlu1 %v782_v60  ;;  %v785_v57 = vsel %vm592_vm3, %v5578_v62, 0.0 }
 0x462   :  { %1115 = vrot.lane.b32.xlu2 %v5336_v9, %s4937_s26 }
 0x464   :  { %v631_v56 = vpop.xlane.xlu1 %630 }
 0x465   :  { %963 = vrot.lane.b32.xlu0 %v5333_v1, %s4933_s27 }
 0x469   :  { %786 = vadd.xlane.f32.xlu1 %v785_v57 }
 0x46c   :  { %v634_v25 = vpop.xlane.xlu1 %633 }
 0x474   :  { %v1059_v41 = vpop.xlane.xlu1 %1058 }
 0x475   :  { %v1072_v0 = vsub.f32 %v5519_v40, %v1059_v41 }
 0x477   :  { %v1077_v4 = vmul.f32 1.442695, %v1072_v0 }
 0x479   :  { %4642 = vpow2.f32 %v1077_v4 }
 0x47a   :  { %4644 = vrcp.f32 %v628_v12 }
 0x47c   :  { %v1065_v6 = vpop.xlane.xlu1 %1064 }
 0x47d   :  { %v1074_v46 = vsub.f32 %v5524_v44, %v1065_v6  ;;  %v625_v5 = vpop.xlane.xlu2 %624  ;;  %v5594_v44 = vadd.f32 %v5490_v21, %v5428_v24  ;;  %v5605_v21 = vadd.f32 %v5495_v20, %v5428_v24 }
 0x47e   :  { %4646 = vrcp.f32 %v625_v5 }
 0x47f   :  { %v5586_v8 = vpop.eup %4642  ;;  %v1081_v11 = vmul.f32 1.442695, %v1074_v46  ;;  %v915_v52 = vsel %vm592_vm3, %v5605_v21, -inf }
 0x480   :  { %v1087_v1 = vsel %vm592_vm3, %v5586_v8, 0.0  ;;  %v4645_v17 = vpop.eup %4644 }
 0x481   :  { %1088 = vadd.xlane.f32.xlu1 %v1087_v1  ;;  %v644_v30 = vmul.f32 %v4645_v17, %v5484_v14  ;;  %4648 = vpow2.f32 %v1081_v11  ;;  %v1069_v14 = vsel %vm592_vm3, %v5594_v44, -inf }
 0x482   :  { %4650 = vrcp.f32 %v634_v25 }
 0x483   :  { %4652 = vrcp.f32 %v631_v56 }
 0x484   :  { %v4647_v45 = vpop.eup %4646 }
 0x485   :  { %v643_v40 = vmul.f32 %v4647_v45, %v5526_v47  ;;  %v911_v3 = vpop.xlane.xlu2 %910  ;;  %v929_v47 = vmul.f32 1.442695, %v921_v58 }
 0x486   :  { %v920_v22 = vsub.f32 %v5533_v55, %v911_v3 }
 0x487   :  { %v648_v26 = vpack.c.bf16 %v644_v30, %v643_v40  ;;  %v5601_v29 = vpop.eup %4648 }
 0x488   :  { %v927_v50 = vmul.f32 1.442695, %v920_v22  ;;  %v1093_v33 = vsel %vm592_vm3, %v5601_v29, 0.0  ;;  %v4651_v55 = vpop.eup %4650 }
 0x489   :  { %3822 = vmatmul.msk.bf16.vlgmr.msrb.gmra.mxu1 %vm592_vm3, %v648_v26  ;;  %v4653_v34 = vpop.eup %4652  ;;  %v646_v7 = vmul.f32 %v4651_v55, %v5512_v36 }
 0x48a   :  { %4654 = vpow2.f32 %v927_v50  ;;  %v645_v12 = vmul.f32 %v4653_v34, %v5508_v35 }
 0x48b   :  { %1070 = vmax.xlane.f32.xlu2 %v1069_v14  ;;  %4656 = vpow2.f32 %v929_v47 }
 0x48c   :  { %v649_v37 = vpack.c.bf16 %v646_v7, %v645_v12  ;;  %4658 = vrcp.f32 %v5539_v2 }
 0x48d   :  { %4660 = vpow2.f32 %v1083_v42 }
 0x48f   :  { %1094 = vadd.xlane.f32.xlu0 %v1093_v33 }
 0x490   :  { %v5611_v63 = vpop.eup %4654 }
 0x491   :  { %v939_v24 = vsel %vm592_vm3, %v5611_v63, 0.0  ;;  %v5617_v20 = vpop.eup %4656 }
 0x492   :  { %v942_v18 = vsel %vm592_vm3, %v5617_v20, 0.0  ;;  %v4659_v36 = vpop.eup %4658 }
 0x493   :  { %916 = vmax.xlane.f32.xlu2 %v915_v52  ;;  %v647_v35 = vmul.f32 %v4659_v36, %v5458_v53  ;;  %v5628_v60 = vpop.eup %4660 }
 0x495   :  { %v650_v39 = vpack.c.bf16 %v647_v35, %v647_v35 }
 0x497   :  { %940 = vadd.xlane.f32.xlu0 %v939_v24 }
 0x499   :  { %3823 = vmatmul.msk.bf16.gmra.mxu1 %vm592_vm3, %v649_v37 }
 0x49a   :  { %961 = vrot.lane.b32.xlu1 %v5336_v9, %s4933_s27  ;;  %v1096_v9 = vsel %vm592_vm3, %v5628_v60, 0.0 }
 0x49b   :  { %943 = vadd.xlane.f32.xlu2 %v942_v18 }
 0x4a9   :  { %3824 = vmatmul.msk.bf16.gmra.mxu1 %vm592_vm3, %v650_v39 }
 0x4b4   :  { %v935_v48 = vpop.xlane.xlu1 %934 }
 0x4bc   :  { %v790_v2 = vpop.xlane.xlu1 %789  ;;  %v938_v53 = vpop.xlane.xlu0 %937 }
 0x4bd   :  { %v778_v49 = vpop.xlane.xlu2 %777 }
 0x4be   :  { %4662 = vrcp.f32 %v778_v49 }
 0x4c4   :  { %1097 = vadd.xlane.f32.xlu1 %v1096_v9  ;;  %v781_v56 = vpop.xlane.xlu1 %780  ;;  %v4663_v25 = vpop.eup %4662 }
 0x4c5   :  { %v1116_v57 = vpop.permute.xlu2 %1115  ;;  %4664 = vrcp.f32 %v781_v56  ;;  %v796_v13 = vmul.f32 %v4663_v25, %v5554_v51  ;;  %v1092_v4 = vpop.xlane.xlu0 %1091 }
 0x4c6   :  { %1142 = vmatpush.bf16.msrb.mxu3 %v1116_v57 }
 0x4cb   :  { %v4665_v41 = vpop.eup %4664 }
 0x4cc   :  { %v797_v0 = vmul.f32 %v4665_v41, %v5564_v16 }
 0x4ce   :  { %v801_v6 = vpack.c.bf16 %v797_v0, %v796_v13 }
 0x4d0   :  { %3828 = vmatmul.msk.bf16.vlgmr.msra.gmra.mxu3 %vm592_vm3, %v801_v6 }
 0x4d4   :  { %v784_v46 = vpop.xlane.xlu1 %783 }
 0x4d5   :  { %4666 = vrcp.f32 %v784_v46 }
 0x4d7   :  { %v964_v5 = vpop.permute.xlu0 %963 }
 0x4d8   :  { %987 = vmatpush.bf16.msra.mxu1 %v964_v5 }
 0x4db   :  { %v4667_v11 = vpop.eup %4666 }
 0x4dc   :  { %v787_v1 = vpop.xlane.xlu1 %786  ;;  %v798_v45 = vmul.f32 %v4667_v11, %v5572_v54 }
 0x4dd   :  { %4668 = vrcp.f32 %v787_v1 }
 0x4de   :  { %4670 = vrcp.f32 %v790_v2 }
 0x4e3   :  { %v4669_v17 = vpop.eup %4668 }
 0x4e4   :  { %v799_v30 = vmul.f32 %v4669_v17, %v5578_v62  ;;  %v4671_v51 = vpop.eup %4670 }
 0x4e5   :  { %v800_v16 = vmul.f32 %v4671_v51, %v5548_v28 }
 0x4e6   :  { %v802_v40 = vpack.c.bf16 %v799_v30, %v798_v45 }
 0x4e7   :  { %v803_v22 = vpack.c.bf16 %v800_v16, %v800_v16 }
 0x4e8   :  { %3829 = vmatmul.msk.bf16.gmra.mxu3 %vm592_vm3, %v802_v40 }
 0x4f4   :  { %v1089_v3 = vpop.xlane.xlu1 %1088 }
 0x4f5   :  { %4672 = vrcp.f32 %v1089_v3 }
 0x4f6   :  { %4674 = vrcp.f32 %v1092_v4 }
 0x4f7   :  { %4676 = vrcp.f32 %v938_v53 }
 0x4f8   :  { %3830 = vmatmul.msk.bf16.gmra.mxu3 %vm592_vm3, %v803_v22  ;;  %4678 = vrcp.f32 %v935_v48 }
 0x4fb   :  { %v4673_v58 = vpop.eup %4672 }
 0x4fc   :  { %v4675_v54 = vpop.eup %4674  ;;  %v1107_v14 = vmul.f32 %v4673_v58, %v5586_v8 }
 0x4fd   :  { %v1108_v47 = vmul.f32 %v4675_v54, %v5562_v59  ;;  %v4677_v52 = vpop.eup %4676 }
 0x4fe   :  { %v1071_v26 = vpop.xlane.xlu2 %1070  ;;  %v4679_v12 = vpop.eup %4678  ;;  %v954_v37 = vmul.f32 %v4677_v52, %v5552_v32  ;;  %v4402_v52 = vld [vmem:[%s6607_s9 + $0x28] sm:$0xff] }
 0x4ff   :  { %v1076_v50 = vsub.f32 %v5594_v44, %v1071_v26  ;;  %v1112_v33 = vpack.c.bf16 %v1108_v47, %v1107_v14  ;;  %v953_v59 = vmul.f32 %v4679_v12, %v5543_v10 }
 0x501   :  { %v1085_v62 = vmul.f32 1.442695, %v1076_v50  ;;  %v958_v36 = vpack.c.bf16 %v954_v37, %v953_v59  ;;  %v4398_v59 = vld [vmem:[%s6607_s9 + $0x8] sm:$0xff] }
 0x502   :  { %v1095_v28 = vpop.xlane.xlu0 %1094 }
 0x503   :  { %4680 = vpow2.f32 %v1085_v62 }
 0x506   :  { %v917_v55 = vpop.xlane.xlu2 %916  ;;  %v5643_v34 = vpop.f32.mrf.mxu1 }
 0x507   :  { %v922_v7 = vsub.f32 %v5605_v21, %v917_v55  ;;  %v4403_v55 = vld [vmem:[%s6607_s9 + $0x30] sm:$0xff] }
 0x508   :  { %3840 = vmatmul.msk.bf16.vlgmr.msrb.gmra.mxu3 %vm592_vm3, %v1112_v33  ;;  %v4404_v33 = vld [vmem:[%s6607_s9 + $0x38] sm:$0xff] }
 0x509   :  { %v4681_v44 = vpop.eup %4680  ;;  %v931_v24 = vmul.f32 1.442695, %v922_v7  ;;  %1306 = vmatpush.bf16.msrb.mxu0 %v4404_v33  ;;  %v4401_v7 = vld [vmem:[%s6607_s9 + $0x20] sm:$0xff] }
 0x50a   :  { %v1099_v8 = vsel %vm592_vm3, %v4681_v44, 0.0  ;;  %v941_v21 = vpop.xlane.xlu0 %940 }
 0x50b   :  { %4682 = vpow2.f32 %v931_v24  ;;  %1100 = vadd.xlane.f32.xlu1 %v1099_v8  ;;  %v4399_v24 = vld [vmem:[%s6607_s9 + $0x10] sm:$0xff] }
 0x50c   :  { %v962_v18 = vpop.permute.xlu1 %961 }
 0x50d   :  { %988 = vmatpush.bf16.msra.mxu1 %v962_v18  ;;  %1307 = vmatpush.bf16.msrb.mxu0 %v4403_v55  ;;  %v4397_v18 = vld [vmem:[%s6607_s9] sm:$0xff] }
 0x50e   :  { %v944_v35 = vpop.xlane.xlu2 %943  ;;  %v5650_v39 = vpop.f32.mrf.mxu1 }
 0x50f   :  { %4684 = vrcp.f32 %v944_v35 }
 0x510   :  { %3834 = vmatmul.msk.bf16.vlgmr.msra.gmra.mxu1 %vm592_vm3, %v958_v36  ;;  %4686 = vrcp.f32 %v941_v21 }
 0x511   :  { %v4683_v43 = vpop.eup %4682  ;;  %4688 = vrcp.f32 %v1095_v28  ;;  %1308 = vmatpush.bf16.msrb.mxu0 %v4402_v52 }
 0x512   :  { %v945_v61 = vsel %vm592_vm3, %v4683_v43, 0.0 }
 0x513   :  { %946 = vadd.xlane.f32.xlu0 %v945_v61 }
 0x515   :  { %v4685_v48 = vpop.eup %4684  ;;  %1309 = vmatpush.bf16.msrb.mxu0 %v4401_v7 }
 0x516   :  { %v5654_v32 = vpop.f32.mrf.mxu1  ;;  %v4687_v42 = vpop.eup %4686  ;;  %v956_v10 = vmul.f32 %v4685_v48, %v5617_v20 }
 0x517   :  { %v955_v2 = vmul.f32 %v4687_v42, %v5611_v63  ;;  %v4689_v25 = vpop.eup %4688 }
 0x518   :  { %v1109_v13 = vmul.f32 %v4689_v25, %v5601_v29 }
 0x519   :  { %v959_v9 = vpack.c.bf16 %v956_v10, %v955_v2 }
 0x51e   :  { %v5658_v49 = vpop.f32.mrf.mxu1 }
 0x520   :  { %3835 = vmatmul.msk.bf16.gmra.mxu1 %vm592_vm3, %v959_v9 }
 0x526   :  { %v5661_v56 = vpop.f32.mrf.mxu1 }
 0x52e   :  { %v685_v53 = vpop.f32.mrf.mxu1 }
 0x537   :  { %v1098_v57 = vpop.xlane.xlu1 %1097 }
 0x538   :  { %4690 = vrcp.f32 %v1098_v57 }
 0x53e   :  { %v4691_v41 = vpop.eup %4690 }
 0x53f   :  { %v1110_v0 = vmul.f32 %v4691_v41, %v5628_v60 }
 0x541   :  { %v1113_v20 = vpack.c.bf16 %v1110_v0, %v1109_v13 }
 0x543   :  { %3841 = vmatmul.msk.bf16.gmra.mxu3 %vm592_vm3, %v1113_v20 }
 0x553   :  { %v836_v63 = vpop.f32.mrf.mxu3 }
 0x55b   :  { %v838_v4 = vpop.f32.mrf.mxu3 }
 0x55c   :  { %v4530_v6 = vpack.i.bf16 %v838_v4, %v836_v63 }
 0x55e   :  { %4531 = vrot.lane.b32.xlu2 %v4530_v6, %s4937_s26 }
 0x56b   :  { %v841_v46 = vpop.f32.mrf.mxu3 }
 0x573   :  { %v843_v5 = vpop.f32.mrf.mxu3 }
 0x574   :  { %v4545_v1 = vpack.i.bf16 %v843_v5, %v841_v46 }
 0x576   :  { %4546 = vrot.lane.b32.xlu2 %v4545_v1, %s4937_s26 }
 0x57b   :  { %v846_v11 = vpop.f32.mrf.mxu3 }
 0x57e   :  { %v1101_v17 = vpop.xlane.xlu1 %1100  ;;  %1171 = vrot.lane.b32.xlu2 %v846_v11, %s4937_s26 }
 0x57f   :  { %4692 = vrcp.f32 %v1101_v17 }
 0x583   :  { %v848_v29 = vpop.f32.mrf.mxu3 }
 0x585   :  { %v4693_v60 = vpop.eup %4692 }
 0x586   :  { %v947_v45 = vpop.xlane.xlu0 %946  ;;  %v1111_v30 = vmul.f32 %v4693_v60, %v4681_v44  ;;  %v4400_v44 = vld [vmem:[%s6607_s9 + $0x18] sm:$0xff] }
 0x587   :  { %4694 = vrcp.f32 %v947_v45  ;;  %1310 = vmatpush.bf16.msrb.mxu0 %v4400_v44 }
 0x588   :  { %v1114_v40 = vpack.c.bf16 %v1111_v30, %v1111_v30 }
 0x58a   :  { %3842 = vmatmul.msk.bf16.gmra.mxu3 %vm592_vm3, %v1114_v40 }
 0x58b   :  { %v1144_v51 = vpop.f32.mrf.mxu3  ;;  %1311 = vmatpush.bf16.msrb.mxu0 %v4399_v24 }
 0x58d   :  { %v4695_v16 = vpop.eup %4694  ;;  %v990_v3 = vpop.f32.mrf.mxu1 }
 0x58e   :  { %v957_v22 = vmul.f32 %v4695_v16, %v4683_v43 }
 0x58f   :  { %1312 = vmatpush.bf16.msrb.mxu0 %v4398_v59 }
 0x590   :  { %v960_v26 = vpack.c.bf16 %v957_v22, %v957_v22 }
 0x592   :  { %3836 = vmatmul.msk.bf16.gmra.mxu1 %vm592_vm3, %v960_v26 }
 0x593   :  { %v1146_v58 = vpop.f32.mrf.mxu3  ;;  %1313 = vmatpush.bf16.msrb.mxu0 %v4397_v18 }
 0x594   :  { %v4540_v50 = vpack.i.bf16 %v1146_v58, %v1144_v51 }
 0x595   :  { %v992_v54 = vpop.f32.mrf.mxu1 }
 0x596   :  { %4541 = vrot.lane.b32.xlu0 %v4540_v50, %s4936_s3  ;;  %v4535_v62 = vpack.i.bf16 %v992_v54, %v990_v3 }
 0x598   :  { %4536 = vrot.lane.b32.xlu1 %v4535_v62, %s4933_s27 }
 0x59d   :  { %v995_v14 = vpop.f32.mrf.mxu1 }
 0x5a5   :  { %v997_v47 = vpop.f32.mrf.mxu1 }
 0x5a6   :  { %v4550_v28 = vpack.i.bf16 %v997_v47, %v995_v14  ;;  %v4593_v14 = vld [vmem:[%s6608_s10] ss:$0 sm:$0xff] }
 0x5a8   :  { %4551 = vrot.lane.b32.xlu0 %v4550_v28, %s4933_s27 }
 0x5b8   :  { %v4532_v36 = vpop.permute.xlu2 %4531 }
 0x5b9   :  { %v4534_v35 = vunpack.i.h.bf16 %v4532_v36  ;;  %v4533_v21 = vunpack.i.l.bf16 %v4532_v36 }
 0x5bb   :  { %v1219_v10 = vsel %vm124_vm0, %v5650_v39, %v4534_v35  ;;  %v1218_v2 = vsel %vm124_vm0, %v5643_v34, %v4533_v21 }
 0x5c6   :  { %v1149_v12 = vpop.f32.mrf.mxu3 }
 0x5ce   :  { %v1151_v37 = vpop.f32.mrf.mxu3 }
 0x5cf   :  { %v4555_v8 = vpack.i.bf16 %v1151_v37, %v1149_v12 }
 0x5d0   :  { %v4547_v4 = vpop.permute.xlu2 %4546 }
 0x5d1   :  { %4556 = vrot.lane.b32.xlu1 %v4555_v8, %s4936_s3  ;;  %v4549_v46 = vunpack.i.h.bf16 %v4547_v4  ;;  %v4548_v5 = vunpack.i.l.bf16 %v4547_v4  ;;  %v4418_v4 = vld [vmem:[#allocation2 + $0x64] sm:$0xf0] }
 0x5d3   :  { %v1221_v29 = vsel %vm124_vm0, %v5658_v49, %v4549_v46  ;;  %v1220_v60 = vsel %vm124_vm0, %v5654_v32, %v4548_v5  ;;  %v3927_v5 = vld [vmem:[#allocation2 + $0x68] sm:$0xf0] }
 0x5d8   :  { %v1172_v26 = vpop.permute.xlu2 %1171 }
 0x5d9   :  { %v1222_v58 = vsel %vm124_vm0, %v5661_v56, %v1172_v26 }
 0x608   :  { %v4542_v43 = vpop.permute.xlu0 %4541 }
 0x609   :  { %v4544_v9 = vunpack.i.h.bf16 %v4542_v43  ;;  %v4543_v53 = vunpack.i.l.bf16 %v4542_v43 }
 0x60a   :  { %v4537_v61 = vpop.permute.xlu1 %4536 }
 0x60b   :  { %v4539_v48 = vunpack.i.h.bf16 %v4537_v61  ;;  %v4538_v42 = vunpack.i.l.bf16 %v4537_v61 }
 0x60d   :  { %v1224_v57 = vsel %vm1223_vm4, %v1218_v2, %v4538_v42  ;;  %v1225_v25 = vsel %vm1223_vm4, %v1219_v10, %v4539_v48  ;;  %v1154_v41 = vpop.f32.mrf.mxu3 }
 0x60e   :  { %1211 = vrot.lane.b32.xlu1 %v1154_v41, %s4936_s3  ;;  %v1230_v13 = vsel %vm1229_vm5, %v1224_v57, %v4543_v53  ;;  %v1231_v0 = vsel %vm1229_vm5, %v1225_v25, %v4544_v9  ;;  %v3933_v41 = vld [vmem:[#allocation2 + $0x70] sm:$0xf] }
 0x60f   :  { %v1000_v20 = vpop.f32.mrf.mxu1  ;;  %v1235_v63 = vpack.c.bf16 %v1231_v0, %v1230_v13  ;;  %v4420_v13 = vld [vmem:[#allocation2 + $0x74] sm:$0xf0]  ;;  %v4419_v0 = vld [vmem:[#allocation2 + $0x74] sm:$0xf] }
 0x610   :  { %1191 = vrot.lane.b32.xlu0 %v1000_v20, %s4933_s27  ;;  %v3934_v20 = vor.u32 %v4420_v13, %v3933_v41 }
 0x611   :  { %1314 = vmatmul.bf16.vlgmr.msrb.gmra.mxu0 %v1235_v63  ;;  %v3935_v63 = vld [vmem:[#allocation2 + $0x78] sm:$0xf0] }
 0x612   :  { %1557 = vmatpush.bf16.msrb.mxu1 %v3934_v20 }
 0x615   :  { %v1156_v39 = vpop.f32.mrf.mxu3 }
 0x616   :  { %v3938_v39 = vor.u32 %v4419_v0, %v3935_v63 }
 0x617   :  { %v1002_v34 = vpop.f32.mrf.mxu1 }
 0x618   :  { %1580 = vmatpush.bf16.msra.mxu2 %v3938_v39  ;;  %v3925_v34 = vld [vmem:[#allocation2 + $0x60] sm:$0xf] }
 0x619   :  { %v3926_v46 = vor.u32 %v4418_v4, %v3925_v34 }
 0x61a   :  { %v4552_v6 = vpop.permute.xlu0 %4551 }
 0x61b   :  { %v4554_v1 = vunpack.i.h.bf16 %v4552_v6  ;;  %v4553_v11 = vunpack.i.l.bf16 %v4552_v6  ;;  %v4417_v6 = vld [vmem:[#allocation2 + $0x64] sm:$0xf]  ;;  %1558 = vmatpush.bf16.msrb.mxu1 %v3926_v46 }
 0x61d   :  { %v1226_v40 = vsel %vm1223_vm4, %v1220_v60, %v4553_v11  ;;  %v1227_v51 = vsel %vm1223_vm4, %v1221_v29, %v4554_v1  ;;  %v3930_v1 = vor.u32 %v4417_v6, %v3927_v5  ;;  %v3917_v11 = vld [vmem:[#allocation2 + $0x50] sm:$0xf]  ;;  %v4415_v29 = vld [vmem:[#allocation2 + $0x54] sm:$0xf] }
 0x61f   :  { %1581 = vmatpush.bf16.msra.mxu2 %v3930_v1 }
 0x643   :  { %v4557_v17 = vpop.permute.xlu1 %4556 }
 0x644   :  { %v4559_v45 = vunpack.i.h.bf16 %v4557_v17  ;;  %v4558_v30 = vunpack.i.l.bf16 %v4557_v17  ;;  %v4416_v17 = vld [vmem:[#allocation2 + $0x54] sm:$0xf0] }
 0x645   :  { %v3918_v60 = vor.u32 %v4416_v17, %v3917_v11 }
 0x646   :  { %v1232_v16 = vsel %vm1229_vm5, %v1226_v40, %v4558_v30  ;;  %v1233_v3 = vsel %vm1229_vm5, %v1227_v51, %v4559_v45  ;;  %v3919_v45 = vld [vmem:[#allocation2 + $0x58] sm:$0xf0]  ;;  %v3909_v40 = vld [vmem:[#allocation2 + $0x40] sm:$0xf]  ;;  %v4414_v51 = vld [vmem:[#allocation2 + $0x44] sm:$0xf0] }
 0x647   :  { %v1236_v22 = vpack.c.bf16 %v1233_v3, %v1232_v16  ;;  %v3922_v30 = vor.u32 %v4415_v29, %v3919_v45  ;;  %1559 = vmatpush.bf16.msrb.mxu1 %v3918_v60  ;;  %v4413_v16 = vld [vmem:[#allocation2 + $0x44] sm:$0xf]  ;;  %v3910_v3 = vor.u32 %v4414_v51, %v3909_v40 }
 0x649   :  { %1319 = vmatmul.bf16.gmra.mxu0 %v1236_v22  ;;  %1582 = vmatpush.bf16.msra.mxu2 %v3922_v30  ;;  %v3911_v22 = vld [vmem:[#allocation2 + $0x48] sm:$0xf0]  ;;  %v5780_v30 = vld [vmem:[%s6609_s11] ss:$0 sm:$0xff] }
 0x64a   :  { %v3914_v26 = vor.u32 %v4413_v16, %v3911_v22  ;;  %v5787_v22 = vld [vmem:[%s6610_s12] ss:$0 sm:$0xff] }
 0x64b   :  { %1560 = vmatpush.bf16.msrb.mxu1 %v3910_v3 }
 0x64d   :  { %1583 = vmatpush.bf16.msra.mxu2 %v3914_v26 }
 0x680   :  { %v1212_v50 = vpop.permute.xlu1 %1211 }
 0x682   :  { %v1192_v49 = vpop.permute.xlu0 %1191 }
 0x683   :  { %v1228_v32 = vsel %vm1223_vm4, %v1222_v58, %v1192_v49  ;;  %v3901_v58 = vld [vmem:[#allocation2 + $0x30] sm:$0xf]  ;;  %v4412_v49 = vld [vmem:[#allocation2 + $0x34] sm:$0xf0] }
 0x684   :  { %v1234_v54 = vsel %vm1229_vm5, %v1228_v32, %v1212_v50  ;;  %v4411_v50 = vld [vmem:[#allocation2 + $0x34] sm:$0xf]  ;;  %v3902_v32 = vor.u32 %v4412_v49, %v3901_v58 }
 0x685   :  { %v1237_v62 = vpack.c.bf16 %v1234_v54, %v1234_v54  ;;  %v3903_v54 = vld [vmem:[#allocation2 + $0x38] sm:$0xf0] }
 0x686   :  { %1561 = vmatpush.bf16.msrb.mxu1 %v3902_v32 }
 0x687   :  { %1324 = vmatmul.bf16.gmra.mxu0 %v1237_v62  ;;  %v3906_v62 = vor.u32 %v4411_v50, %v3903_v54 }
 0x689   :  { %1584 = vmatpush.bf16.msra.mxu2 %v3906_v62 }
 0x68e   :  { %v1315_v47 = vpop.f32.mrf.mxu0 }
 0x68f   :  { %v1316_v28 = vadd.f32 %v4593_v14, %v1315_v47  ;;  %v4410_v47 = vld [vmem:[#allocation2 + $0x24] sm:$0xf0] }
 0x691   :  { %v5725_v33 = vadd.f32 %v1316_v28, %v5104_v31  ;;  %v4409_v28 = vld [vmem:[#allocation2 + $0x24] sm:$0xf] }
 0x693   :  { %1336 = vadd.xlane.f32.xlu2 %v5725_v33 }
 0x696   :  { %v1317_v56 = vpop.f32.mrf.mxu0 }
 0x697   :  { %v1318_v55 = vadd.f32 %v4593_v14, %v1317_v56 }
 0x699   :  { %v5729_v52 = vadd.f32 %v1318_v55, %v5080_v15 }
 0x69b   :  { %1338 = vadd.xlane.f32.xlu0 %v5729_v52 }
 0x6c6   :  { %v1320_v7 = vpop.f32.mrf.mxu0 }
 0x6c7   :  { %v1321_v12 = vadd.f32 %v4593_v14, %v1320_v7  ;;  %v3895_v7 = vld [vmem:[#allocation2 + $0x28] sm:$0xf0] }
 0x6c9   :  { %v5733_v44 = vadd.f32 %v1321_v12, %v5086_v19 }
 0x6cb   :  { %1340 = vadd.xlane.f32.xlu1 %v5733_v44 }
 0x6ce   :  { %v1322_v24 = vpop.f32.mrf.mxu0 }
 0x6cf   :  { %v1323_v37 = vadd.f32 %v4593_v14, %v1322_v24  ;;  %v3898_v24 = vor.u32 %v4409_v28, %v3895_v7 }
 0x6d1   :  { %v5737_v31 = vadd.f32 %v1323_v37, %v5092_v23  ;;  %1585 = vmatpush.bf16.msra.mxu2 %v3898_v24 }
 0x6d3   :  { %1342 = vadd.xlane.f32.xlu2 %v5737_v31 }
 0x704   :  { %v1325_v8 = vpop.f32.mrf.mxu0 }
 0x705   :  { %v1326_v59 = vadd.f32 %v4593_v14, %v1325_v8  ;;  %v3893_v14 = vld [vmem:[#allocation2 + $0x20] sm:$0xf]  ;;  %v3885_v8 = vld [vmem:[#allocation2 + $0x10] sm:$0xf] }
 0x706   :  { %v1337_v15 = vpop.xlane.xlu2 %1336  ;;  %v3894_v55 = vor.u32 %v4410_v47, %v3893_v14 }
 0x707   :  { %v5741_v18 = vadd.f32 %v1326_v59, %v5098_v27  ;;  %v1346_v36 = vmul.f32 %v1337_v15, %v5107_v38  ;;  %v4408_v59 = vld [vmem:[#allocation2 + $0x14] sm:$0xf0]  ;;  %v4407_v15 = vld [vmem:[#allocation2 + $0x14] sm:$0xf] }
 0x708   :  { %1562 = vmatpush.bf16.msrb.mxu1 %v3894_v55 }
 0x709   :  { %v5745_v19 = vsub.f32 %v5725_v33, %v1346_v36  ;;  %1344 = vadd.xlane.f32.xlu2 %v5741_v18 }
 0x70b   :  { %v1356_v35 = vmul.f32 %v5745_v19, %v5745_v19 }
 0x70c   :  { %v1327_v23 = vpop.f32.mrf.mxu0 }
 0x70d   :  { %1361 = vadd.xlane.f32.xlu0 %v1356_v35  ;;  %v3886_v35 = vor.u32 %v4408_v59, %v3885_v8  ;;  %v3887_v23 = vld [vmem:[#allocation2 + $0x18] sm:$0xf0] }
 0x70e   :  { %v1339_v21 = vpop.xlane.xlu0 %1338 }
 0x70f   :  { %v1347_v43 = vmul.f32 %v1339_v21, %v5107_v38  ;;  %v3877_v21 = vld [vmem:[#allocation2] sm:$0xf]  ;;  %1563 = vmatpush.bf16.msrb.mxu1 %v3886_v35 }
 0x711   :  { %v5752_v61 = vsub.f32 %v5729_v52, %v1347_v43  ;;  %v4406_v43 = vld [vmem:[#allocation2 + $0x4] sm:$0xf0] }
 0x713   :  { %v1357_v27 = vmul.f32 %v5752_v61, %v5752_v61 }
 0x715   :  { %1363 = vadd.xlane.f32.xlu1 %v1357_v27 }
 0x73e   :  { %v1341_v48 = vpop.xlane.xlu1 %1340 }
 0x73f   :  { %v1348_v42 = vmul.f32 %v1341_v48, %v5107_v38 }
 0x741   :  { %v5758_v10 = vsub.f32 %v5733_v44, %v1348_v42  ;;  %v3890_v42 = vor.u32 %v4407_v15, %v3887_v23 }
 0x743   :  { %v1358_v2 = vmul.f32 %v5758_v10, %v5758_v10  ;;  %1586 = vmatpush.bf16.msra.mxu2 %v3890_v42 }
 0x745   :  { %1365 = vadd.xlane.f32.xlu0 %v1358_v2  ;;  %v4405_v2 = vld [vmem:[#allocation2 + $0x4] sm:$0xf] }
 0x746   :  { %v1343_v9 = vpop.xlane.xlu2 %1342 }
 0x747   :  { %v1349_v53 = vmul.f32 %v1343_v9, %v5107_v38  ;;  %v3879_v9 = vld [vmem:[#allocation2 + $0x8] sm:$0xf0] }
 0x748   :  { %v3882_v41 = vor.u32 %v4405_v2, %v3879_v9 }
 0x749   :  { %v5764_v57 = vsub.f32 %v5737_v31, %v1349_v53  ;;  %v3878_v53 = vor.u32 %v4406_v43, %v3877_v21 }
 0x74a   :  { %1587 = vmatpush.bf16.msra.mxu2 %v3882_v41 }
 0x74b   :  { %v1359_v25 = vmul.f32 %v5764_v57, %v5764_v57  ;;  %1564 = vmatpush.bf16.msrb.mxu1 %v3878_v53 }
 0x74d   :  { %1367 = vadd.xlane.f32.xlu1 %v1359_v25 }
 0x77c   :  { %v1345_v56 = vpop.xlane.xlu2 %1344 }
 0x77d   :  { %v1350_v12 = vmul.f32 %v1345_v56, %v5107_v38 }
 0x77f   :  { %v5770_v37 = vsub.f32 %v5741_v18, %v1350_v12 }
 0x780   :  { %v1362_v36 = vpop.xlane.xlu0 %1361 }
 0x781   :  { %v1371_v27 = vmul.f32 %v1362_v36, %v5107_v38  ;;  %v1360_v48 = vmul.f32 %v5770_v37, %v5770_v37 }
 0x783   :  { %v1376_v25 = vadd.f32 1e-05, %v1371_v27  ;;  %1369 = vadd.xlane.f32.xlu2 %v1360_v48 }
 0x785   :  { %4696 = vrsqrt.f32 %v1376_v25  ;;  %vm1387_vm7 = vweird.f32 %v1376_v25 }
 0x788   :  { %v1364_v13 = vpop.xlane.xlu1 %1363 }
 0x789   :  { %v1372_v0 = vmul.f32 %v1364_v13, %v5107_v38 }
 0x78b   :  { %v4697_v20 = vpop.eup %4696  ;;  %v1377_v63 = vadd.f32 1e-05, %v1372_v0 }
 0x78c   :  { %v1382_v39 = vmul.f32 %v4697_v20, %v1376_v25  ;;  %vm1388_vm6 = vweird.f32 %v4697_v20 }
 0x78d   :  { %4698 = vrsqrt.f32 %v1377_v63  ;;  %vm1389_vm8 = vmor %vm1387_vm7, %vm1388_vm6  ;;  %vm1397_vm10 = vweird.f32 %v1377_v63 }
 0x78e   :  { %v1383_v34 = vmul.f32 %v4697_v20, %v1382_v39  ;;  %v4428_v39 = vld [vmem:[#allocation5 + $0x38] sm:$0xff] }
 0x78f   :  { %1831 = vmatpush.bf16.msra.mxu3 %v4428_v39 }
 0x790   :  { %v1384_v4 = vmul.f32 0.5, %v1383_v34 }
 0x792   :  { %v1385_v6 = vsub.f32 1.5, %v1384_v4 }
 0x793   :  { %v4699_v46 = vpop.eup %4698 }
 0x794   :  { %v1386_v5 = vmul.f32 %v4697_v20, %v1385_v6  ;;  %v1392_v1 = vmul.f32 %v4699_v46, %v1377_v63  ;;  %vm1398_vm9 = vweird.f32 %v4699_v46 }
 0x795   :  { %vm1399_vm11 = vmor %vm1397_vm10, %vm1398_vm9 }
 0x796   :  { %v1393_v11 = vmul.f32 %v4699_v46, %v1392_v1  ;;  %v1390_v17 = vsel %vm1389_vm8, %v4697_v20, %v1386_v5  ;;  %v4436_v1 = vld [vmem:[#allocation5 + $0x78] sm:$0xff] }
 0x797   :  { %v1431_v45 = vmul.f32 %v1390_v17, %v5745_v19  ;;  %1854 = vmatpush.bf16.msra.mxu0 %v4436_v1  ;;  %v4426_v17 = vld [vmem:[#allocation5 + $0x28] sm:$0xff] }
 0x798   :  { %v1394_v29 = vmul.f32 0.5, %v1393_v11 }
 0x799   :  { %v1439_v3 = vmul.f32 %v5780_v30, %v1431_v45  ;;  %v4425_v45 = vld [vmem:[#allocation5 + $0x20] sm:$0xff] }
 0x79a   :  { %v1395_v60 = vsub.f32 1.5, %v1394_v29 }
 0x79b   :  { %v1447_v26 = vadd.f32 %v5787_v22, %v1439_v3  ;;  %v4432_v3 = vld [vmem:[#allocation5 + $0x58] sm:$0xff] }
 0x79c   :  { %v1396_v40 = vmul.f32 %v4699_v46, %v1395_v60  ;;  %v4435_v60 = vld [vmem:[#allocation5 + $0x70] sm:$0xff] }
 0x79d   :  { %1855 = vmatpush.bf16.msra.mxu0 %v4435_v60 }
 0x79e   :  { %v1400_v51 = vsel %vm1399_vm11, %v4699_v46, %v1396_v40  ;;  %v4427_v46 = vld [vmem:[#allocation5 + $0x30] sm:$0xff]  ;;  %v4434_v40 = vld [vmem:[#allocation5 + $0x68] sm:$0xff] }
 0x79f   :  { %v1432_v16 = vmul.f32 %v1400_v51, %v5752_v61  ;;  %1832 = vmatpush.bf16.msra.mxu3 %v4427_v46  ;;  %v4424_v51 = vld [vmem:[#allocation5 + $0x18] sm:$0xff] }
 0x7a1   :  { %v1440_v19 = vmul.f32 %v5780_v30, %v1432_v16  ;;  %1856 = vmatpush.bf16.msra.mxu0 %v4434_v40  ;;  %v1471_v16 = vld [vmem:[%s6612_s14] sm:$0x3] }
 0x7a3   :  { %v1448_v58 = vadd.f32 %v5787_v22, %v1440_v19  ;;  %1833 = vmatpush.bf16.msra.mxu3 %v4426_v17  ;;  %v4422_v19 = vld [vmem:[#allocation5 + $0x8] sm:$0xff] }
 0x7a5   :  { %v1452_v49 = vpack.c.bf16 %v1448_v58, %v1447_v26  ;;  %v4431_v26 = vld [vmem:[#allocation5 + $0x50] sm:$0xff] }
 0x7a7   :  { %1565 = vmatmul.bf16.vlgmr.msrb.gmra.mxu1 %v1452_v49  ;;  %1588 = vmatmul.bf16.vlgmr.msra.gmra.mxu2 %v1452_v49 }
 0x7a8   :  { %1834 = vmatpush.bf16.msra.mxu3 %v4425_v45 }
 0x7ac   :  { %1835 = vmatpush.bf16.msra.mxu3 %v4424_v51 }
 0x7b8   :  { %v1366_v50 = vpop.xlane.xlu0 %1365 }
 0x7b9   :  { %v1373_v32 = vmul.f32 %v1366_v50, %v5107_v38  ;;  %v4421_v50 = vld [vmem:[#allocation5] sm:$0xff] }
 0x7bb   :  { %v1378_v61 = vadd.f32 1e-05, %v1373_v32 }
 0x7bd   :  { %4700 = vrsqrt.f32 %v1378_v61  ;;  %vm1407_vm13 = vweird.f32 %v1378_v61 }
 0x7c0   :  { %v1368_v54 = vpop.xlane.xlu1 %1367 }
 0x7c1   :  { %v1374_v62 = vmul.f32 %v1368_v54, %v5107_v38  ;;  %v4430_v54 = vld [vmem:[#allocation5 + $0x48] sm:$0xff] }
 0x7c3   :  { %v4701_v14 = vpop.eup %4700  ;;  %v1379_v47 = vadd.f32 1e-05, %v1374_v62 }
 0x7c4   :  { %v1402_v28 = vmul.f32 %v4701_v14, %v1378_v61  ;;  %vm1408_vm12 = vweird.f32 %v4701_v14  ;;  %v5810_v61 = vperm.slane %v1471_v16, 1 }
 0x7c5   :  { %4702 = vrsqrt.f32 %v1379_v47  ;;  %vm1409_vm14 = vmor %vm1407_vm13, %vm1408_vm12  ;;  %vm1417_vm1 = vweird.f32 %v1379_v47 }
 0x7c6   :  { %v1403_v56 = vmul.f32 %v4701_v14, %v1402_v28 }
 0x7c8   :  { %v1404_v55 = vmul.f32 0.5, %v1403_v56  ;;  %v4429_v56 = vld [vmem:[#allocation5 + $0x40] sm:$0xff] }
 0x7ca   :  { %v1405_v7 = vsub.f32 1.5, %v1404_v55 }
 0x7cb   :  { %v4703_v12 = vpop.eup %4702 }
 0x7cc   :  { %v1406_v24 = vmul.f32 %v4701_v14, %v1405_v7  ;;  %v1412_v8 = vmul.f32 %v4703_v12, %v1379_v47  ;;  %vm1418_vm15 = vweird.f32 %v4703_v12 }
 0x7cd   :  { %vm1419_vm6 = vmor %vm1417_vm1, %vm1418_vm15 }
 0x7ce   :  { %v1413_v59 = vmul.f32 %v4703_v12, %v1412_v8  ;;  %v1410_v36 = vsel %vm1409_vm14, %v4701_v14, %v1406_v24 }
 0x7cf   :  { %v1433_v23 = vmul.f32 %v1410_v36, %v5758_v10 }
 0x7d0   :  { %v1414_v15 = vmul.f32 0.5, %v1413_v59 }
 0x7d1   :  { %v1441_v48 = vmul.f32 %v5780_v30, %v1433_v23 }
 0x7d2   :  { %v1415_v35 = vsub.f32 1.5, %v1414_v15 }
 0x7d3   :  { %v1449_v2 = vadd.f32 %v5787_v22, %v1441_v48 }
 0x7d4   :  { %v1416_v21 = vmul.f32 %v4703_v12, %v1415_v35 }
 0x7d6   :  { %v1420_v43 = vsel %vm1419_vm6, %v4703_v12, %v1416_v21 }
 0x7d7   :  { %v1434_v27 = vmul.f32 %v1420_v43, %v5764_v57 }
 0x7d9   :  { %v1442_v42 = vmul.f32 %v5780_v30, %v1434_v27 }
 0x7db   :  { %v1450_v9 = vadd.f32 %v5787_v22, %v1442_v42 }
 0x7dd   :  { %v1453_v53 = vpack.c.bf16 %v1450_v9, %v1449_v2 }
 0x7df   :  { %1570 = vmatmul.bf16.gmra.mxu1 %v1453_v53  ;;  %1593 = vmatmul.bf16.gmra.mxu2 %v1453_v53 }
 0x7f6   :  { %v1370_v25 = vpop.xlane.xlu2 %1369 }
 0x7f7   :  { %v1375_v10 = vmul.f32 %v1370_v25, %v5107_v38 }
 0x7f9   :  { %v1380_v41 = vadd.f32 1e-05, %v1375_v10 }
 0x7fb   :  { %4704 = vrsqrt.f32 %v1380_v41  ;;  %vm1427_vm8 = vweird.f32 %v1380_v41 }
 0x801   :  { %v4705_v13 = vpop.eup %4704 }
 0x802   :  { %v1422_v0 = vmul.f32 %v4705_v13, %v1380_v41  ;;  %vm1428_vm7 = vweird.f32 %v4705_v13 }
 0x803   :  { %vm1429_vm9 = vmor %vm1427_vm8, %vm1428_vm7 }
 0x804   :  { %v1423_v20 = vmul.f32 %v4705_v13, %v1422_v0 }
 0x806   :  { %v1424_v57 = vmul.f32 0.5, %v1423_v20 }
 0x808   :  { %v1425_v63 = vsub.f32 1.5, %v1424_v57 }
 0x80a   :  { %v1426_v34 = vmul.f32 %v4705_v13, %v1425_v63 }
 0x80c   :  { %v1430_v4 = vsel %vm1429_vm9, %v4705_v13, %v1426_v34 }
 0x80d   :  { %v1435_v6 = vmul.f32 %v1430_v4, %v5770_v37  ;;  %v4433_v37 = vld [vmem:[#allocation5 + $0x60] sm:$0xff] }
 0x80e   :  { %1857 = vmatpush.bf16.msra.mxu0 %v4433_v37 }
 0x80f   :  { %v1443_v5 = vmul.f32 %v5780_v30, %v1435_v6  ;;  %v4423_v30 = vld [vmem:[#allocation5 + $0x10] sm:$0xff] }
 0x810   :  { %1836 = vmatpush.bf16.msra.mxu3 %v4423_v30 }
 0x811   :  { %v1451_v11 = vadd.f32 %v5787_v22, %v1443_v5  ;;  %v5807_v22 = vperm.slane %v1471_v16, 0 }
 0x812   :  { %1858 = vmatpush.bf16.msra.mxu0 %v4432_v3 }
 0x813   :  { %v1454_v29 = vpack.c.bf16 %v1451_v11, %v1451_v11 }
 0x814   :  { %1837 = vmatpush.bf16.msra.mxu3 %v4422_v19 }
 0x815   :  { %1575 = vmatmul.bf16.gmra.mxu1 %v1454_v29  ;;  %1598 = vmatmul.bf16.gmra.mxu2 %v1454_v29 }
 0x816   :  { %1859 = vmatpush.bf16.msra.mxu0 %v4431_v26 }
 0x818   :  { %1838 = vmatpush.bf16.msra.mxu3 %v4421_v50 }
 0x81a   :  { %1860 = vmatpush.bf16.msra.mxu0 %v4430_v54 }
 0x81e   :  { %1861 = vmatpush.bf16.msra.mxu0 %v4429_v56 }
 0x824   :  { %v1566_v58 = vpop.f32.mrf.mxu1 }
 0x825   :  { %v1567_v49 = vadd.f32 %v1566_v58, %v5807_v22 }
 0x827   :  { %v1603_v32 = vmul.f32 %v1567_v49, %v1567_v49 }
 0x829   :  { %v1613_v62 = vmul.f32 %v1603_v32, %v1567_v49 }
 0x82a   :  { %v1589_v14 = vpop.f32.mrf.mxu2 }
 0x82b   :  { %v1623_v47 = vmul.f32 0.044715, %v1613_v62  ;;  %v1590_v28 = vadd.f32 %v1589_v14, %v5810_v61 }
 0x82c   :  { %v1568_v55 = vpop.f32.mrf.mxu1 }
 0x82d   :  { %v1633_v7 = vadd.f32 %v1623_v47, %v1567_v49  ;;  %v1604_v12 = vmul.f32 %v1590_v28, %v1590_v28  ;;  %v1569_v24 = vadd.f32 %v1568_v55, %v5807_v22 }
 0x82f   :  { %v1643_v8 = vmul.f32 0.7978846, %v1633_v7  ;;  %v1614_v59 = vmul.f32 %v1604_v12, %v1590_v28  ;;  %v1605_v15 = vmul.f32 %v1569_v24, %v1569_v24 }
 0x831   :  { %v1624_v36 = vmul.f32 0.044715, %v1614_v59  ;;  %v1615_v35 = vmul.f32 %v1605_v15, %v1569_v24  ;;  %4706 = vtanh.f32 %v1643_v8 }
 0x832   :  { %v1591_v23 = vpop.f32.mrf.mxu2 }
 0x833   :  { %v1634_v21 = vadd.f32 %v1624_v36, %v1590_v28  ;;  %v1625_v43 = vmul.f32 0.044715, %v1615_v35  ;;  %v1592_v27 = vadd.f32 %v1591_v23, %v5810_v61 }
 0x835   :  { %v1644_v48 = vmul.f32 0.7978846, %v1634_v21  ;;  %v1635_v42 = vadd.f32 %v1625_v43, %v1569_v24  ;;  %v1606_v2 = vmul.f32 %v1592_v27, %v1592_v27 }
 0x837   :  { %v1645_v9 = vmul.f32 0.7978846, %v1635_v42  ;;  %v1616_v53 = vmul.f32 %v1606_v2, %v1592_v27  ;;  %4708 = vtanh.f32 %v1644_v48  ;;  %v4707_v25 = vpop.eup %4706 }
 0x838   :  { %v1663_v13 = vadd.f32 1.0, %v4707_v25 }
 0x839   :  { %4710 = vtanh.f32 %v1645_v9  ;;  %v1626_v10 = vmul.f32 0.044715, %v1616_v53 }
 0x83a   :  { %v1673_v63 = vmul.f32 0.5, %v1663_v13 }
 0x83b   :  { %v1636_v41 = vadd.f32 %v1626_v10, %v1592_v27 }
 0x83c   :  { %v1683_v6 = vmul.f32 %v1673_v63, %v1567_v49 }
 0x83d   :  { %v1646_v0 = vmul.f32 0.7978846, %v1636_v41  ;;  %v4709_v20 = vpop.eup %4708 }
 0x83e   :  { %v1664_v34 = vadd.f32 1.0, %v4709_v20 }
 0x83f   :  { %v4711_v57 = vpop.eup %4710  ;;  %4712 = vtanh.f32 %v1646_v0 }
 0x840   :  { %v1665_v39 = vadd.f32 1.0, %v4711_v57  ;;  %v1674_v1 = vmul.f32 0.5, %v1664_v34 }
 0x842   :  { %v1675_v4 = vmul.f32 0.5, %v1665_v39  ;;  %v1684_v60 = vmul.f32 %v1674_v1, %v1590_v28 }
 0x844   :  { %v1685_v46 = vmul.f32 %v1675_v4, %v1569_v24 }
 0x845   :  { %v4713_v5 = vpop.eup %4712 }
 0x846   :  { %v1666_v11 = vadd.f32 1.0, %v4713_v5  ;;  %v1693_v17 = vpack.c.bf16 %v1685_v46, %v1683_v6 }
 0x848   :  { %v1676_v29 = vmul.f32 0.5, %v1666_v11  ;;  %1839 = vmatmul.bf16.vlgmr.msra.gmra.mxu3 %v1693_v17 }
 0x84a   :  { %v1686_v45 = vmul.f32 %v1676_v29, %v1592_v27 }
 0x84c   :  { %v1694_v40 = vpack.c.bf16 %v1686_v45, %v1684_v60 }
 0x84e   :  { %1862 = vmatmul.bf16.vlgmr.msra.gmra.mxu0 %v1694_v40 }
 0x85c   :  { %v1571_v51 = vpop.f32.mrf.mxu1 }
 0x85d   :  { %v1572_v37 = vadd.f32 %v1571_v51, %v5807_v22 }
 0x85f   :  { %v1607_v30 = vmul.f32 %v1572_v37, %v1572_v37 }
 0x861   :  { %v1617_v16 = vmul.f32 %v1607_v30, %v1572_v37 }
 0x862   :  { %v1594_v3 = vpop.f32.mrf.mxu2 }
 0x863   :  { %v1627_v19 = vmul.f32 0.044715, %v1617_v16  ;;  %v1595_v26 = vadd.f32 %v1594_v3, %v5810_v61 }
 0x864   :  { %v1573_v58 = vpop.f32.mrf.mxu1 }
 0x865   :  { %v1637_v49 = vadd.f32 %v1627_v19, %v1572_v37  ;;  %v1608_v50 = vmul.f32 %v1595_v26, %v1595_v26  ;;  %v1574_v32 = vadd.f32 %v1573_v58, %v5807_v22 }
 0x867   :  { %v1618_v54 = vmul.f32 %v1608_v50, %v1595_v26  ;;  %v1609_v62 = vmul.f32 %v1574_v32, %v1574_v32  ;;  %v1647_v14 = vmul.f32 0.7978846, %v1637_v49 }
 0x869   :  { %v1628_v47 = vmul.f32 0.044715, %v1618_v54  ;;  %v1619_v28 = vmul.f32 %v1609_v62, %v1574_v32  ;;  %4714 = vtanh.f32 %v1647_v14 }
 0x86a   :  { %v1596_v56 = vpop.f32.mrf.mxu2 }
 0x86b   :  { %v1638_v55 = vadd.f32 %v1628_v47, %v1595_v26  ;;  %v1629_v7 = vmul.f32 0.044715, %v1619_v28  ;;  %v1597_v12 = vadd.f32 %v1596_v56, %v5810_v61  ;;  %v4596_v47 = vld [vmem:[%s6614_s16] ss:$0 sm:$0xff] }
 0x86d   :  { %v1648_v24 = vmul.f32 0.7978846, %v1638_v55  ;;  %v1610_v8 = vmul.f32 %v1597_v12, %v1597_v12  ;;  %v1639_v59 = vadd.f32 %v1629_v7, %v1574_v32 }
 0x86f   :  { %v1620_v15 = vmul.f32 %v1610_v8, %v1597_v12  ;;  %v1649_v36 = vmul.f32 0.7978846, %v1639_v59  ;;  %4716 = vtanh.f32 %v1648_v24  ;;  %v4715_v35 = vpop.eup %4714 }
 0x870   :  { %v1667_v43 = vadd.f32 1.0, %v4715_v35 }
 0x871   :  { %v1630_v23 = vmul.f32 0.044715, %v1620_v15  ;;  %4718 = vtanh.f32 %v1649_v36 }
 0x872   :  { %v1677_v9 = vmul.f32 0.5, %v1667_v43 }
 0x873   :  { %v1640_v21 = vadd.f32 %v1630_v23, %v1597_v12 }
 0x874   :  { %v1687_v10 = vmul.f32 %v1677_v9, %v1572_v37 }
 0x875   :  { %v1650_v27 = vmul.f32 0.7978846, %v1640_v21  ;;  %v4717_v48 = vpop.eup %4716 }
 0x876   :  { %v1668_v25 = vadd.f32 1.0, %v4717_v48 }
 0x877   :  { %v4719_v42 = vpop.eup %4718  ;;  %4720 = vtanh.f32 %v1650_v27 }
 0x878   :  { %v1669_v2 = vadd.f32 1.0, %v4719_v42  ;;  %v1678_v57 = vmul.f32 0.5, %v1668_v25 }
 0x87a   :  { %v1679_v53 = vmul.f32 0.5, %v1669_v2  ;;  %v1688_v39 = vmul.f32 %v1678_v57, %v1595_v26 }
 0x87c   :  { %v1689_v41 = vmul.f32 %v1679_v53, %v1574_v32 }
 0x87d   :  { %v4721_v13 = vpop.eup %4720 }
 0x87e   :  { %v1695_v0 = vpack.c.bf16 %v1689_v41, %v1687_v10  ;;  %v1670_v20 = vadd.f32 1.0, %v4721_v13 }
 0x880   :  { %1844 = vmatmul.bf16.gmra.mxu3 %v1695_v0  ;;  %v1680_v63 = vmul.f32 0.5, %v1670_v20 }
 0x882   :  { %v1690_v34 = vmul.f32 %v1680_v63, %v1597_v12 }
 0x884   :  { %v1696_v4 = vpack.c.bf16 %v1690_v34, %v1688_v39 }
 0x886   :  { %1867 = vmatmul.bf16.gmra.mxu0 %v1696_v4 }
 0x892   :  { %v1576_v6 = vpop.f32.mrf.mxu1 }
 0x893   :  { %v1577_v46 = vadd.f32 %v1576_v6, %v5807_v22 }
 0x895   :  { %v1611_v5 = vmul.f32 %v1577_v46, %v1577_v46 }
 0x897   :  { %v1621_v1 = vmul.f32 %v1611_v5, %v1577_v46 }
 0x898   :  { %v1599_v11 = vpop.f32.mrf.mxu2 }
 0x899   :  { %v1631_v17 = vmul.f32 0.044715, %v1621_v1  ;;  %v1600_v29 = vadd.f32 %v1599_v11, %v5810_v61 }
 0x89a   :  { %v1578_v60 = vpop.f32.mrf.mxu1 }
 0x89b   :  { %v1641_v45 = vadd.f32 %v1631_v17, %v1577_v46  ;;  %v1612_v40 = vmul.f32 %v1600_v29, %v1600_v29  ;;  %v4124_v60 = vld [vmem:[%s6605_s7 + $0x168] sm:$0xf] }
 0x89d   :  { %v1651_v51 = vmul.f32 0.7978846, %v1641_v45  ;;  %v1622_v37 = vmul.f32 %v1612_v40, %v1600_v29  ;;  %v4459_v45 = vld [vmem:[%s6605_s7 + $0x170] sm:$0xf0]  ;;  %v4458_v40 = vld [vmem:[%s6605_s7 + $0x16c] sm:$0xf] }
 0x89f   :  { %v1632_v30 = vmul.f32 0.044715, %v1622_v37  ;;  %4722 = vtanh.f32 %v1651_v51  ;;  %v4125_v51 = vor.u32 %v4459_v45, %v4124_v60  ;;  %v4126_v37 = vld [vmem:[%s6605_s7 + $0x174] sm:$0xf0]  ;;  %v4445_v45 = vld [vmem:[%s6605_s7 + $0x100] sm:$0xf0] }
 0x8a0   :  { %v1601_v16 = vpop.f32.mrf.mxu2  ;;  %v4072_v60 = vld [vmem:[%s6605_s7 + $0xf8] sm:$0xf] }
 0x8a1   :  { %v1642_v3 = vadd.f32 %v1632_v30, %v1600_v29  ;;  %v4132_v30 = vld [vmem:[%s6605_s7 + $0x170] sm:$0xf]  ;;  %v4460_v16 = vld [vmem:[%s6605_s7 + $0x178] sm:$0xf0]  ;;  %2175 = vmatpush.bf16.msra.mxu1 %v4125_v51  ;;  %v4073_v51 = vor.u32 %v4445_v45, %v4072_v60 }
 0x8a3   :  { %v1652_v19 = vmul.f32 0.7978846, %v1642_v3  ;;  %v4129_v3 = vor.u32 %v4458_v40, %v4126_v37  ;;  %v4052_v37 = vld [vmem:[%s6605_s7 + $0xd8] sm:$0xf] }
 0x8a5   :  { %v4723_v26 = vpop.eup %4722  ;;  %4724 = vtanh.f32 %v1652_v19  ;;  %v4133_v19 = vor.u32 %v4460_v16, %v4132_v30  ;;  %2198 = vmatpush.bf16.msrb.mxu2 %v4129_v3  ;;  %v4441_v30 = vld [vmem:[%s6605_s7 + $0xe0] sm:$0xf0]  ;;  %v4440_v16 = vld [vmem:[%s6605_s7 + $0xdc] sm:$0xf] }
 0x8a6   :  { %v1671_v58 = vadd.f32 1.0, %v4723_v26  ;;  %v4112_v26 = vld [vmem:[%s6605_s7 + $0x150] sm:$0xf] }
 0x8a7   :  { %2221 = vmatpush.bf16.msrb.mxu3 %v4133_v19  ;;  %v4053_v19 = vor.u32 %v4441_v30, %v4052_v37 }
 0x8a8   :  { %v1681_v22 = vmul.f32 0.5, %v1671_v58  ;;  %v4456_v58 = vld [vmem:[%s6605_s7 + $0x158] sm:$0xf0] }
 0x8aa   :  { %v1691_v49 = vmul.f32 %v1681_v22, %v1577_v46  ;;  %v4455_v22 = vld [vmem:[%s6605_s7 + $0x154] sm:$0xf] }
 0x8ab   :  { %v4725_v50 = vpop.eup %4724 }
 0x8ac   :  { %v1697_v32 = vpack.c.bf16 %v1691_v49, %v1691_v49  ;;  %v1672_v54 = vadd.f32 1.0, %v4725_v50  ;;  %v4113_v50 = vor.u32 %v4456_v58, %v4112_v26  ;;  %v4054_v26 = vld [vmem:[%s6605_s7 + $0xe4] sm:$0xf0]  ;;  %v4060_v58 = vld [vmem:[%s6605_s7 + $0xe0] sm:$0xf] }
 0x8ae   :  { %1849 = vmatmul.bf16.gmra.mxu3 %v1697_v32  ;;  %v1682_v61 = vmul.f32 0.5, %v1672_v54  ;;  %v4114_v32 = vld [vmem:[%s6605_s7 + $0x15c] sm:$0xf0]  ;;  %v4120_v54 = vld [vmem:[%s6605_s7 + $0x158] sm:$0xf]  ;;  %2176 = vmatpush.bf16.msra.mxu1 %v4113_v50  ;;  %v4057_v50 = vor.u32 %v4440_v16, %v4054_v26 }
 0x8b0   :  { %v1692_v62 = vmul.f32 %v1682_v61, %v1600_v29  ;;  %v4457_v61 = vld [vmem:[%s6605_s7 + $0x160] sm:$0xf0] }
 0x8b2   :  { %v1698_v14 = vpack.c.bf16 %v1692_v62, %v1692_v62 }
 0x8b4   :  { %1872 = vmatmul.bf16.gmra.mxu0 %v1698_v14  ;;  %v4117_v14 = vor.u32 %v4455_v22, %v4114_v32  ;;  %v4442_v22 = vld [vmem:[%s6605_s7 + $0xe8] sm:$0xf0] }
 0x8b5   :  { %v4061_v32 = vor.u32 %v4442_v22, %v4060_v58 }
 0x8b6   :  { %2199 = vmatpush.bf16.msrb.mxu2 %v4117_v14 }
 0x8cb   :  { %v1840_v28 = vpop.f32.mrf.mxu3  ;;  %v1863_v56 = vpop.f32.mrf.mxu0 }
 0x8cc   :  { %v1841_v55 = vadd.f32 %v4596_v47, %v1840_v28 }
 0x8ce   :  { %v1864_v7 = vadd.f32 %v1863_v56, %v1841_v55  ;;  %v4100_v56 = vld [vmem:[%s6605_s7 + $0x138] sm:$0xf]  ;;  %v4453_v55 = vld [vmem:[%s6605_s7 + $0x140] sm:$0xf0] }
 0x8d0   :  { %v5825_v12 = vadd.f32 %v1864_v7, %v5725_v33  ;;  %v4452_v7 = vld [vmem:[%s6605_s7 + $0x13c] sm:$0xf] }
 0x8d2   :  { %1886 = vadd.xlane.f32.xlu0 %v5825_v12 }
 0x8d3   :  { %v1842_v24 = vpop.f32.mrf.mxu3  ;;  %v1865_v59 = vpop.f32.mrf.mxu0 }
 0x8d4   :  { %v1843_v8 = vadd.f32 %v4596_v47, %v1842_v24  ;;  %v4101_v24 = vor.u32 %v4453_v55, %v4100_v56  ;;  %v4048_v56 = vld [vmem:[%s6605_s7 + $0xc8] sm:$0xf]  ;;  %v4439_v55 = vld [vmem:[%s6605_s7 + $0xd0] sm:$0xf0] }
 0x8d6   :  { %v1866_v15 = vadd.f32 %v1865_v59, %v1843_v8  ;;  %v4102_v8 = vld [vmem:[%s6605_s7 + $0x144] sm:$0xf0]  ;;  %v4108_v59 = vld [vmem:[%s6605_s7 + $0x140] sm:$0xf]  ;;  %2177 = vmatpush.bf16.msra.mxu1 %v4101_v24 }
 0x8d8   :  { %v5829_v36 = vadd.f32 %v1866_v15, %v5729_v52  ;;  %v4454_v15 = vld [vmem:[%s6605_s7 + $0x148] sm:$0xf0] }
 0x8da   :  { %1888 = vadd.xlane.f32.xlu1 %v5829_v36 }
 0x903   :  { %v1845_v35 = vpop.f32.mrf.mxu3  ;;  %v1868_v23 = vpop.f32.mrf.mxu0 }
 0x904   :  { %v1846_v21 = vadd.f32 %v4596_v47, %v1845_v35 }
 0x906   :  { %v1869_v43 = vadd.f32 %v1868_v23, %v1846_v21  ;;  %v4105_v23 = vor.u32 %v4452_v7, %v4102_v8  ;;  %v4109_v21 = vor.u32 %v4454_v15, %v4108_v59  ;;  %v4049_v8 = vor.u32 %v4439_v55, %v4048_v56 }
 0x908   :  { %v5833_v27 = vadd.f32 %v1869_v43, %v5733_v44  ;;  %2200 = vmatpush.bf16.msrb.mxu2 %v4105_v23  ;;  %v4088_v43 = vld [vmem:[%s6605_s7 + $0x120] sm:$0xf] }
 0x90a   :  { %1890 = vadd.xlane.f32.xlu2 %v5833_v27 }
 0x90b   :  { %v1847_v33 = vpop.f32.mrf.mxu3  ;;  %v1870_v42 = vpop.f32.mrf.mxu0 }
 0x90c   :  { %v1848_v48 = vadd.f32 %v4596_v47, %v1847_v33  ;;  %v4450_v33 = vld [vmem:[%s6605_s7 + $0x128] sm:$0xf0] }
 0x90e   :  { %v1871_v2 = vadd.f32 %v1870_v42, %v1848_v48  ;;  %v4449_v48 = vld [vmem:[%s6605_s7 + $0x124] sm:$0xf]  ;;  %v4089_v42 = vor.u32 %v4450_v33, %v4088_v43 }
 0x910   :  { %v5837_v9 = vadd.f32 %v1871_v2, %v5737_v31  ;;  %v4090_v2 = vld [vmem:[%s6605_s7 + $0x12c] sm:$0xf0]  ;;  %2178 = vmatpush.bf16.msra.mxu1 %v4089_v42 }
 0x912   :  { %1892 = vadd.xlane.f32.xlu0 %v5837_v9 }
 0x931   :  { %v1850_v52 = vpop.f32.mrf.mxu3  ;;  %v1873_v53 = vpop.f32.mrf.mxu0 }
 0x932   :  { %v1851_v25 = vadd.f32 %v4596_v47, %v1850_v52  ;;  %v4121_v47 = vor.u32 %v4457_v61, %v4120_v54  ;;  %v4096_v52 = vld [vmem:[%s6605_s7 + $0x128] sm:$0xf]  ;;  %v4040_v54 = vld [vmem:[%s6605_s7 + $0xc0] sm:$0xf]  ;;  %v4438_v61 = vld [vmem:[%s6605_s7 + $0xc8] sm:$0xf0] }
 0x933   :  { %v4041_v14 = vor.u32 %v4438_v61, %v4040_v54 }
 0x934   :  { %v1874_v10 = vadd.f32 %v1873_v53, %v1851_v25  ;;  %2222 = vmatpush.bf16.msrb.mxu3 %v4121_v47  ;;  %v4451_v53 = vld [vmem:[%s6605_s7 + $0x130] sm:$0xf0]  ;;  %v4093_v25 = vor.u32 %v4449_v48, %v4090_v2  ;;  %v4042_v47 = vld [vmem:[%s6605_s7 + $0xcc] sm:$0xf0] }
 0x936   :  { %v5841_v41 = vadd.f32 %v1874_v10, %v5741_v18  ;;  %v4097_v10 = vor.u32 %v4451_v53, %v4096_v52  ;;  %2201 = vmatpush.bf16.msrb.mxu2 %v4093_v25 }
 0x938   :  { %1894 = vadd.xlane.f32.xlu1 %v5841_v41  ;;  %2223 = vmatpush.bf16.msrb.mxu3 %v4109_v21 }
 0x939   :  { %v1852_v44 = vpop.f32.mrf.mxu3  ;;  %v1875_v13 = vpop.f32.mrf.mxu0 }
 0x93a   :  { %v4076_v44 = vld [vmem:[%s6605_s7 + $0x108] sm:$0xf]  ;;  %v4447_v13 = vld [vmem:[%s6605_s7 + $0x110] sm:$0xf0] }
 0x93c   :  { %2224 = vmatpush.bf16.msrb.mxu3 %v4097_v10 }
 0x945   :  { %v1887_v0 = vpop.xlane.xlu0 %1886 }
 0x946   :  { %v1896_v20 = vmul.f32 %v1887_v0, %v5107_v38  ;;  %v4446_v0 = vld [vmem:[%s6605_s7 + $0x10c] sm:$0xf] }
 0x948   :  { %v5846_v57 = vsub.f32 %v5825_v12, %v1896_v20  ;;  %v4077_v20 = vor.u32 %v4447_v13, %v4076_v44 }
 0x94a   :  { %v1906_v31 = vmul.f32 %v5846_v57, %v5846_v57  ;;  %2179 = vmatpush.bf16.msra.mxu1 %v4077_v20 }
 0x94c   :  { %1911 = vadd.xlane.f32.xlu2 %v1906_v31  ;;  %v4078_v31 = vld [vmem:[%s6605_s7 + $0x114] sm:$0xf0] }
 0x94d   :  { %v1889_v63 = vpop.xlane.xlu1 %1888 }
 0x94e   :  { %v1897_v39 = vmul.f32 %v1889_v63, %v5107_v38  ;;  %v4084_v63 = vld [vmem:[%s6605_s7 + $0x110] sm:$0xf] }
 0x950   :  { %v5852_v18 = vsub.f32 %v5829_v36, %v1897_v39  ;;  %v4448_v39 = vld [vmem:[%s6605_s7 + $0x118] sm:$0xf0] }
 0x952   :  { %v1907_v34 = vmul.f32 %v5852_v18, %v5852_v18 }
 0x954   :  { %1913 = vadd.xlane.f32.xlu0 %v1907_v34  ;;  %v4081_v34 = vor.u32 %v4446_v0, %v4078_v31  ;;  %v6024_v0 = vld [vmem:[%s6603_s5 + $0x1] ss:$0 sm:$0xff] }
 0x956   :  { %2202 = vmatpush.bf16.msrb.mxu2 %v4081_v34  ;;  %v4598_v34 = vld [vmem:[%s6604_s6 + $0x1] ss:$0 sm:$0xff] }
 0x97d   :  { %v1891_v4 = vpop.xlane.xlu2 %1890 }
 0x97e   :  { %v1898_v6 = vmul.f32 %v1891_v4, %v5107_v38  ;;  %v4085_v4 = vor.u32 %v4448_v39, %v4084_v63 }
 0x980   :  { %v5858_v46 = vsub.f32 %v5833_v27, %v1898_v6  ;;  %v4064_v6 = vld [vmem:[%s6605_s7 + $0xf0] sm:$0xf]  ;;  %2225 = vmatpush.bf16.msrb.mxu3 %v4085_v4 }
 0x982   :  { %v1908_v5 = vmul.f32 %v5858_v46, %v5858_v46 }
 0x984   :  { %1915 = vadd.xlane.f32.xlu1 %v1908_v5  ;;  %v4444_v5 = vld [vmem:[%s6605_s7 + $0xf8] sm:$0xf0]  ;;  %2226 = vmatpush.bf16.msrb.mxu3 %v4073_v51 }
 0x985   :  { %v1893_v1 = vpop.xlane.xlu0 %1892 }
 0x986   :  { %v1899_v11 = vmul.f32 %v1893_v1, %v5107_v38  ;;  %v4443_v1 = vld [vmem:[%s6605_s7 + $0xf4] sm:$0xf] }
 0x988   :  { %v5864_v17 = vsub.f32 %v5837_v9, %v1899_v11  ;;  %v4065_v11 = vor.u32 %v4444_v5, %v4064_v6  ;;  %2227 = vmatpush.bf16.msrb.mxu3 %v4061_v32 }
 0x98a   :  { %v1909_v29 = vmul.f32 %v5864_v17, %v5864_v17  ;;  %2180 = vmatpush.bf16.msra.mxu1 %v4065_v11 }
 0x98c   :  { %1917 = vadd.xlane.f32.xlu2 %v1909_v29  ;;  %v4066_v29 = vld [vmem:[%s6605_s7 + $0xfc] sm:$0xf0]  ;;  %2228 = vmatpush.bf16.msrb.mxu3 %v4049_v8 }
 0x98d   :  { %v4069_v40 = vor.u32 %v4443_v1, %v4066_v29 }
 0x98e   :  { %2181 = vmatpush.bf16.msra.mxu1 %v4053_v19 }
 0x98f   :  { %2203 = vmatpush.bf16.msrb.mxu2 %v4069_v40 }
 0x992   :  { %2182 = vmatpush.bf16.msra.mxu1 %v4041_v14 }
 0x993   :  { %2204 = vmatpush.bf16.msrb.mxu2 %v4057_v50 }
 0x9ab   :  { %v1895_v49 = vpop.xlane.xlu1 %1894 }
 0x9ac   :  { %v1900_v62 = vmul.f32 %v1895_v49, %v5107_v38 }
 0x9ae   :  { %v5906_v28 = vsub.f32 %v5841_v41, %v1900_v62  ;;  %v4437_v62 = vld [vmem:[%s6605_s7 + $0xc4] sm:$0xf] }
 0x9af   :  { %v4045_v24 = vor.u32 %v4437_v62, %v4042_v47 }
 0x9b0   :  { %v1910_v35 = vmul.f32 %v5906_v28, %v5906_v28 }
 0x9b1   :  { %2205 = vmatpush.bf16.msrb.mxu2 %v4045_v24 }
 0x9b2   :  { %1919 = vadd.xlane.f32.xlu0 %v1910_v35 }
 0x9bf   :  { %v1912_v3 = vpop.xlane.xlu2 %1911 }
 0x9c0   :  { %v1921_v49 = vmul.f32 %v1912_v3, %v5107_v38 }
 0x9c2   :  { %v1926_v7 = vadd.f32 1e-05, %v1921_v49 }
 0x9c4   :  { %4726 = vrsqrt.f32 %v1926_v7  ;;  %vm1937_vm11 = vweird.f32 %v1926_v7 }
 0x9c7   :  { %v1914_v59 = vpop.xlane.xlu0 %1913 }
 0x9c8   :  { %v1922_v15 = vmul.f32 %v1914_v59, %v5107_v38 }
 0x9ca   :  { %v4727_v35 = vpop.eup %4726  ;;  %v1927_v23 = vadd.f32 1e-05, %v1922_v15 }
 0x9cb   :  { %v1932_v21 = vmul.f32 %v4727_v35, %v1926_v7  ;;  %vm1938_vm10 = vweird.f32 %v4727_v35 }
 0x9cc   :  { %4728 = vrsqrt.f32 %v1927_v23  ;;  %vm1939_vm12 = vmor %vm1937_vm11, %vm1938_vm10  ;;  %vm1947_vm14 = vweird.f32 %v1927_v23 }
 0x9cd   :  { %v1933_v43 = vmul.f32 %v4727_v35, %v1932_v21 }
 0x9cf   :  { %v1934_v33 = vmul.f32 0.5, %v1933_v43 }
 0x9d1   :  { %v1935_v48 = vsub.f32 1.5, %v1934_v33 }
 0x9d2   :  { %v4729_v42 = vpop.eup %4728 }
 0x9d3   :  { %v1936_v2 = vmul.f32 %v4727_v35, %v1935_v48  ;;  %v1942_v52 = vmul.f32 %v4729_v42, %v1927_v23  ;;  %vm1948_vm13 = vweird.f32 %v4729_v42 }
 0x9d4   :  { %vm1949_vm15 = vmor %vm1947_vm14, %vm1948_vm13 }
 0x9d5   :  { %v1943_v53 = vmul.f32 %v4729_v42, %v1942_v52  ;;  %v1940_v25 = vsel %vm1939_vm12, %v4727_v35, %v1936_v2 }
 0x9d6   :  { %v1981_v13 = vmul.f32 %v1940_v25, %v5846_v57 }
 0x9d7   :  { %v1944_v10 = vmul.f32 0.5, %v1943_v53  ;;  %v4037_v53 = vld [vmem:[%s6606_s8 + $0x3] sm:$0x7] }
 0x9d8   :  { %v1989_v39 = vmul.f32 %v6024_v0, %v1981_v13  ;;  %v2042_v25 = vperm.slane %v4037_v53, 1 }
 0x9d9   :  { %v1945_v44 = vsub.f32 1.5, %v1944_v10 }
 0x9da   :  { %v1997_v57 = vadd.f32 %v4598_v34, %v1989_v39 }
 0x9db   :  { %v1946_v20 = vmul.f32 %v4729_v42, %v1945_v44 }
 0x9dd   :  { %v1950_v31 = vsel %vm1949_vm15, %v4729_v42, %v1946_v20 }
 0x9de   :  { %v1982_v63 = vmul.f32 %v1950_v31, %v5852_v18 }
 0x9e0   :  { %v1990_v4 = vmul.f32 %v6024_v0, %v1982_v63  ;;  %v2041_v63 = vperm.slane %v4037_v53, 0 }
 0x9e2   :  { %v1998_v6 = vadd.f32 %v4598_v34, %v1990_v4 }
 0x9e4   :  { %v2002_v5 = vpack.c.bf16 %v1998_v6, %v1997_v57 }
 0x9e6   :  { %2183 = vmatmul.bf16.vlgmr.msra.gmra.mxu1 %v2002_v5  ;;  %2206 = vmatmul.bf16.vlgmr.msrb.gmra.mxu2 %v2002_v5 }
 0x9e7   :  { %2229 = vmatmul.bf16.vlgmr.msrb.gmra.mxu3 %v2002_v5 }
 0x9f7   :  { %v1916_v1 = vpop.xlane.xlu1 %1915 }
 0x9f8   :  { %v1923_v11 = vmul.f32 %v1916_v1, %v5107_v38 }
 0x9fa   :  { %v1928_v29 = vadd.f32 1e-05, %v1923_v11 }
 0x9fc   :  { %4730 = vrsqrt.f32 %v1928_v29  ;;  %vm1957_vm6 = vweird.f32 %v1928_v29 }
 0x9ff   :  { %v1918_v18 = vpop.xlane.xlu2 %1917 }
 0xa00   :  { %v1924_v60 = vmul.f32 %v1918_v18, %v5107_v38 }
 0xa02   :  { %v4731_v45 = vpop.eup %4730  ;;  %v1929_v40 = vadd.f32 1e-05, %v1924_v60 }
 0xa03   :  { %v1952_v51 = vmul.f32 %v4731_v45, %v1928_v29  ;;  %vm1958_vm1 = vweird.f32 %v4731_v45 }
 0xa04   :  { %4732 = vrsqrt.f32 %v1929_v40  ;;  %vm1959_vm7 = vmor %vm1957_vm6, %vm1958_vm1  ;;  %vm1967_vm9 = vweird.f32 %v1929_v40 }
 0xa05   :  { %v1953_v37 = vmul.f32 %v4731_v45, %v1952_v51 }
 0xa07   :  { %v1954_v30 = vmul.f32 0.5, %v1953_v37 }
 0xa09   :  { %v1955_v16 = vsub.f32 1.5, %v1954_v30 }
 0xa0a   :  { %v4733_v3 = vpop.eup %4732 }
 0xa0b   :  { %v1956_v19 = vmul.f32 %v4731_v45, %v1955_v16  ;;  %v1962_v26 = vmul.f32 %v4733_v3, %v1929_v40  ;;  %vm1968_vm8 = vweird.f32 %v4733_v3 }
 0xa0c   :  { %vm1969_vm10 = vmor %vm1967_vm9, %vm1968_vm8 }
 0xa0d   :  { %v1963_v58 = vmul.f32 %v4733_v3, %v1962_v26  ;;  %v1960_v22 = vsel %vm1959_vm7, %v4731_v45, %v1956_v19 }
 0xa0e   :  { %v1983_v32 = vmul.f32 %v1960_v22, %v5858_v46 }
 0xa0f   :  { %v1964_v49 = vmul.f32 0.5, %v1963_v58 }
 0xa10   :  { %v1991_v14 = vmul.f32 %v6024_v0, %v1983_v32 }
 0xa11   :  { %v1965_v50 = vsub.f32 1.5, %v1964_v49 }
 0xa12   :  { %v1999_v56 = vadd.f32 %v4598_v34, %v1991_v14 }
 0xa13   :  { %v1966_v54 = vmul.f32 %v4733_v3, %v1965_v50  ;;  %v2043_v50 = vperm.slane %v4037_v53, 2 }
 0xa15   :  { %v1970_v61 = vsel %vm1969_vm10, %v4733_v3, %v1966_v54 }
 0xa16   :  { %v1984_v62 = vmul.f32 %v1970_v61, %v5864_v17 }
 0xa18   :  { %v1992_v47 = vmul.f32 %v6024_v0, %v1984_v62 }
 0xa1a   :  { %v2000_v55 = vadd.f32 %v4598_v34, %v1992_v47 }
 0xa1c   :  { %v2003_v7 = vpack.c.bf16 %v2000_v55, %v1999_v56 }
 0xa1e   :  { %2188 = vmatmul.bf16.gmra.mxu1 %v2003_v7  ;;  %2211 = vmatmul.bf16.gmra.mxu2 %v2003_v7 }
 0xa1f   :  { %2234 = vmatmul.bf16.gmra.mxu3 %v2003_v7 }
 0xa25   :  { %v1920_v24 = vpop.xlane.xlu0 %1919 }
 0xa26   :  { %v1925_v8 = vmul.f32 %v1920_v24, %v5107_v38 }
 0xa28   :  { %v1930_v46 = vadd.f32 1e-05, %v1925_v8 }
 0xa2a   :  { %4734 = vrsqrt.f32 %v1930_v46  ;;  %vm1977_vm12 = vweird.f32 %v1930_v46 }
 0xa30   :  { %v4735_v59 = vpop.eup %4734 }
 0xa31   :  { %v1972_v15 = vmul.f32 %v4735_v59, %v1930_v46  ;;  %vm1978_vm11 = vweird.f32 %v4735_v59 }
 0xa32   :  { %vm1979_vm13 = vmor %vm1977_vm12, %vm1978_vm11 }
 0xa33   :  { %v1973_v35 = vmul.f32 %v4735_v59, %v1972_v15 }
 0xa35   :  { %v1974_v23 = vmul.f32 0.5, %v1973_v35 }
 0xa37   :  { %v1975_v17 = vsub.f32 1.5, %v1974_v23 }
 0xa39   :  { %v1976_v21 = vmul.f32 %v4735_v59, %v1975_v17 }
 0xa3b   :  { %v1980_v43 = vsel %vm1979_vm13, %v4735_v59, %v1976_v21 }
 0xa3c   :  { %v1985_v33 = vmul.f32 %v1980_v43, %v5906_v28 }
 0xa3e   :  { %v1993_v48 = vmul.f32 %v6024_v0, %v1985_v33 }
 0xa40   :  { %v2001_v42 = vadd.f32 %v4598_v34, %v1993_v48 }
 0xa42   :  { %v2004_v2 = vpack.c.bf16 %v2001_v42, %v2001_v42 }
 0xa44   :  { %2193 = vmatmul.bf16.gmra.mxu1 %v2004_v2  ;;  %2216 = vmatmul.bf16.gmra.mxu2 %v2004_v2 }
 0xa45   :  { %2239 = vmatmul.bf16.gmra.mxu3 %v2004_v2 }
 0xa63   :  { %v2184_v28 = vpop.f32.mrf.mxu1 }
 0xa64   :  { %v2185_v30 = vadd.f32 %v2184_v28, %v2041_v63 }
 0xa66   :  { %v2244_v3 = vmul.f32 0.17677669, %v2185_v30 }
 0xa69   :  { %v2207_v52 = vpop.f32.mrf.mxu2 }
 0xa6a   :  { %v2208_v44 = vadd.f32 %v2207_v52, %v2042_v25  ;;  %v2230_v57 = vpop.f32.mrf.mxu3 }
 0xa6b   :  { %v2186_v0 = vpop.f32.mrf.mxu1  ;;  %v2231_v17 = vadd.f32 %v2230_v57, %v2043_v50 }
 0xa6c   :  { %v2187_v37 = vadd.f32 %v2186_v0, %v2041_v63 }
 0xa6e   :  { %v2245_v16 = vmul.f32 0.17677669, %v2187_v37 }
 0xa70   :  { %v2249_v19 = vpack.c.bf16 %v2245_v16, %v2244_v3  ;;  %v6124_v3 = vld [vmem:[%s6631_s28 + $0x8] sm:$0xff] }
 0xa71   :  { %v2209_v10 = vpop.f32.mrf.mxu2 }
 0xa72   :  { %v2210_v13 = vadd.f32 %v2209_v10, %v2042_v25  ;;  %v2232_v40 = vpop.f32.mrf.mxu3 }
 0xa73   :  { %v2233_v15 = vadd.f32 %v2232_v40, %v2043_v50 }
 0xa74   :  { %v6044_v20 = vpack.c.bf16 %v2210_v13, %v2208_v44 }
 0xa75   :  { %v6069_v21 = vpack.c.bf16 %v2233_v15, %v2231_v17 }
 0xa76   :  { %2404 = vrot.lane.b32.xlu0 %v6044_v20, %s4936_s3  ;;  %v2268_v33 = vsel %vm124_vm0, %v6044_v20, 0 }
 0xa9b   :  { %v2189_v31 = vpop.f32.mrf.mxu1 }
 0xa9c   :  { %v2190_v34 = vadd.f32 %v2189_v31, %v2041_v63 }
 0xa9e   :  { %v2246_v5 = vmul.f32 0.17677669, %v2190_v34 }
 0xaa1   :  { %v2212_v39 = vpop.f32.mrf.mxu2 }
 0xaa2   :  { %v2213_v18 = vadd.f32 %v2212_v39, %v2042_v25  ;;  %v2235_v51 = vpop.f32.mrf.mxu3 }
 0xaa3   :  { %v2191_v4 = vpop.f32.mrf.mxu1  ;;  %v2236_v46 = vadd.f32 %v2235_v51, %v2043_v50  ;;  %v6112_v51 = vld [vmem:[%s6631_s28] sm:$0xff] }
 0xaa4   :  { %v2192_v6 = vadd.f32 %v2191_v4, %v2041_v63 }
 0xaa6   :  { %v2247_v1 = vmul.f32 0.17677669, %v2192_v6 }
 0xaa8   :  { %v6048_v11 = vpack.c.bf16 %v2247_v1, %v2246_v5 }
 0xaa9   :  { %v2214_v29 = vpop.f32.mrf.mxu2 }
 0xaaa   :  { %v2215_v60 = vadd.f32 %v2214_v29, %v2042_v25  ;;  %2397 = vrot.lane.b32.xlu0 %v6048_v11, %s4936_s3  ;;  %v2237_v26 = vpop.f32.mrf.mxu3 }
 0xaab   :  { %v2238_v7 = vadd.f32 %v2237_v26, %v2043_v50 }
 0xaac   :  { %v2253_v45 = vpack.c.bf16 %v2215_v60, %v2213_v18 }
 0xaad   :  { %v6064_v35 = vpack.c.bf16 %v2238_v7, %v2236_v46 }
 0xaae   :  { %2406 = vrot.lane.b32.xlu2 %v2253_v45, %s4936_s3  ;;  %v2271_v43 = vsel %vm124_vm0, %v2253_v45, 0 }
 0xab2   :  { %2717 = vrot.lane.b32.xlu0 %v2253_v45, %s4937_s26 }
 0xaba   :  { %2563 = vrot.lane.b32.xlu0 %v2253_v45, %s4933_s27 }
 0xac1   :  { %v2194_v58 = vpop.f32.mrf.mxu1 }
 0xac2   :  { %v2195_v22 = vadd.f32 %v2194_v58, %v2041_v63  ;;  %2555 = vrot.lane.b32.xlu0 %v2249_v19, %s4933_s27 }
 0xac4   :  { %v2248_v49 = vmul.f32 0.17677669, %v2195_v22 }
 0xac6   :  { %v2251_v54 = vpack.c.bf16 %v2248_v49, %v2248_v49  ;;  %v6131_v49 = vld [vmem:[%s6631_s28 + $0x10] sm:$0xff] }
 0xac7   :  { %v2217_v32 = vpop.f32.mrf.mxu2 }
 0xac8   :  { %v2218_v61 = vadd.f32 %v2217_v32, %v2042_v25  ;;  %v2240_v62 = vpop.f32.mrf.mxu3 }
 0xac9   :  { %v2241_v14 = vadd.f32 %v2240_v62, %v2043_v50  ;;  %v2196_v47 = vpop.f32.mrf.mxu1  ;;  %v6143_v62 = vld [vmem:[%s6631_s28 + $0x18] sm:$0xff] }
 0xaca   :  { %v2254_v56 = vpack.c.bf16 %v2218_v61, %v2218_v61  ;;  %2713 = vrot.lane.b32.xlu0 %v2251_v54, %s4937_s26 }
 0xacb   :  { %v6057_v55 = vpack.c.bf16 %v2241_v14, %v2241_v14 }
 0xacc   :  { %2408 = vrot.lane.b32.xlu1 %v2254_v56, %s4936_s3  ;;  %2719 = vrot.lane.b32.xlu2 %v2254_v56, %s4937_s26  ;;  %v2274_v24 = vsel %vm124_vm0, %v2254_v56, 0 }
 0xacd   :  { %2281 = vmatpush.bf16.xpose.msrb.mxu0 %v2274_v24  ;;  %v2367_v8 = vsel %vm660_vm2, %v6057_v55, 0  ;;  %v6153_v24 = vld [vmem:[%s6631_s28 + $0x20] sm:$0xff] }
 0xace   :  { %2374 = vmatpush.bf16.msrb.mxu1 %v2367_v8 }
 0xacf   :  { %v2219_v59 = vpop.f32.mrf.mxu2 }
 0xad0   :  { %v2242_v23 = vpop.f32.mrf.mxu3 }
 0xad2   :  { %2375 = vmatpush.bf16.msrb.mxu1 %v6064_v35  ;;  %2514 = vrot.lane.b32.xlu0 %v6064_v35, %s4936_s3 }
 0xad4   :  { %2395 = vrot.lane.b32.xlu1 %v2249_v19, %s4936_s3  ;;  %2565 = vrot.lane.b32.xlu2 %v2254_v56, %s4933_s27 }
 0xad5   :  { %2282 = vmatpush.bf16.xpose.msrb.mxu0 %v2271_v43 }
 0xad6   :  { %2376 = vmatpush.bf16.msrb.mxu1 %v6069_v21 }
 0xada   :  { %2516 = vrot.lane.b32.xlu0 %v6057_v55, %s4936_s3 }
 0xadc   :  { %2709 = vrot.lane.b32.xlu2 %v2249_v19, %s4937_s26  ;;  %2399 = vrot.lane.b32.xlu1 %v2251_v54, %s4936_s3 }
 0xadd   :  { %2283 = vmatpush.bf16.xpose.msrb.mxu0 %v2268_v33 }
 0xae2   :  { %2824 = vrot.lane.b32.xlu0 %v6057_v55, %s4937_s26 }
 0xae4   :  { %4134 = vmatmul.msk.bf16.vlgmr.msrb.gmra.mxu0 %vm124_vm0, %v2249_v19  ;;  %2715 = vrot.lane.b32.xlu1 %v6044_v20, %s4937_s26 }
 0xae5   :  { %2711 = vrot.lane.b32.xlu2 %v6048_v11, %s4937_s26 }
 0xae8   :  { %v2405_v48 = vpop.permute.xlu0 %2404 }
 0xae9   :  { %v2420_v5 = vsel %vm124_vm0, %v2405_v48, 0 }
 0xaec   :  { %2561 = vrot.lane.b32.xlu1 %v6044_v20, %s4933_s27 }
 0xaed   :  { %2559 = vrot.lane.b32.xlu2 %v2251_v54, %s4933_s27 }
 0xaf4   :  { %2557 = vrot.lane.b32.xlu1 %v6048_v11, %s4933_s27  ;;  %4135 = vmatmul.msk.bf16.gmra.mxu0 %vm124_vm0, %v6048_v11 }
 0xb04   :  { %4136 = vmatmul.msk.bf16.gmra.mxu0 %vm124_vm0, %v2251_v54 }
 0xb08   :  { %v2407_v2 = vpop.permute.xlu2 %2406 }
 0xb09   :  { %v2423_v34 = vsel %vm124_vm0, %v2407_v2, 0 }
 0xb1c   :  { %v2398_v42 = vpop.permute.xlu0 %2397 }
 0xb24   :  { %v2718_v52 = vpop.permute.xlu0 %2717 }
 0xb25   :  { %v2734_v29 = vsel %vm124_vm0, %v2718_v52, 0 }
 0xb26   :  { %v2720_v53 = vpop.permute.xlu2 %2719 }
 0xb27   :  { %v2737_v1 = vsel %vm124_vm0, %v2720_v53, 0 }
 0xb2c   :  { %v2564_v25 = vpop.permute.xlu0 %2563 }
 0xb2d   :  { %v2580_v20 = vsel %vm124_vm0, %v2564_v25, 0 }
 0xb2e   :  { %v2566_v10 = vpop.permute.xlu2 %2565 }
 0xb2f   :  { %v2583_v44 = vsel %vm124_vm0, %v2566_v10, 0 }
 0xb30   :  { %2590 = vmatpush.bf16.xpose.msra.mxu0 %v2583_v44 }
 0xb34   :  { %v2556_v13 = vpop.permute.xlu0 %2555 }
 0xb36   :  { %v2710_v22 = vpop.permute.xlu2 %2709 }
 0xb38   :  { %2591 = vmatpush.bf16.xpose.msra.mxu0 %v2580_v20 }
 0xb3c   :  { %v6098_v28 = vpop.permute.xlu0 %2713 }
 0xb3e   :  { %v2409_v0 = vpop.permute.xlu1 %2408 }
 0xb3f   :  { %v2426_v31 = vsel %vm124_vm0, %v2409_v0, 0  ;;  %v2712_v47 = vpop.permute.xlu2 %2711 }
 0xb40   :  { %2433 = vmatpush.bf16.xpose.msra.mxu2 %v2426_v31 }
 0xb44   :  { %v2515_v63 = vpop.permute.xlu0 %2514 }
 0xb46   :  { %v2396_v39 = vpop.permute.xlu1 %2395 }
 0xb47   :  { %v2560_v59 = vpop.permute.xlu2 %2559 }
 0xb48   :  { %2434 = vmatpush.bf16.xpose.msra.mxu2 %v2423_v34 }
 0xb4c   :  { %v2517_v4 = vpop.permute.xlu0 %2516 }
 0xb4d   :  { %v2530_v57 = vsel %vm660_vm2, %v2517_v4, 0 }
 0xb4e   :  { %v2400_v6 = vpop.permute.xlu1 %2399  ;;  %2537 = vmatpush.bf16.msra.mxu3 %v2530_v57 }
 0xb50   :  { %2435 = vmatpush.bf16.xpose.msra.mxu2 %v2420_v5 }
 0xb52   :  { %2538 = vmatpush.bf16.msra.mxu3 %v2515_v63 }
 0xb56   :  { %v2716_v11 = vpop.permute.xlu1 %2715 }
 0xb57   :  { %4140 = vmatmul.msk.bf16.vlgmr.msra.gmra.mxu2 %vm124_vm0, %v2396_v39  ;;  %v2731_v45 = vsel %vm124_vm0, %v2716_v11, 0 }
 0xb58   :  { %2744 = vmatpush.bf16.xpose.msrb.mxu2 %v2737_v1 }
 0xb5e   :  { %v2562_v18 = vpop.permute.xlu1 %2561 }
 0xb5f   :  { %v2577_v60 = vsel %vm124_vm0, %v2562_v18, 0 }
 0xb60   :  { %2745 = vmatpush.bf16.xpose.msrb.mxu2 %v2734_v29  ;;  %2592 = vmatpush.bf16.xpose.msra.mxu0 %v2577_v60 }
 0xb61   :  { %v2285_v40 = vpop.f32.mrf.mxu0 }
 0xb62   :  { %v6115_v37 = vadd.f32 %v6112_v51, %v2285_v40 }
 0xb64   :  { %v2299_v30 = vsel %vm592_vm3, %v6115_v37, -inf }
 0xb65   :  { %2300 = vmax.xlane.f32.xlu2 %v2299_v30 }
 0xb66   :  { %v2558_v54 = vpop.permute.xlu1 %2557 }
 0xb67   :  { %4141 = vmatmul.msk.bf16.gmra.mxu2 %vm124_vm0, %v2398_v42  ;;  %4146 = vmatmul.msk.bf16.vlgmr.msra.gmra.mxu0 %vm124_vm0, %v2556_v13 }
 0xb68   :  { %2746 = vmatpush.bf16.xpose.msrb.mxu2 %v2731_v45 }
 0xb69   :  { %v2287_v16 = vpop.f32.mrf.mxu0 }
 0xb6a   :  { %v2288_v19 = vadd.f32 %v6124_v3, %v2287_v16 }
 0xb6c   :  { %v2302_v26 = vsel %vm592_vm3, %v2288_v19, -inf }
 0xb6d   :  { %2303 = vmax.xlane.f32.xlu1 %v2302_v26 }
 0xb71   :  { %v2290_v58 = vpop.f32.mrf.mxu0 }
 0xb72   :  { %v6134_v50 = vadd.f32 %v6131_v49, %v2290_v58 }
 0xb74   :  { %v2305_v32 = vsel %vm592_vm3, %v6134_v50, -inf }
 0xb75   :  { %2306 = vmax.xlane.f32.xlu1 %v2305_v32 }
 0xb77   :  { %4142 = vmatmul.msk.bf16.gmra.mxu2 %vm124_vm0, %v2400_v6  ;;  %4147 = vmatmul.msk.bf16.gmra.mxu0 %vm124_vm0, %v2558_v54 }
 0xb79   :  { %v2292_v61 = vpop.f32.mrf.mxu0 }
 0xb7a   :  { %v6146_v14 = vadd.f32 %v6143_v62, %v2292_v61 }
 0xb7c   :  { %v2308_v56 = vsel %vm592_vm3, %v6146_v14, -inf }
 0xb7d   :  { %2309 = vmax.xlane.f32.xlu2 %v2308_v56 }
 0xb81   :  { %v2295_v7 = vpop.f32.mrf.mxu0 }
 0xb82   :  { %v6156_v8 = vadd.f32 %v6153_v24, %v2295_v7 }
 0xb84   :  { %v2311_v46 = vsel %vm592_vm3, %v6156_v8, -inf }
 0xb85   :  { %2312 = vmax.xlane.f32.xlu1 %v2311_v46 }
 0xb87   :  { %4148 = vmatmul.msk.bf16.gmra.mxu0 %vm124_vm0, %v2560_v59  ;;  %4152 = vmatmul.msk.bf16.vlgmr.msrb.gmra.mxu2 %vm124_vm0, %v2710_v22 }
 0xb89   :  { %v2297_v15 = vpop.f32.mrf.mxu0 }
 0xb97   :  { %4153 = vmatmul.msk.bf16.gmra.mxu2 %vm124_vm0, %v2712_v47 }
 0xba7   :  { %4154 = vmatmul.msk.bf16.gmra.mxu2 %vm124_vm0, %v6098_v28 }
 0xbd8   :  { %v2301_v5 = vpop.xlane.xlu2 %2300 }
 0xbda   :  { %v2437_v23 = vpop.f32.mrf.mxu2 }
 0xbdb   :  { %v6176_v44 = vadd.f32 %v6112_v51, %v2437_v23 }
 0xbdd   :  { %v2451_v0 = vsel %vm592_vm3, %v6176_v44, -inf }
 0xbe0   :  { %v2304_v43 = vpop.xlane.xlu1 %2303 }
 0xbe1   :  { %v2315_v52 = vsub.f32 %v2288_v19, %v2304_v43 }
 0xbe2   :  { %v2439_v17 = vpop.f32.mrf.mxu2 }
 0xbe3   :  { %v6166_v33 = vadd.f32 %v6124_v3, %v2439_v17  ;;  %v2321_v25 = vmul.f32 1.442695, %v2315_v52 }
 0xbe4   :  { %v2594_v48 = vpop.f32.mrf.mxu0 }
 0xbe5   :  { %v6169_v42 = vadd.f32 %v6112_v51, %v2594_v48  ;;  %v2454_v2 = vsel %vm592_vm3, %v6166_v33, -inf  ;;  %4736 = vpow2.f32 %v2321_v25 }
 0xbe6   :  { %2455 = vmax.xlane.f32.xlu0 %v2454_v2 }
 0xbe7   :  { %v2608_v53 = vsel %vm592_vm3, %v6169_v42, -inf }
 0xbe8   :  { %2609 = vmax.xlane.f32.xlu1 %v2608_v53  ;;  %v2307_v1 = vpop.xlane.xlu1 %2306 }
 0xbe9   :  { %v2316_v45 = vsub.f32 %v6134_v50, %v2307_v1 }
 0xbea   :  { %v2442_v10 = vpop.f32.mrf.mxu2 }
 0xbeb   :  { %v6188_v39 = vpop.eup %4736  ;;  %v6197_v11 = vadd.f32 %v6131_v49, %v2442_v10  ;;  %v2323_v30 = vmul.f32 1.442695, %v2316_v45 }
 0xbec   :  { %v2596_v13 = vpop.f32.mrf.mxu0  ;;  %v2332_v57 = vsel %vm592_vm3, %v6188_v39, 0.0 }
 0xbed   :  { %v6179_v20 = vadd.f32 %v6124_v3, %v2596_v13  ;;  %v2457_v40 = vsel %vm592_vm3, %v6197_v11, -inf  ;;  %4738 = vpow2.f32 %v2323_v30 }
 0xbef   :  { %v2611_v28 = vsel %vm592_vm3, %v6179_v20, -inf }
 0xbf0   :  { %2612 = vmax.xlane.f32.xlu2 %v2611_v28  ;;  %2452 = vmax.xlane.f32.xlu1 %v2451_v0  ;;  %v2310_v19 = vpop.xlane.xlu2 %2309 }
 0xbf1   :  { %v2317_v22 = vsub.f32 %v6146_v14, %v2310_v19 }
 0xbf2   :  { %v2444_v31 = vpop.f32.mrf.mxu2 }
 0xbf3   :  { %v6186_v63 = vadd.f32 %v6143_v62, %v2444_v31  ;;  %v2325_v50 = vmul.f32 1.442695, %v2317_v22  ;;  %v6217_v47 = vpop.eup %4738 }
 0xbf4   :  { %v6190_v34 = vpop.f32.mrf.mxu0  ;;  %v2335_v46 = vsel %vm592_vm3, %v6217_v47, 0.0 }
 0xbf5   :  { %v2460_v4 = vsel %vm592_vm3, %v6186_v63, -inf  ;;  %4740 = vpow2.f32 %v2325_v50 }
 0xbf6   :  { %2461 = vmax.xlane.f32.xlu0 %v2460_v4 }
 0xbf8   :  { %2333 = vadd.xlane.f32.xlu2 %v2332_v57  ;;  %v2313_v61 = vpop.xlane.xlu1 %2312  ;;  %v6259_v57 = vadd.f32 %v6131_v49, %v6190_v34 }
 0xbf9   :  { %v2318_v7 = vsub.f32 %v6156_v8, %v2313_v61 }
 0xbfa   :  { %v2447_v6 = vpop.f32.mrf.mxu2 }
 0xbfb   :  { %v6200_v29 = vadd.f32 %v6153_v24, %v2447_v6  ;;  %v2327_v14 = vmul.f32 1.442695, %v2318_v7  ;;  %v6225_v23 = vpop.eup %4740  ;;  %v2614_v6 = vsel %vm592_vm3, %v6259_v57, -inf }
 0xbfc   :  { %v2601_v18 = vpop.f32.mrf.mxu0  ;;  %v2338_v43 = vsel %vm592_vm3, %v6225_v23, 0.0 }
 0xbfd   :  { %v2463_v60 = vsel %vm592_vm3, %v6200_v29, -inf  ;;  %v6208_v26 = vadd.f32 %v6143_v62, %v2601_v18  ;;  %4742 = vpow2.f32 %v2327_v14 }
 0xbfe   :  { %2464 = vmax.xlane.f32.xlu0 %v2463_v60 }
 0xbff   :  { %v2617_v32 = vsel %vm592_vm3, %v6208_v26, -inf }
 0xc00   :  { %2458 = vmax.xlane.f32.xlu2 %v2457_v40 }
 0xc02   :  { %v2449_v16 = vpop.f32.mrf.mxu2 }
 0xc03   :  { %v6231_v48 = vpop.eup %4742 }
 0xc04   :  { %v6210_v58 = vpop.f32.mrf.mxu0  ;;  %v2341_v2 = vsel %vm592_vm3, %v6231_v48, 0.0 }
 0xc08   :  { %2618 = vmax.xlane.f32.xlu2 %v2617_v32 }
 0xc09   :  { %2512 = vrot.lane.b32.xlu1 %v6069_v21, %s4936_s3 }
 0xc0a   :  { %v2748_v54 = vpop.f32.mrf.mxu2 }
 0xc0b   :  { %v6237_v53 = vadd.f32 %v6112_v51, %v2748_v54 }
 0xc0c   :  { %v2606_v56 = vpop.f32.mrf.mxu0 }
 0xc0d   :  { %v2762_v28 = vsel %vm592_vm3, %v6237_v53, -inf }
 0xc10   :  { %2336 = vadd.xlane.f32.xlu2 %v2335_v46 }
 0xc12   :  { %v2750_v59 = vpop.f32.mrf.mxu2 }
 0xc13   :  { %v6223_v15 = vadd.f32 %v6124_v3, %v2750_v59  ;;  %v2314_v3 = vsub.f32 %v6115_v37, %v2301_v5  ;;  %v2825_v5 = vpop.permute.xlu0 %2824 }
 0xc15   :  { %v2765_v17 = vsel %vm592_vm3, %v6223_v15, -inf  ;;  %v2319_v10 = vmul.f32 1.442695, %v2314_v3 }
 0xc16   :  { %2766 = vmax.xlane.f32.xlu0 %v2765_v17 }
 0xc17   :  { %4744 = vpow2.f32 %v2319_v10 }
 0xc18   :  { %2339 = vadd.xlane.f32.xlu2 %v2338_v43 }
 0xc1a   :  { %v2753_v8 = vpop.f32.mrf.mxu2 }
 0xc1b   :  { %v6249_v37 = vadd.f32 %v6131_v49, %v2753_v8 }
 0xc1d   :  { %v6251_v51 = vpop.eup %4744 }
 0xc1e   :  { %v2329_v4 = vsel %vm592_vm3, %v6251_v51, 0.0 }
 0xc20   :  { %2342 = vadd.xlane.f32.xlu2 %v2341_v2 }
 0xc22   :  { %v2755_v52 = vpop.f32.mrf.mxu2 }
 0xc23   :  { %v6240_v25 = vadd.f32 %v6143_v62, %v2755_v52  ;;  %v2768_v62 = vsel %vm592_vm3, %v6249_v37, -inf }
 0xc25   :  { %v2771_v13 = vsel %vm592_vm3, %v6240_v25, -inf }
 0xc26   :  { %2772 = vmax.xlane.f32.xlu0 %v2771_v13 }
 0xc28   :  { %2763 = vmax.xlane.f32.xlu2 %v2762_v28  ;;  %v2838_v28 = vsel %vm660_vm2, %v2825_v5, 0 }
 0xc2a   :  { %v6246_v0 = vpop.f32.mrf.mxu2 }
 0xc30   :  { %2769 = vmax.xlane.f32.xlu2 %v2768_v62 }
 0xc32   :  { %v2760_v31 = vpop.f32.mrf.mxu2 }
 0xc33   :  { %2330 = vadd.xlane.f32.xlu1 %v2329_v4 }
 0xc3a   :  { %2820 = vrot.lane.b32.xlu0 %v6069_v21, %s4937_s26 }
 0xc3b   :  { %2615 = vmax.xlane.f32.xlu1 %v2614_v6 }
 0xc42   :  { %2668 = vrot.lane.b32.xlu0 %v6064_v35, %s4933_s27 }
 0xc59   :  { %v2456_v1 = vpop.xlane.xlu0 %2455 }
 0xc5a   :  { %v2467_v45 = vsub.f32 %v6166_v33, %v2456_v1 }
 0xc5b   :  { %v2610_v18 = vpop.xlane.xlu1 %2609 }
 0xc5c   :  { %v2623_v60 = vsub.f32 %v6169_v42, %v2610_v18  ;;  %v2473_v49 = vmul.f32 1.442695, %v2467_v45 }
 0xc5e   :  { %v2628_v40 = vmul.f32 1.442695, %v2623_v60 }
 0xc60   :  { %4746 = vpow2.f32 %v2628_v40 }
 0xc61   :  { %4748 = vpow2.f32 %v2473_v49 }
 0xc63   :  { %v2613_v34 = vpop.xlane.xlu2 %2612  ;;  %v2453_v30 = vpop.xlane.xlu1 %2452 }
 0xc64   :  { %v2466_v16 = vsub.f32 %v6176_v44, %v2453_v30  ;;  %v2624_v32 = vsub.f32 %v6179_v20, %v2613_v34 }
 0xc66   :  { %v6270_v19 = vpop.eup %4746  ;;  %v2471_v22 = vmul.f32 1.442695, %v2466_v16  ;;  %v2630_v33 = vmul.f32 1.442695, %v2624_v32 }
 0xc67   :  { %v2638_v50 = vsel %vm592_vm3, %v6270_v19, 0.0  ;;  %v6275_v61 = vpop.eup %4748 }
 0xc68   :  { %2639 = vadd.xlane.f32.xlu2 %v2638_v50  ;;  %4750 = vpow2.f32 %v2471_v22  ;;  %v2484_v44 = vsel %vm592_vm3, %v6275_v61, 0.0 }
 0xc69   :  { %v2462_v42 = vpop.xlane.xlu0 %2461  ;;  %4752 = vpow2.f32 %v2630_v33 }
 0xc6a   :  { %v2469_v8 = vsub.f32 %v6186_v63, %v2462_v42 }
 0xc6b   :  { %v2334_v54 = vpop.xlane.xlu2 %2333 }
 0xc6c   :  { %v2477_v52 = vmul.f32 1.442695, %v2469_v8 }
 0xc6e   :  { %v6277_v56 = vpop.eup %4750 }
 0xc6f   :  { %v2481_v20 = vsel %vm592_vm3, %v6277_v56, 0.0  ;;  %v6285_v43 = vpop.eup %4752 }
 0xc70   :  { %2485 = vadd.xlane.f32.xlu2 %v2484_v44  ;;  %2482 = vadd.xlane.f32.xlu1 %v2481_v20  ;;  %v2641_v3 = vsel %vm592_vm3, %v6285_v43, 0.0 }
 0xc71   :  { %v2465_v7 = vpop.xlane.xlu0 %2464 }
 0xc72   :  { %v2470_v46 = vsub.f32 %v6200_v29, %v2465_v7 }
 0xc73   :  { %v2459_v14 = vpop.xlane.xlu2 %2458 }
 0xc74   :  { %v2479_v59 = vmul.f32 1.442695, %v2470_v46  ;;  %v2468_v17 = vsub.f32 %v6197_v11, %v2459_v14 }
 0xc76   :  { %4754 = vpow2.f32 %v2479_v59  ;;  %v2475_v2 = vmul.f32 1.442695, %v2468_v17 }
 0xc78   :  { %4756 = vpow2.f32 %v2475_v2  ;;  %2642 = vadd.xlane.f32.xlu1 %v2641_v3 }
 0xc79   :  { %4758 = vpow2.f32 %v2477_v52 }
 0xc7b   :  { %v6290_v10 = vpop.xlane.xlu2 %2618  ;;  %v2513_v13 = vpop.permute.xlu1 %2512 }
 0xc7c   :  { %v6292_v29 = vpop.eup %4754  ;;  %2539 = vmatpush.bf16.msra.mxu3 %v2513_v13  ;;  %v2626_v3 = vsub.f32 %v6208_v26, %v6290_v10 }
 0xc7d   :  { %v2493_v63 = vsel %vm592_vm3, %v6292_v29, 0.0 }
 0xc7e   :  { %v6297_v11 = vpop.eup %4756  ;;  %2494 = vadd.xlane.f32.xlu0 %v2493_v63  ;;  %v2634_v63 = vmul.f32 1.442695, %v2626_v3 }
 0xc7f   :  { %v2487_v62 = vsel %vm592_vm3, %v6297_v11, 0.0  ;;  %v6301_v4 = vpop.eup %4758 }
 0xc80   :  { %2845 = vmatpush.bf16.msrb.mxu3 %v2838_v28  ;;  %2488 = vadd.xlane.f32.xlu2 %v2487_v62  ;;  %v2490_v6 = vsel %vm592_vm3, %v6301_v4, 0.0  ;;  %v6349_v62 = vadd.f32 %v6153_v24, %v6210_v58 }
 0xc82   :  { %v2620_v26 = vsel %vm592_vm3, %v6349_v62, -inf }
 0xc83   :  { %v2337_v31 = vpop.xlane.xlu2 %2336 }
 0xc88   :  { %2491 = vadd.xlane.f32.xlu2 %v2490_v6 }
 0xc8b   :  { %v2340_v5 = vpop.xlane.xlu2 %2339 }
 0xc91   :  { %2822 = vrot.lane.b32.xlu1 %v6064_v35, %s4937_s26 }
 0xc93   :  { %v2343_v1 = vpop.xlane.xlu2 %2342 }
 0xc9b   :  { %v2764_v18 = vpop.xlane.xlu2 %2763 }
 0xc9c   :  { %v2777_v60 = vsub.f32 %v6237_v53, %v2764_v18 }
 0xc9e   :  { %v2782_v45 = vmul.f32 1.442695, %v2777_v60 }
 0xca0   :  { %4760 = vpow2.f32 %v2782_v45  ;;  %2670 = vrot.lane.b32.xlu2 %v6057_v55, %s4933_s27 }
 0xca1   :  { %4762 = vrcp.f32 %v2334_v54  ;;  %v2767_v54 = vpop.xlane.xlu0 %2766 }
 0xca3   :  { %v2770_v34 = vpop.xlane.xlu2 %2769 }
 0xca4   :  { %v2779_v35 = vsub.f32 %v6249_v37, %v2770_v34  ;;  %v2778_v37 = vsub.f32 %v6223_v15, %v2767_v54 }
 0xca6   :  { %v6310_v40 = vpop.eup %4760  ;;  %v2331_v49 = vpop.xlane.xlu1 %2330  ;;  %v2786_v32 = vmul.f32 1.442695, %v2779_v35  ;;  %v2784_v46 = vmul.f32 1.442695, %v2778_v37 }
 0xca7   :  { %4764 = vrcp.f32 %v2331_v49  ;;  %v2792_v30 = vsel %vm592_vm3, %v6310_v40, 0.0  ;;  %v4763_v16 = vpop.eup %4762 }
 0xca8   :  { %2793 = vadd.xlane.f32.xlu0 %v2792_v30  ;;  %v2350_v53 = vmul.f32 %v4763_v16, %v6188_v39  ;;  %4766 = vpow2.f32 %v2786_v32 }
 0xca9   :  { %4768 = vrcp.f32 %v2340_v5  ;;  %v2773_v28 = vpop.xlane.xlu0 %2772 }
 0xcaa   :  { %4770 = vrcp.f32 %v2337_v31 }
 0xcad   :  { %v4765_v22 = vpop.eup %4764 }
 0xcae   :  { %v2349_v50 = vmul.f32 %v4765_v22, %v6251_v51  ;;  %v2616_v55 = vpop.xlane.xlu1 %2615  ;;  %v6320_v20 = vpop.eup %4766 }
 0xcaf   :  { %v2625_v33 = vsub.f32 %v6259_v57, %v2616_v55  ;;  %v4769_v7 = vpop.eup %4768  ;;  %v2798_v51 = vsel %vm592_vm3, %v6320_v20, 0.0 }
 0xcb0   :  { %v2354_v42 = vpack.c.bf16 %v2350_v53, %v2349_v50  ;;  %v4771_v39 = vpop.eup %4770  ;;  %v2352_v14 = vmul.f32 %v4769_v7, %v6225_v23 }
 0xcb1   :  { %v2632_v44 = vmul.f32 1.442695, %v2625_v33  ;;  %v2351_v57 = vmul.f32 %v4771_v39, %v6217_v47  ;;  %v2821_v34 = vpop.permute.xlu0 %2820 }
 0xcb2   :  { %4137 = vmatmul.msk.bf16.vlgmr.msrb.gmra.mxu1 %vm592_vm3, %v2354_v42 }
 0xcb3   :  { %4772 = vpow2.f32 %v2632_v44  ;;  %v2355_v15 = vpack.c.bf16 %v2352_v14, %v2351_v57 }
 0xcb4   :  { %4774 = vpow2.f32 %v2784_v46 }
 0xcb5   :  { %4776 = vrcp.f32 %v2343_v1 }
 0xcb6   :  { %4778 = vpow2.f32 %v2634_v63 }
 0xcb9   :  { %v6328_v59 = vpop.eup %4772  ;;  %v2669_v22 = vpop.permute.xlu0 %2668 }
 0xcba   :  { %v2644_v17 = vsel %vm592_vm3, %v6328_v59, 0.0  ;;  %v6333_v8 = vpop.eup %4774 }
 0xcbb   :  { %2799 = vadd.xlane.f32.xlu1 %v2798_v51  ;;  %v2795_v23 = vsel %vm592_vm3, %v6333_v8, 0.0  ;;  %v4777_v2 = vpop.eup %4776 }
 0xcbc   :  { %2666 = vrot.lane.b32.xlu0 %v6069_v21, %s4933_s27  ;;  %v6339_v21 = vadd.f32 %v6153_v24, %v6246_v0  ;;  %v2353_v47 = vmul.f32 %v4777_v2, %v6231_v48  ;;  %v2780_v0 = vsub.f32 %v6240_v25, %v2773_v28  ;;  %v6354_v31 = vpop.eup %4778 }
 0xcbd   :  { %v2647_v6 = vsel %vm592_vm3, %v6354_v31, 0.0 }
 0xcbe   :  { %v2774_v52 = vsel %vm592_vm3, %v6339_v21, -inf  ;;  %v2356_v13 = vpack.c.bf16 %v2353_v47, %v2353_v47  ;;  %v2788_v48 = vmul.f32 1.442695, %v2780_v0 }
 0xcc0   :  { %4780 = vpow2.f32 %v2788_v48 }
 0xcc2   :  { %4138 = vmatmul.msk.bf16.gmra.mxu1 %vm592_vm3, %v2355_v15 }
 0xcc3   :  { %2645 = vadd.xlane.f32.xlu1 %v2644_v17 }
 0xcc6   :  { %v6358_v5 = vpop.eup %4780 }
 0xcc7   :  { %v2801_v25 = vsel %vm592_vm3, %v6358_v5, 0.0 }
 0xcc9   :  { %2796 = vadd.xlane.f32.xlu2 %v2795_v23 }
 0xcd1   :  { %2775 = vmax.xlane.f32.xlu2 %v2774_v52 }
 0xcd2   :  { %4139 = vmatmul.msk.bf16.gmra.mxu1 %vm592_vm3, %v2356_v13 }
 0xcd9   :  { %2621 = vmax.xlane.f32.xlu2 %v2620_v26 }
 0xcdb   :  { %v2640_v10 = vpop.xlane.xlu2 %2639 }
 0xce1   :  { %2648 = vadd.xlane.f32.xlu2 %v2647_v6 }
 0xce3   :  { %v2486_v24 = vpop.xlane.xlu2 %2485  ;;  %v2483_v58 = vpop.xlane.xlu1 %2482 }
 0xce4   :  { %4782 = vrcp.f32 %v2486_v24 }
 0xce5   :  { %4784 = vrcp.f32 %v2483_v58 }
 0xce6   :  { %2802 = vadd.xlane.f32.xlu0 %v2801_v25 }
 0xcea   :  { %v4783_v1 = vpop.eup %4782 }
 0xceb   :  { %v4785_v18 = vpop.eup %4784  ;;  %v2502_v60 = vmul.f32 %v4783_v1, %v6275_v61  ;;  %v2643_v16 = vpop.xlane.xlu1 %2642 }
 0xcec   :  { %v2501_v45 = vmul.f32 %v4785_v18, %v6277_v56 }
 0xcee   :  { %v2506_v49 = vpack.c.bf16 %v2502_v60, %v2501_v45 }
 0xcf0   :  { %4143 = vmatmul.msk.bf16.vlgmr.msra.gmra.mxu3 %vm592_vm3, %v2506_v49 }
 0xcf1   :  { %v2495_v33 = vpop.xlane.xlu0 %2494 }
 0xcf3   :  { %v2489_v30 = vpop.xlane.xlu2 %2488 }
 0xcf4   :  { %4786 = vrcp.f32 %v2489_v30 }
 0xcfa   :  { %v4787_v53 = vpop.eup %4786 }
 0xcfb   :  { %v2492_v35 = vpop.xlane.xlu2 %2491  ;;  %v2503_v50 = vmul.f32 %v4787_v53, %v6297_v11 }
 0xcfc   :  { %4788 = vrcp.f32 %v2492_v35 }
 0xcfd   :  { %4790 = vrcp.f32 %v2495_v33 }
 0xcfe   :  { %4792 = vrcp.f32 %v2643_v16 }
 0xcff   :  { %4794 = vrcp.f32 %v2640_v10 }
 0xd02   :  { %v4789_v32 = vpop.eup %4788 }
 0xd03   :  { %v2504_v55 = vmul.f32 %v4789_v32, %v6301_v4  ;;  %v2671_v42 = vpop.permute.xlu2 %2670  ;;  %v2823_v56 = vpop.permute.xlu1 %2822 }
 0xd04   :  { %v2684_v61 = vsel %vm660_vm2, %v2671_v42, 0  ;;  %2846 = vmatpush.bf16.msrb.mxu3 %v2823_v56  ;;  %v4791_v44 = vpop.eup %4790 }
 0xd05   :  { %2691 = vmatpush.bf16.msra.mxu1 %v2684_v61  ;;  %v2507_v54 = vpack.c.bf16 %v2504_v55, %v2503_v50  ;;  %v2505_v37 = vmul.f32 %v4791_v44, %v6292_v29  ;;  %v4793_v4 = vpop.eup %4792 }
 0xd06   :  { %v4795_v39 = vpop.eup %4794  ;;  %v2659_v46 = vmul.f32 %v4793_v4, %v6285_v43 }
 0xd07   :  { %4144 = vmatmul.msk.bf16.gmra.mxu3 %vm592_vm3, %v2507_v54  ;;  %v2508_v7 = vpack.c.bf16 %v2505_v37, %v2505_v37  ;;  %v2658_v51 = vmul.f32 %v4795_v39, %v6270_v19 }
 0xd08   :  { %2847 = vmatpush.bf16.msrb.mxu3 %v2821_v34 }
 0xd09   :  { %2692 = vmatpush.bf16.msra.mxu1 %v2669_v22  ;;  %v2663_v15 = vpack.c.bf16 %v2659_v46, %v2658_v51 }
 0xd17   :  { %4145 = vmatmul.msk.bf16.gmra.mxu3 %vm592_vm3, %v2508_v7 }
 0xd1b   :  { %v2794_v11 = vpop.xlane.xlu0 %2793 }
 0xd1c   :  { %4796 = vrcp.f32 %v2794_v11 }
 0xd22   :  { %v4797_v2 = vpop.eup %4796 }
 0xd23   :  { %v2812_v43 = vmul.f32 %v4797_v2, %v6310_v40 }
 0xd2e   :  { %v2667_v14 = vpop.permute.xlu0 %2666  ;;  %v2800_v13 = vpop.xlane.xlu1 %2799 }
 0xd2f   :  { %v6373_v57 = vpop.f32.mrf.mxu1  ;;  %2693 = vmatpush.bf16.msra.mxu1 %v2667_v14 }
 0xd32   :  { %4149 = vmatmul.msk.bf16.vlgmr.msra.gmra.mxu1 %vm592_vm3, %v2663_v15 }
 0xd36   :  { %v2646_v40 = vpop.xlane.xlu1 %2645 }
 0xd37   :  { %v6376_v29 = vpop.f32.mrf.mxu1 }
 0xd3c   :  { %v2797_v17 = vpop.xlane.xlu2 %2796 }
 0xd3d   :  { %4798 = vrcp.f32 %v2797_v17 }
 0xd3f   :  { %v6378_v23 = vpop.f32.mrf.mxu1 }
 0xd43   :  { %v4799_v47 = vpop.eup %4798 }
 0xd44   :  { %v2813_v19 = vmul.f32 %v4799_v47, %v6333_v8  ;;  %v2776_v3 = vpop.xlane.xlu2 %2775 }
 0xd45   :  { %v2781_v52 = vsub.f32 %v6339_v21, %v2776_v3 }
 0xd46   :  { %v2817_v28 = vpack.c.bf16 %v2813_v19, %v2812_v43 }
 0xd47   :  { %v2790_v63 = vmul.f32 1.442695, %v2781_v52  ;;  %v6383_v0 = vpop.f32.mrf.mxu1  ;;  %v4468_v52 = vld [vmem:[%s6607_s9 + $0x78] sm:$0xff] }
 0xd48   :  { %4155 = vmatmul.msk.bf16.vlgmr.msrb.gmra.mxu3 %vm592_vm3, %v2817_v28  ;;  %3011 = vmatpush.bf16.msrb.mxu0 %v4468_v52  ;;  %v4466_v28 = vld [vmem:[%s6607_s9 + $0x68] sm:$0xff] }
 0xd49   :  { %4800 = vpow2.f32 %v2790_v63  ;;  %v4465_v63 = vld [vmem:[%s6607_s9 + $0x60] sm:$0xff] }
 0xd4c   :  { %v2622_v48 = vpop.xlane.xlu2 %2621 }
 0xd4d   :  { %v2627_v26 = vsub.f32 %v6349_v62, %v2622_v48  ;;  %v4464_v48 = vld [vmem:[%s6607_s9 + $0x58] sm:$0xff] }
 0xd4f   :  { %v4801_v10 = vpop.eup %4800  ;;  %v2636_v6 = vmul.f32 1.442695, %v2627_v26  ;;  %v6387_v24 = vpop.f32.mrf.mxu1  ;;  %v4463_v26 = vld [vmem:[%s6607_s9 + $0x50] sm:$0xff] }
 0xd50   :  { %v2804_v8 = vsel %vm592_vm3, %v4801_v10, 0.0 }
 0xd51   :  { %4802 = vpow2.f32 %v2636_v6  ;;  %2805 = vadd.xlane.f32.xlu0 %v2804_v8  ;;  %v4461_v6 = vld [vmem:[%s6607_s9 + $0x40] sm:$0xff] }
 0xd52   :  { %4804 = vrcp.f32 %v2646_v40 }
 0xd54   :  { %v2649_v21 = vpop.xlane.xlu2 %2648 }
 0xd55   :  { %4806 = vrcp.f32 %v2649_v21 }
 0xd56   :  { %4808 = vrcp.f32 %v2800_v13  ;;  %v4467_v13 = vld [vmem:[%s6607_s9 + $0x70] sm:$0xff] }
 0xd57   :  { %v4803_v58 = vpop.eup %4802  ;;  %v2390_v25 = vpop.f32.mrf.mxu1  ;;  %3012 = vmatpush.bf16.msrb.mxu0 %v4467_v13 }
 0xd58   :  { %v2650_v1 = vsel %vm592_vm3, %v4803_v58, 0.0  ;;  %v4805_v18 = vpop.eup %4804 }
 0xd59   :  { %v2803_v60 = vpop.xlane.xlu0 %2802  ;;  %2651 = vadd.xlane.f32.xlu1 %v2650_v1  ;;  %v2660_v45 = vmul.f32 %v4805_v18, %v6328_v59 }
 0xd5a   :  { %4810 = vrcp.f32 %v2803_v60 }
 0xd5b   :  { %v4807_v62 = vpop.eup %4806  ;;  %3013 = vmatpush.bf16.msrb.mxu0 %v4466_v28 }
 0xd5c   :  { %v2661_v49 = vmul.f32 %v4807_v62, %v6354_v31  ;;  %v4809_v34 = vpop.eup %4808 }
 0xd5d   :  { %v2814_v16 = vmul.f32 %v4809_v34, %v6320_v20 }
 0xd5e   :  { %v2664_v30 = vpack.c.bf16 %v2661_v49, %v2660_v45 }
 0xd5f   :  { %3014 = vmatpush.bf16.msrb.mxu0 %v4465_v63 }
 0xd60   :  { %v4811_v35 = vpop.eup %4810  ;;  %4150 = vmatmul.msk.bf16.gmra.mxu1 %vm592_vm3, %v2664_v30 }
 0xd61   :  { %v2815_v22 = vmul.f32 %v4811_v35, %v6358_v5 }
 0xd63   :  { %v2818_v53 = vpack.c.bf16 %v2815_v22, %v2814_v16  ;;  %3015 = vmatpush.bf16.msrb.mxu0 %v4464_v48 }
 0xd65   :  { %4156 = vmatmul.msk.bf16.gmra.mxu3 %vm592_vm3, %v2818_v53 }
 0xd67   :  { %3016 = vmatpush.bf16.msrb.mxu0 %v4463_v26 }
 0xd73   :  { %v2541_v32 = vpop.f32.mrf.mxu3 }
 0xd7b   :  { %v2543_v50 = vpop.f32.mrf.mxu3 }
 0xd7c   :  { %v4560_v55 = vpack.i.bf16 %v2543_v50, %v2541_v32 }
 0xd7e   :  { %4561 = vrot.lane.b32.xlu2 %v4560_v55, %s4937_s26 }
 0xd8a   :  { %v2546_v59 = vpop.f32.mrf.mxu3 }
 0xd92   :  { %v2548_v42 = vpop.f32.mrf.mxu3 }
 0xd93   :  { %v4575_v20 = vpack.i.bf16 %v2548_v42, %v2546_v59 }
 0xd9a   :  { %v2551_v31 = vpop.f32.mrf.mxu3 }
 0xda2   :  { %v2553_v61 = vpop.f32.mrf.mxu3 }
 0xdaf   :  { %v2695_v56 = vpop.f32.mrf.mxu1 }
 0xdb7   :  { %v2697_v33 = vpop.f32.mrf.mxu1 }
 0xdb8   :  { %v4565_v54 = vpack.i.bf16 %v2697_v33, %v2695_v56 }
 0xdba   :  { %4566 = vrot.lane.b32.xlu0 %v4565_v54, %s4933_s27 }
 0xdc2   :  { %4576 = vrot.lane.b32.xlu0 %v4575_v20, %s4937_s26 }
 0xdc4   :  { %v2806_v5 = vpop.xlane.xlu0 %2805 }
 0xdc5   :  { %4812 = vrcp.f32 %v2806_v5 }
 0xdca   :  { %2876 = vrot.lane.b32.xlu0 %v2551_v31, %s4937_s26 }
 0xdcb   :  { %v4813_v44 = vpop.eup %4812  ;;  %v2849_v37 = vpop.f32.mrf.mxu3 }
 0xdcc   :  { %v2816_v7 = vmul.f32 %v4813_v44, %v4801_v10  ;;  %v2652_v11 = vpop.xlane.xlu1 %2651  ;;  %v4462_v10 = vld [vmem:[%s6607_s9 + $0x48] sm:$0xff] }
 0xdcd   :  { %4814 = vrcp.f32 %v2652_v11  ;;  %3017 = vmatpush.bf16.msrb.mxu0 %v4462_v10 }
 0xdce   :  { %v2819_v4 = vpack.c.bf16 %v2816_v7, %v2816_v7 }
 0xdd0   :  { %4157 = vmatmul.msk.bf16.gmra.mxu3 %vm592_vm3, %v2819_v4 }
 0xdd1   :  { %3018 = vmatpush.bf16.msrb.mxu0 %v4461_v6 }
 0xdd3   :  { %v4815_v39 = vpop.eup %4814  ;;  %v2851_v46 = vpop.f32.mrf.mxu3 }
 0xdd4   :  { %v2662_v51 = vmul.f32 %v4815_v39, %v4803_v58  ;;  %v4570_v14 = vpack.i.bf16 %v2851_v46, %v2849_v37 }
 0xdd6   :  { %4571 = vrot.lane.b32.xlu1 %v4570_v14, %s4936_s3  ;;  %v2665_v15 = vpack.c.bf16 %v2662_v51, %v2662_v51 }
 0xdd8   :  { %4151 = vmatmul.msk.bf16.gmra.mxu1 %vm592_vm3, %v2665_v15  ;;  %v4562_v40 = vpop.permute.xlu2 %4561 }
 0xdd9   :  { %v4564_v21 = vunpack.i.h.bf16 %v4562_v40  ;;  %v4563_v58 = vunpack.i.l.bf16 %v4562_v40 }
 0xddb   :  { %v2924_v60 = vsel %vm124_vm0, %v6376_v29, %v4564_v21  ;;  %v2923_v62 = vsel %vm124_vm0, %v6373_v57, %v4563_v58 }
 0xddd   :  { %v2700_v17 = vpop.f32.mrf.mxu1 }
 0xde5   :  { %v2702_v2 = vpop.f32.mrf.mxu1 }
 0xde6   :  { %v4580_v47 = vpack.i.bf16 %v2702_v2, %v2700_v17  ;;  %v4599_v17 = vld [vmem:[%s6608_s10 + $0x1] ss:$0 sm:$0xff] }
 0xde8   :  { %v2854_v43 = vpop.f32.mrf.mxu3  ;;  %4581 = vrot.lane.b32.xlu2 %v4580_v47, %s4933_s27 }
 0xdf0   :  { %v2856_v19 = vpop.f32.mrf.mxu3 }
 0xdf1   :  { %v4585_v3 = vpack.i.bf16 %v2856_v19, %v2854_v43 }
 0xdf3   :  { %4586 = vrot.lane.b32.xlu1 %v4585_v3, %s4936_s3 }
 0xe2c   :  { %v4567_v8 = vpop.permute.xlu0 %4566 }
 0xe2d   :  { %v4569_v25 = vunpack.i.h.bf16 %v4567_v8  ;;  %v4568_v1 = vunpack.i.l.bf16 %v4567_v8 }
 0xe2f   :  { %v2929_v34 = vsel %vm1223_vm4, %v2924_v60, %v4569_v25  ;;  %v2928_v30 = vsel %vm1223_vm4, %v2923_v62, %v4568_v1 }
 0xe34   :  { %v4577_v50 = vpop.permute.xlu0 %4576 }
 0xe35   :  { %v4579_v59 = vunpack.i.h.bf16 %v4577_v50  ;;  %v4578_v42 = vunpack.i.l.bf16 %v4577_v50  ;;  %v4482_v50 = vld [vmem:[#allocation2 + $0xe4] sm:$0xf0] }
 0xe37   :  { %v2926_v33 = vsel %vm124_vm0, %v6383_v0, %v4579_v59  ;;  %v2925_v54 = vsel %vm124_vm0, %v6378_v23, %v4578_v42  ;;  %v4262_v42 = vld [vmem:[#allocation2 + $0xe8] sm:$0xf0] }
 0xe3c   :  { %v2877_v39 = vpop.permute.xlu0 %2876 }
 0xe3d   :  { %v2927_v0 = vsel %vm124_vm0, %v6387_v24, %v2877_v39 }
 0xe42   :  { %v4582_v55 = vpop.permute.xlu2 %4581 }
 0xe43   :  { %v4584_v31 = vunpack.i.h.bf16 %v4582_v55  ;;  %v4583_v61 = vunpack.i.l.bf16 %v4582_v55  ;;  %v4481_v55 = vld [vmem:[#allocation2 + $0xe4] sm:$0xf] }
 0xe45   :  { %v2931_v44 = vsel %vm1223_vm4, %v2926_v33, %v4584_v31  ;;  %v2930_v37 = vsel %vm1223_vm4, %v2925_v54, %v4583_v61  ;;  %v4265_v31 = vor.u32 %v4481_v55, %v4262_v42  ;;  %v4252_v61 = vld [vmem:[#allocation2 + $0xd0] sm:$0xf]  ;;  %v4479_v33 = vld [vmem:[#allocation2 + $0xd4] sm:$0xf] }
 0xe48   :  { %v4572_v18 = vpop.permute.xlu1 %4571 }
 0xe49   :  { %v4574_v45 = vunpack.i.h.bf16 %v4572_v18  ;;  %v4573_v49 = vunpack.i.l.bf16 %v4572_v18 }
 0xe4b   :  { %v2934_v35 = vsel %vm1229_vm5, %v2929_v34, %v4574_v45  ;;  %v2933_v16 = vsel %vm1229_vm5, %v2928_v30, %v4573_v49 }
 0xe4c   :  { %v2938_v22 = vpack.c.bf16 %v2934_v35, %v2933_v16  ;;  %v4268_v35 = vld [vmem:[#allocation2 + $0xf0] sm:$0xf]  ;;  %v4484_v16 = vld [vmem:[#allocation2 + $0xf4] sm:$0xf0] }
 0xe4e   :  { %3019 = vmatmul.bf16.vlgmr.msrb.gmra.mxu0 %v2938_v22  ;;  %v4483_v22 = vld [vmem:[#allocation2 + $0xf4] sm:$0xf] }
 0xe53   :  { %v2859_v53 = vpop.f32.mrf.mxu3 }
 0xe54   :  { %2916 = vrot.lane.b32.xlu1 %v2859_v53, %s4936_s3  ;;  %v4269_v53 = vor.u32 %v4484_v16, %v4268_v35 }
 0xe55   :  { %v2705_v32 = vpop.f32.mrf.mxu1 }
 0xe56   :  { %2896 = vrot.lane.b32.xlu2 %v2705_v32, %s4933_s27  ;;  %v4270_v32 = vld [vmem:[#allocation2 + $0xf8] sm:$0xf0]  ;;  %3266 = vmatpush.bf16.msrb.mxu1 %v4269_v53  ;;  %s4938_s27 = smov [#allocation7]  }
 0xe57   :  { %s3696_s10 = sshll.u32 %s4938_s27, 4  ;;  %s3697_s10 = int_to_ptr.vmem [resolvable:$true] %s3696_s10 }
 0xe5b   :  { %v2861_v29 = vpop.f32.mrf.mxu3 }
 0xe5c   :  { %v4273_v29 = vor.u32 %v4483_v22, %v4270_v32 }
 0xe5d   :  { %v2707_v57 = vpop.f32.mrf.mxu1 }
 0xe5e   :  { %3289 = vmatpush.bf16.msra.mxu2 %v4273_v29  ;;  %v4260_v57 = vld [vmem:[#allocation2 + $0xe0] sm:$0xf] }
 0xe5f   :  { %v4261_v59 = vor.u32 %v4482_v50, %v4260_v57 }
 0xe61   :  { %3267 = vmatpush.bf16.msrb.mxu1 %v4261_v59 }
 0xe62   :  { %3290 = vmatpush.bf16.msra.mxu2 %v4265_v31 }
 0xe65   :  { %v4587_v56 = vpop.permute.xlu1 %4586 }
 0xe66   :  { %v4589_v20 = vunpack.i.h.bf16 %v4587_v56  ;;  %v4588_v5 = vunpack.i.l.bf16 %v4587_v56  ;;  %v4480_v56 = vld [vmem:[#allocation2 + $0xd4] sm:$0xf0] }
 0xe67   :  { %v4253_v54 = vor.u32 %v4480_v56, %v4252_v61 }
 0xe68   :  { %v2935_v7 = vsel %vm1229_vm5, %v2930_v37, %v4588_v5  ;;  %v2936_v11 = vsel %vm1229_vm5, %v2931_v44, %v4589_v20  ;;  %v4254_v20 = vld [vmem:[#allocation2 + $0xd8] sm:$0xf0]  ;;  %v4244_v44 = vld [vmem:[#allocation2 + $0xc0] sm:$0xf]  ;;  %v4478_v37 = vld [vmem:[#allocation2 + $0xc4] sm:$0xf0] }
 0xe69   :  { %v2939_v4 = vpack.c.bf16 %v2936_v11, %v2935_v7  ;;  %v4257_v5 = vor.u32 %v4479_v33, %v4254_v20  ;;  %3268 = vmatpush.bf16.msrb.mxu1 %v4253_v54  ;;  %v4477_v7 = vld [vmem:[#allocation2 + $0xc4] sm:$0xf]  ;;  %v4245_v11 = vor.u32 %v4478_v37, %v4244_v44  ;;  %v6510_v20 = vld [vmem:[%s6609_s11 + $0x1] ss:$0 sm:$0xff] }
 0xe6b   :  { %3024 = vmatmul.bf16.gmra.mxu0 %v2939_v4  ;;  %3291 = vmatpush.bf16.msra.mxu2 %v4257_v5  ;;  %v4246_v4 = vld [vmem:[#allocation2 + $0xc8] sm:$0xf0] }
 0xe6c   :  { %v4249_v39 = vor.u32 %v4477_v7, %v4246_v4  ;;  %v6517_v4 = vld [vmem:[%s6610_s12 + $0x1] ss:$0 sm:$0xff] }
 0xe6d   :  { %3269 = vmatpush.bf16.msrb.mxu1 %v4245_v11 }
 0xe6f   :  { %3292 = vmatpush.bf16.msra.mxu2 %v4249_v39 }
 0xeb0   :  { %v2897_v46 = vpop.permute.xlu2 %2896 }
 0xeb1   :  { %v2932_v51 = vsel %vm1223_vm4, %v2927_v0, %v2897_v46  ;;  %v4236_v46 = vld [vmem:[#allocation2 + $0xb0] sm:$0xf]  ;;  %v4476_v0 = vld [vmem:[#allocation2 + $0xb4] sm:$0xf0] }
 0xec6   :  { %v2917_v23 = vpop.permute.xlu1 %2916 }
 0xec7   :  { %v2937_v14 = vsel %vm1229_vm5, %v2932_v51, %v2917_v23  ;;  %v4475_v51 = vld [vmem:[#allocation2 + $0xb4] sm:$0xf]  ;;  %v4237_v23 = vor.u32 %v4476_v0, %v4236_v46 }
 0xec8   :  { %v2940_v15 = vpack.c.bf16 %v2937_v14, %v2937_v14  ;;  %v4238_v14 = vld [vmem:[#allocation2 + $0xb8] sm:$0xf0] }
 0xec9   :  { %3270 = vmatpush.bf16.msrb.mxu1 %v4237_v23 }
 0xeca   :  { %3029 = vmatmul.bf16.gmra.mxu0 %v2940_v15  ;;  %v4241_v15 = vor.u32 %v4475_v51, %v4238_v14 }
 0xecb   :  { %v3020_v2 = vpop.f32.mrf.mxu0 }
 0xecc   :  { %v3021_v47 = vadd.f32 %v4599_v17, %v3020_v2  ;;  %3293 = vmatpush.bf16.msra.mxu2 %v4241_v15  ;;  %v4474_v2 = vld [vmem:[#allocation2 + $0xa4] sm:$0xf0] }
 0xece   :  { %v6456_v43 = vadd.f32 %v3021_v47, %v5825_v12  ;;  %v4473_v47 = vld [vmem:[#allocation2 + $0xa4] sm:$0xf] }
 0xed0   :  { %3043 = vadd.xlane.f32.xlu0 %v6456_v43 }
 0xed3   :  { %v3022_v19 = vpop.f32.mrf.mxu0 }
 0xed4   :  { %v3023_v24 = vadd.f32 %v4599_v17, %v3022_v19 }
 0xed6   :  { %v6460_v3 = vadd.f32 %v3023_v24, %v5829_v36  ;;  %v4230_v24 = vld [vmem:[#allocation2 + $0xa8] sm:$0xf0] }
 0xed8   :  { %3045 = vadd.xlane.f32.xlu2 %v6460_v3 }
 0xee8   :  { %v3025_v52 = vpop.f32.mrf.mxu0 }
 0xee9   :  { %v3026_v13 = vadd.f32 %v4599_v17, %v3025_v52  ;;  %v4233_v52 = vor.u32 %v4473_v47, %v4230_v24 }
 0xeeb   :  { %v6464_v28 = vadd.f32 %v3026_v13, %v5833_v27  ;;  %3294 = vmatpush.bf16.msra.mxu2 %v4233_v52  ;;  %v4220_v13 = vld [vmem:[#allocation2 + $0x90] sm:$0xf] }
 0xeed   :  { %3047 = vadd.xlane.f32.xlu1 %v6464_v28 }
 0xef0   :  { %v3027_v63 = vpop.f32.mrf.mxu0 }
 0xef1   :  { %v3028_v48 = vadd.f32 %v4599_v17, %v3027_v63  ;;  %v4472_v63 = vld [vmem:[#allocation2 + $0x94] sm:$0xf0] }
 0xef3   :  { %v6468_v12 = vadd.f32 %v3028_v48, %v5837_v9  ;;  %v4471_v48 = vld [vmem:[#allocation2 + $0x94] sm:$0xf] }
 0xef5   :  { %3049 = vadd.xlane.f32.xlu2 %v6468_v12 }
 0xf43   :  { %v3044_v26 = vpop.xlane.xlu0 %3043 }
 0xf44   :  { %v3053_v36 = vmul.f32 %v3044_v26, %v5107_v38  ;;  %v4221_v26 = vor.u32 %v4472_v63, %v4220_v13 }
 0xf46   :  { %v6473_v10 = vsub.f32 %v6456_v43, %v3053_v36  ;;  %v4222_v36 = vld [vmem:[#allocation2 + $0x98] sm:$0xf0] }
 0xf47   :  { %v3030_v6 = vpop.f32.mrf.mxu0 }
 0xf48   :  { %v3031_v40 = vadd.f32 %v4599_v17, %v3030_v6  ;;  %v3063_v27 = vmul.f32 %v6473_v10, %v6473_v10  ;;  %v4228_v17 = vld [vmem:[#allocation2 + $0xa0] sm:$0xf] }
 0xf49   :  { %v4229_v19 = vor.u32 %v4474_v2, %v4228_v17 }
 0xf4a   :  { %v6478_v8 = vadd.f32 %v3031_v40, %v5841_v41  ;;  %3068 = vadd.xlane.f32.xlu0 %v3063_v27  ;;  %v4225_v40 = vor.u32 %v4471_v48, %v4222_v36 }
 0xf4b   :  { %v3046_v21 = vpop.xlane.xlu2 %3045  ;;  %3271 = vmatpush.bf16.msrb.mxu1 %v4229_v19 }
 0xf4c   :  { %v3054_v9 = vmul.f32 %v3046_v21, %v5107_v38  ;;  %3051 = vadd.xlane.f32.xlu2 %v6478_v8  ;;  %3295 = vmatpush.bf16.msra.mxu2 %v4225_v40 }
 0xf4e   :  { %v6483_v58 = vsub.f32 %v6460_v3, %v3054_v9  ;;  %v4212_v9 = vld [vmem:[#allocation2 + $0x80] sm:$0xf] }
 0xf4f   :  { %v3032_v25 = vpop.f32.mrf.mxu0  ;;  %3272 = vmatpush.bf16.msrb.mxu1 %v4221_v26 }
 0xf50   :  { %v3064_v1 = vmul.f32 %v6483_v58, %v6483_v58  ;;  %v4470_v25 = vld [vmem:[#allocation2 + $0x84] sm:$0xf0] }
 0xf52   :  { %3070 = vadd.xlane.f32.xlu1 %v3064_v1  ;;  %v4469_v1 = vld [vmem:[#allocation2 + $0x84] sm:$0xf] }
 0xf60   :  { %v3048_v18 = vpop.xlane.xlu1 %3047 }
 0xf61   :  { %v3055_v60 = vmul.f32 %v3048_v18, %v5107_v38 }
 0xf63   :  { %v6489_v41 = vsub.f32 %v6464_v28, %v3055_v60 }
 0xf65   :  { %v3065_v62 = vmul.f32 %v6489_v41, %v6489_v41 }
 0xf67   :  { %3072 = vadd.xlane.f32.xlu0 %v3065_v62  ;;  %v4213_v62 = vor.u32 %v4470_v25, %v4212_v9 }
 0xf68   :  { %v3050_v45 = vpop.xlane.xlu2 %3049 }
 0xf69   :  { %v3056_v49 = vmul.f32 %v3050_v45, %v5107_v38  ;;  %v4214_v45 = vld [vmem:[#allocation2 + $0x88] sm:$0xf0]  ;;  %3273 = vmatpush.bf16.msrb.mxu1 %v4213_v62 }
 0xf6b   :  { %v6495_v34 = vsub.f32 %v6468_v12, %v3056_v49  ;;  %v4217_v49 = vor.u32 %v4469_v1, %v4214_v45 }
 0xf6d   :  { %v3066_v30 = vmul.f32 %v6495_v34, %v6495_v34  ;;  %3296 = vmatpush.bf16.msra.mxu2 %v4217_v49 }
 0xf6f   :  { %3074 = vadd.xlane.f32.xlu1 %v3066_v30 }
 0xfbd   :  { %v3069_v6 = vpop.xlane.xlu0 %3068 }
 0xfbe   :  { %v3078_v27 = vmul.f32 %v3069_v6, %v5107_v38 }
 0xfbf   :  { %v3052_v21 = vpop.xlane.xlu2 %3051 }
 0xfc0   :  { %v3083_v18 = vadd.f32 1e-05, %v3078_v27  ;;  %v3057_v60 = vmul.f32 %v3052_v21, %v5107_v38 }
 0xfc2   :  { %4816 = vrsqrt.f32 %v3083_v18  ;;  %v6502_v30 = vsub.f32 %v6478_v8, %v3057_v60  ;;  %vm3094_vm3 = vweird.f32 %v3083_v18 }
 0xfc4   :  { %v3067_v35 = vmul.f32 %v6502_v30, %v6502_v30 }
 0xfc5   :  { %v3071_v16 = vpop.xlane.xlu1 %3070 }
 0xfc6   :  { %v3079_v22 = vmul.f32 %v3071_v16, %v5107_v38  ;;  %3076 = vadd.xlane.f32.xlu2 %v3067_v35 }
 0xfc8   :  { %v4817_v53 = vpop.eup %4816  ;;  %v3084_v32 = vadd.f32 1e-05, %v3079_v22 }
 0xfc9   :  { %v3089_v29 = vmul.f32 %v4817_v53, %v3083_v18  ;;  %vm3095_vm2 = vweird.f32 %v4817_v53 }
 0xfca   :  { %4818 = vrsqrt.f32 %v3084_v32  ;;  %vm3096_vm4 = vmor %vm3094_vm3, %vm3095_vm2  ;;  %vm3104_vm14 = vweird.f32 %v3084_v32 }
 0xfcb   :  { %v3090_v57 = vmul.f32 %v4817_v53, %v3089_v29  ;;  %v4491_v29 = vld [vmem:[#allocation5 + $0xb0] sm:$0xff] }
 0xfcd   :  { %v3091_v50 = vmul.f32 0.5, %v3090_v57 }
 0xfcf   :  { %v3092_v55 = vsub.f32 1.5, %v3091_v50  ;;  %v4500_v50 = vld [vmem:[#allocation5 + $0xf8] sm:$0xff] }
 0xfd0   :  { %v4819_v59 = vpop.eup %4818  ;;  %3565 = vmatpush.bf16.msra.mxu0 %v4500_v50 }
 0xfd1   :  { %v3093_v42 = vmul.f32 %v4817_v53, %v3092_v55  ;;  %v3099_v31 = vmul.f32 %v4819_v59, %v3084_v32  ;;  %vm3105_vm5 = vweird.f32 %v4819_v59 }
 0xfd2   :  { %vm3106_vm15 = vmor %vm3104_vm14, %vm3105_vm5 }
 0xfd3   :  { %v3100_v61 = vmul.f32 %v4819_v59, %v3099_v31  ;;  %v3097_v56 = vsel %vm3096_vm4, %v4817_v53, %v3093_v42  ;;  %v4492_v53 = vld [vmem:[#allocation5 + $0xb8] sm:$0xff] }
 0xfd4   :  { %v3138_v5 = vmul.f32 %v3097_v56, %v6473_v10  ;;  %3542 = vmatpush.bf16.msra.mxu3 %v4492_v53 }
 0xfd5   :  { %v3101_v33 = vmul.f32 0.5, %v3100_v61  ;;  %v4489_v61 = vld [vmem:[#allocation5 + $0xa0] sm:$0xff] }
 0xfd6   :  { %v3146_v39 = vmul.f32 %v6510_v20, %v3138_v5  ;;  %v4488_v5 = vld [vmem:[#allocation5 + $0x98] sm:$0xff] }
 0xfd7   :  { %v3102_v54 = vsub.f32 1.5, %v3101_v33  ;;  %v4498_v33 = vld [vmem:[#allocation5 + $0xe8] sm:$0xff] }
 0xfd8   :  { %v3154_v10 = vadd.f32 %v6517_v4, %v3146_v39  ;;  %3543 = vmatpush.bf16.msra.mxu3 %v4491_v29 }
 0xfd9   :  { %v3103_v44 = vmul.f32 %v4819_v59, %v3102_v54 }
 0xfda   :  { %v3073_v37 = vpop.xlane.xlu0 %3072 }
 0xfdb   :  { %v3107_v7 = vsel %vm3106_vm15, %v4819_v59, %v3103_v44  ;;  %v3080_v11 = vmul.f32 %v3073_v37, %v5107_v38  ;;  %v4490_v59 = vld [vmem:[#allocation5 + $0xa8] sm:$0xff]  ;;  %v4497_v37 = vld [vmem:[#allocation5 + $0xe0] sm:$0xff] }
 0xfdc   :  { %v3139_v46 = vmul.f32 %v3107_v7, %v6483_v58  ;;  %3544 = vmatpush.bf16.msra.mxu3 %v4490_v59  ;;  %v4487_v7 = vld [vmem:[#allocation5 + $0x90] sm:$0xff] }
 0xfdd   :  { %v3085_v0 = vadd.f32 1e-05, %v3080_v11  ;;  %v4496_v11 = vld [vmem:[#allocation5 + $0xd8] sm:$0xff] }
 0xfde   :  { %v3147_v51 = vmul.f32 %v6510_v20, %v3139_v46 }
 0xfdf   :  { %4820 = vrsqrt.f32 %v3085_v0  ;;  %vm3114_vm6 = vweird.f32 %v3085_v0 }
 0xfe0   :  { %v3155_v23 = vadd.f32 %v6517_v4, %v3147_v51  ;;  %3545 = vmatpush.bf16.msra.mxu3 %v4489_v61 }
 0xfe2   :  { %v3075_v14 = vpop.xlane.xlu1 %3074  ;;  %v3159_v15 = vpack.c.bf16 %v3155_v23, %v3154_v10  ;;  %v4494_v10 = vld [vmem:[#allocation5 + $0xc8] sm:$0xff] }
 0xfe3   :  { %v3081_v17 = vmul.f32 %v3075_v14, %v5107_v38 }
 0xfe4   :  { %3274 = vmatmul.bf16.vlgmr.msrb.gmra.mxu1 %v3159_v15  ;;  %3297 = vmatmul.bf16.vlgmr.msra.gmra.mxu2 %v3159_v15 }
 0xfe5   :  { %v4821_v2 = vpop.eup %4820  ;;  %v3086_v47 = vadd.f32 1e-05, %v3081_v17  ;;  %3546 = vmatpush.bf16.msra.mxu3 %v4488_v5 }
 0xfe6   :  { %v3109_v19 = vmul.f32 %v4821_v2, %v3085_v0  ;;  %vm3115_vm1 = vweird.f32 %v4821_v2  ;;  %v4485_v0 = vld [vmem:[#allocation5 + $0x80] sm:$0xff] }
 0xfe7   :  { %4822 = vrsqrt.f32 %v3086_v47  ;;  %vm3116_vm7 = vmor %vm3114_vm6, %vm3115_vm1  ;;  %vm3124_vm9 = vweird.f32 %v3086_v47 }
 0xfe8   :  { %v3110_v24 = vmul.f32 %v4821_v2, %v3109_v19 }
 0xfe9   :  { %3547 = vmatpush.bf16.msra.mxu3 %v4487_v7 }
 0xfea   :  { %v3111_v58 = vmul.f32 0.5, %v3110_v24 }
 0xfec   :  { %v3112_v52 = vsub.f32 1.5, %v3111_v58 }
 0xfed   :  { %v4823_v13 = vpop.eup %4822 }
 0xfee   :  { %v3113_v63 = vmul.f32 %v4821_v2, %v3112_v52  ;;  %v3119_v48 = vmul.f32 %v4823_v13, %v3086_v47  ;;  %vm3125_vm8 = vweird.f32 %v4823_v13 }
 0xfef   :  { %vm3126_vm10 = vmor %vm3124_vm9, %vm3125_vm8 }
 0xff0   :  { %v3120_v26 = vmul.f32 %v4823_v13, %v3119_v48  ;;  %v3117_v36 = vsel %vm3116_vm7, %v4821_v2, %v3113_v63  ;;  %v4493_v2 = vld [vmem:[#allocation5 + $0xc0] sm:$0xff] }
 0xff1   :  { %v3140_v27 = vmul.f32 %v3117_v36, %v6489_v41 }
 0xff2   :  { %v3121_v6 = vmul.f32 0.5, %v3120_v26 }
 0xff3   :  { %v3148_v1 = vmul.f32 %v6510_v20, %v3140_v27 }
 0xff4   :  { %v3122_v40 = vsub.f32 1.5, %v3121_v6 }
 0xff5   :  { %v3156_v60 = vadd.f32 %v6517_v4, %v3148_v1 }
 0xff6   :  { %v3123_v21 = vmul.f32 %v4823_v13, %v3122_v40 }
 0xff8   :  { %v3127_v9 = vsel %vm3126_vm10, %v4823_v13, %v3123_v21 }
 0xff9   :  { %v3141_v25 = vmul.f32 %v3127_v9, %v6495_v34 }
 0xffb   :  { %v3149_v18 = vmul.f32 %v6510_v20, %v3141_v25 }
 0xffd   :  { %v3157_v62 = vadd.f32 %v6517_v4, %v3149_v18 }
 0xfff   :  { %v3160_v45 = vpack.c.bf16 %v3157_v62, %v3156_v60 }
0x1001   :  { %3279 = vmatmul.bf16.gmra.mxu1 %v3160_v45  ;;  %3302 = vmatmul.bf16.gmra.mxu2 %v3160_v45 }
0x1039   :  { %v3077_v49 = vpop.xlane.xlu2 %3076 }
0x103a   :  { %v3082_v41 = vmul.f32 %v3077_v49, %v5107_v38  ;;  %v4499_v38 = vld [vmem:[#allocation5 + $0xf0] sm:$0xff] }
0x103b   :  { %3566 = vmatpush.bf16.msra.mxu0 %v4499_v38 }
0x103c   :  { %v3087_v35 = vadd.f32 1e-05, %v3082_v41 }
0x103e   :  { %4824 = vrsqrt.f32 %v3087_v35  ;;  %vm3134_vm12 = vweird.f32 %v3087_v35 }
0x103f   :  { %3567 = vmatpush.bf16.msra.mxu0 %v4498_v33 }
0x1043   :  { %3568 = vmatpush.bf16.msra.mxu0 %v4497_v37 }
0x1044   :  { %v4825_v16 = vpop.eup %4824 }
0x1045   :  { %v3129_v22 = vmul.f32 %v4825_v16, %v3087_v35  ;;  %vm3135_vm11 = vweird.f32 %v4825_v16 }
0x1046   :  { %vm3136_vm13 = vmor %vm3134_vm12, %vm3135_vm11 }
0x1047   :  { %v3130_v34 = vmul.f32 %v4825_v16, %v3129_v22  ;;  %3569 = vmatpush.bf16.msra.mxu0 %v4496_v11 }
0x1049   :  { %v3131_v32 = vmul.f32 0.5, %v3130_v34 }
0x104b   :  { %v3132_v57 = vsub.f32 1.5, %v3131_v32 }
0x104d   :  { %v3133_v55 = vmul.f32 %v4825_v16, %v3132_v57 }
0x104f   :  { %v3137_v42 = vsel %vm3136_vm13, %v4825_v16, %v3133_v55 }
0x1050   :  { %v3142_v31 = vmul.f32 %v3137_v42, %v6502_v30  ;;  %v4209_v30 = vld [vmem:[%s6612_s14 + $0x2] sm:$0x3] }
0x1051   :  { %v6538_v39 = vperm.slane %v4209_v30, 0  ;;  %v6541_v14 = vperm.slane %v4209_v30, 1 }
0x1052   :  { %v3150_v56 = vmul.f32 %v6510_v20, %v3142_v31  ;;  %v4486_v20 = vld [vmem:[#allocation5 + $0x88] sm:$0xff] }
0x1053   :  { %3548 = vmatpush.bf16.msra.mxu3 %v4486_v20 }
0x1054   :  { %v3158_v54 = vadd.f32 %v6517_v4, %v3150_v56  ;;  %v4495_v4 = vld [vmem:[#allocation5 + $0xd0] sm:$0xff] }
0x1055   :  { %3570 = vmatpush.bf16.msra.mxu0 %v4495_v4 }
0x1056   :  { %v3161_v44 = vpack.c.bf16 %v3158_v54, %v3158_v54 }
0x1057   :  { %3549 = vmatpush.bf16.msra.mxu3 %v4485_v0 }
0x1058   :  { %3284 = vmatmul.bf16.gmra.mxu1 %v3161_v44  ;;  %3307 = vmatmul.bf16.gmra.mxu2 %v3161_v44 }
0x1059   :  { %3571 = vmatpush.bf16.msra.mxu0 %v4494_v10 }
0x105d   :  { %3572 = vmatpush.bf16.msra.mxu0 %v4493_v2 }
0x1061   :  { %v3275_v46 = vpop.f32.mrf.mxu1 }
0x1062   :  { %v3276_v51 = vadd.f32 %v3275_v46, %v6538_v39 }
0x1064   :  { %v3312_v23 = vmul.f32 %v3276_v51, %v3276_v51 }
0x1066   :  { %v3322_v15 = vmul.f32 %v3312_v23, %v3276_v51 }
0x1067   :  { %v3298_v17 = vpop.f32.mrf.mxu2 }
0x1068   :  { %v3332_v47 = vmul.f32 0.044715, %v3322_v15  ;;  %v3299_v19 = vadd.f32 %v3298_v17, %v6541_v14 }
0x1069   :  { %v3277_v24 = vpop.f32.mrf.mxu1 }
0x106a   :  { %v3342_v58 = vadd.f32 %v3332_v47, %v3276_v51  ;;  %v3313_v52 = vmul.f32 %v3299_v19, %v3299_v19  ;;  %v3278_v13 = vadd.f32 %v3277_v24, %v6538_v39 }
0x106c   :  { %v3352_v63 = vmul.f32 0.7978846, %v3342_v58  ;;  %v3323_v48 = vmul.f32 %v3313_v52, %v3299_v19  ;;  %v3314_v26 = vmul.f32 %v3278_v13, %v3278_v13 }
0x106e   :  { %v3333_v36 = vmul.f32 0.044715, %v3323_v48  ;;  %v3324_v6 = vmul.f32 %v3314_v26, %v3278_v13  ;;  %4826 = vtanh.f32 %v3352_v63 }
0x106f   :  { %v3300_v40 = vpop.f32.mrf.mxu2 }
0x1070   :  { %v3343_v27 = vadd.f32 %v3333_v36, %v3299_v19  ;;  %v3334_v21 = vmul.f32 0.044715, %v3324_v6  ;;  %v3301_v9 = vadd.f32 %v3300_v40, %v6541_v14 }
0x1072   :  { %v3353_v25 = vmul.f32 0.7978846, %v3343_v27  ;;  %v3344_v1 = vadd.f32 %v3334_v21, %v3278_v13  ;;  %v3315_v18 = vmul.f32 %v3301_v9, %v3301_v9 }
0x1074   :  { %v3354_v60 = vmul.f32 0.7978846, %v3344_v1  ;;  %v3325_v62 = vmul.f32 %v3315_v18, %v3301_v9  ;;  %4828 = vtanh.f32 %v3353_v25  ;;  %v4827_v45 = vpop.eup %4826 }
0x1075   :  { %v3372_v35 = vadd.f32 1.0, %v4827_v45 }
0x1076   :  { %4830 = vtanh.f32 %v3354_v60  ;;  %v3335_v49 = vmul.f32 0.044715, %v3325_v62 }
0x1077   :  { %v3382_v34 = vmul.f32 0.5, %v3372_v35 }
0x1078   :  { %v3345_v41 = vadd.f32 %v3335_v49, %v3301_v9 }
0x1079   :  { %v3392_v59 = vmul.f32 %v3382_v34, %v3276_v51 }
0x107a   :  { %v3355_v16 = vmul.f32 0.7978846, %v3345_v41  ;;  %v4829_v22 = vpop.eup %4828 }
0x107b   :  { %v3373_v29 = vadd.f32 1.0, %v4829_v22 }
0x107c   :  { %v4831_v53 = vpop.eup %4830  ;;  %4832 = vtanh.f32 %v3355_v16 }
0x107d   :  { %v3374_v32 = vadd.f32 1.0, %v4831_v53  ;;  %v3383_v61 = vmul.f32 0.5, %v3373_v29 }
0x107e   :  { %v3280_v57 = vpop.f32.mrf.mxu1 }
0x107f   :  { %v3384_v50 = vmul.f32 0.5, %v3374_v32  ;;  %v3281_v55 = vadd.f32 %v3280_v57, %v6538_v39  ;;  %v3393_v30 = vmul.f32 %v3383_v61, %v3299_v19 }
0x1081   :  { %v3394_v42 = vmul.f32 %v3384_v50, %v3278_v13  ;;  %v3316_v38 = vmul.f32 %v3281_v55, %v3281_v55 }
0x1082   :  { %v4833_v31 = vpop.eup %4832 }
0x1083   :  { %v3402_v56 = vpack.c.bf16 %v3394_v42, %v3392_v59  ;;  %v3375_v33 = vadd.f32 1.0, %v4833_v31  ;;  %v3326_v54 = vmul.f32 %v3316_v38, %v3281_v55  ;;  %v4508_v59 = vld [vmem:[%s6615_s17 + $0x38] sm:$0xff] }
0x1084   :  { %v3303_v5 = vpop.f32.mrf.mxu2  ;;  %3664 = vmatpush.bf16.msra.mxu1 %v4508_v59 }
0x1085   :  { %v3385_v44 = vmul.f32 0.5, %v3375_v33  ;;  %v3336_v37 = vmul.f32 0.044715, %v3326_v54  ;;  %v3304_v7 = vadd.f32 %v3303_v5, %v6541_v14  ;;  %3550 = vmatmul.bf16.vlgmr.msra.gmra.mxu3 %v3402_v56 }
0x1086   :  { %v3282_v11 = vpop.f32.mrf.mxu1 }
0x1087   :  { %v3395_v20 = vmul.f32 %v3385_v44, %v3301_v9  ;;  %v3346_v4 = vadd.f32 %v3336_v37, %v3281_v55  ;;  %v3317_v46 = vmul.f32 %v3304_v7, %v3304_v7  ;;  %v3283_v0 = vadd.f32 %v3282_v11, %v6538_v39 }
0x1089   :  { %v3403_v51 = vpack.c.bf16 %v3395_v20, %v3393_v30  ;;  %v3356_v10 = vmul.f32 0.7978846, %v3346_v4  ;;  %v3327_v23 = vmul.f32 %v3317_v46, %v3304_v7  ;;  %v3318_v15 = vmul.f32 %v3283_v0, %v3283_v0 }
0x108b   :  { %v3337_v17 = vmul.f32 0.044715, %v3327_v23  ;;  %v3328_v2 = vmul.f32 %v3318_v15, %v3283_v0  ;;  %3573 = vmatmul.bf16.vlgmr.msra.gmra.mxu0 %v3403_v51  ;;  %4834 = vtanh.f32 %v3356_v10  ;;  %v4503_v23 = vld [vmem:[%s6615_s17 + $0x10] sm:$0xff] }
0x108c   :  { %v3305_v47 = vpop.f32.mrf.mxu2 }
0x108d   :  { %v3347_v24 = vadd.f32 %v3337_v17, %v3304_v7  ;;  %v3338_v58 = vmul.f32 0.044715, %v3328_v2  ;;  %v3306_v52 = vadd.f32 %v3305_v47, %v6541_v14 }
0x108f   :  { %v3357_v19 = vmul.f32 0.7978846, %v3347_v24  ;;  %v3348_v13 = vadd.f32 %v3338_v58, %v3283_v0  ;;  %v3319_v63 = vmul.f32 %v3306_v52, %v3306_v52  ;;  %v4502_v24 = vld [vmem:[%s6615_s17 + $0x8] sm:$0xff] }
0x1091   :  { %v3358_v48 = vmul.f32 0.7978846, %v3348_v13  ;;  %v3329_v26 = vmul.f32 %v3319_v63, %v3306_v52  ;;  %4836 = vtanh.f32 %v3357_v19  ;;  %v4835_v36 = vpop.eup %4834  ;;  %v4501_v19 = vld [vmem:[%s6615_s17] sm:$0xff] }
0x1092   :  { %v3376_v27 = vadd.f32 1.0, %v4835_v36 }
0x1093   :  { %4838 = vtanh.f32 %v3358_v48  ;;  %v3339_v6 = vmul.f32 0.044715, %v3329_v26  ;;  %v4602_v48 = vld [vmem:[%s6614_s16 + $0x1] ss:$0 sm:$0xff] }
0x1094   :  { %v3386_v18 = vmul.f32 0.5, %v3376_v27 }
0x1095   :  { %v3349_v40 = vadd.f32 %v3339_v6, %v3306_v52 }
0x1096   :  { %v3396_v45 = vmul.f32 %v3386_v18, %v3281_v55  ;;  %v4507_v55 = vld [vmem:[%s6615_s17 + $0x30] sm:$0xff] }
0x1097   :  { %v3359_v21 = vmul.f32 0.7978846, %v3349_v40  ;;  %v4837_v9 = vpop.eup %4836  ;;  %3665 = vmatpush.bf16.msra.mxu1 %v4507_v55  ;;  %v4603_v55 = vld [vmem:[%s6616_s18] ss:$0 sm:$0xff] }
0x1098   :  { %v3377_v62 = vadd.f32 1.0, %v4837_v9 }
0x1099   :  { %v4839_v25 = vpop.eup %4838  ;;  %4840 = vtanh.f32 %v3359_v21 }
0x109a   :  { %v3378_v1 = vadd.f32 1.0, %v4839_v25  ;;  %v3387_v22 = vmul.f32 0.5, %v3377_v62 }
0x109c   :  { %v3388_v60 = vmul.f32 0.5, %v3378_v1  ;;  %v3397_v34 = vmul.f32 %v3387_v22, %v3304_v7  ;;  %v4505_v7 = vld [vmem:[%s6615_s17 + $0x20] sm:$0xff] }
0x109e   :  { %v3398_v49 = vmul.f32 %v3388_v60, %v3283_v0  ;;  %v4504_v0 = vld [vmem:[%s6615_s17 + $0x18] sm:$0xff] }
0x109f   :  { %v4841_v41 = vpop.eup %4840 }
0x10a0   :  { %v3404_v35 = vpack.c.bf16 %v3398_v49, %v3396_v45  ;;  %v3379_v16 = vadd.f32 1.0, %v4841_v41 }
0x10a2   :  { %3555 = vmatmul.bf16.gmra.mxu3 %v3404_v35  ;;  %v3389_v53 = vmul.f32 0.5, %v3379_v16 }
0x10a4   :  { %v3399_v32 = vmul.f32 %v3389_v53, %v3306_v52 }
0x10a6   :  { %v3405_v29 = vpack.c.bf16 %v3399_v32, %v3397_v34 }
0x10a8   :  { %3578 = vmatmul.bf16.gmra.mxu0 %v3405_v29 }
0x10d5   :  { %v3285_v57 = vpop.f32.mrf.mxu1 }
0x10d6   :  { %v3286_v50 = vadd.f32 %v3285_v57, %v6538_v39  ;;  %v4506_v39 = vld [vmem:[%s6615_s17 + $0x28] sm:$0xff] }
0x10d7   :  { %3666 = vmatpush.bf16.msra.mxu1 %v4506_v39 }
0x10d8   :  { %v3320_v42 = vmul.f32 %v3286_v50, %v3286_v50 }
0x10da   :  { %v3330_v38 = vmul.f32 %v3320_v42, %v3286_v50 }
0x10db   :  { %v3308_v31 = vpop.f32.mrf.mxu2  ;;  %3667 = vmatpush.bf16.msra.mxu1 %v4505_v7 }
0x10dc   :  { %v3340_v61 = vmul.f32 0.044715, %v3330_v38  ;;  %v3309_v56 = vadd.f32 %v3308_v31, %v6541_v14 }
0x10dd   :  { %v3287_v33 = vpop.f32.mrf.mxu1 }
0x10de   :  { %v3350_v54 = vadd.f32 %v3340_v61, %v3286_v50  ;;  %v3321_v5 = vmul.f32 %v3309_v56, %v3309_v56 }
0x10df   :  { %3668 = vmatpush.bf16.msra.mxu1 %v4504_v0 }
0x10e0   :  { %v3360_v44 = vmul.f32 0.7978846, %v3350_v54  ;;  %v3331_v37 = vmul.f32 %v3321_v5, %v3309_v56 }
0x10e2   :  { %v3341_v30 = vmul.f32 0.044715, %v3331_v37  ;;  %4842 = vtanh.f32 %v3360_v44 }
0x10e3   :  { %v3310_v11 = vpop.f32.mrf.mxu2  ;;  %3669 = vmatpush.bf16.msra.mxu1 %v4503_v23 }
0x10e4   :  { %v3351_v20 = vadd.f32 %v3341_v30, %v3309_v56 }
0x10e6   :  { %v3361_v14 = vmul.f32 0.7978846, %v3351_v20 }
0x10e7   :  { %3670 = vmatpush.bf16.msra.mxu1 %v4502_v24 }
0x10e8   :  { %v4843_v4 = vpop.eup %4842  ;;  %4844 = vtanh.f32 %v3361_v14 }
0x10e9   :  { %v3380_v46 = vadd.f32 1.0, %v4843_v4 }
0x10eb   :  { %v3390_v51 = vmul.f32 0.5, %v3380_v46  ;;  %3671 = vmatpush.bf16.msra.mxu1 %v4501_v19 }
0x10ed   :  { %v3400_v10 = vmul.f32 %v3390_v51, %v3286_v50 }
0x10ee   :  { %v4845_v15 = vpop.eup %4844 }
0x10ef   :  { %v3406_v17 = vpack.c.bf16 %v3400_v10, %v3400_v10  ;;  %v3381_v2 = vadd.f32 1.0, %v4845_v15 }
0x10f1   :  { %3560 = vmatmul.bf16.gmra.mxu3 %v3406_v17  ;;  %v3391_v47 = vmul.f32 0.5, %v3381_v2 }
0x10f3   :  { %v3401_v58 = vmul.f32 %v3391_v47, %v3309_v56 }
0x10f5   :  { %v3407_v52 = vpack.c.bf16 %v3401_v58, %v3401_v58 }
0x10f7   :  { %3583 = vmatmul.bf16.gmra.mxu0 %v3407_v52 }
0x1108   :  { %v3551_v13 = vpop.f32.mrf.mxu3  ;;  %v3574_v63 = vpop.f32.mrf.mxu0 }
0x1109   :  { %v3552_v26 = vadd.f32 %v4602_v48, %v3551_v13 }
0x110b   :  { %v3575_v6 = vadd.f32 %v3574_v63, %v3552_v26 }
0x110d   :  { %v3588_v9 = vadd.f32 %v3575_v6, %v6456_v43 }
0x1110   :  { %v3553_v36 = vpop.f32.mrf.mxu3  ;;  %v3576_v27 = vpop.f32.mrf.mxu0 }
0x1111   :  { %v3554_v40 = vadd.f32 %v4602_v48, %v3553_v36 }
0x1113   :  { %v3577_v21 = vadd.f32 %v3576_v27, %v3554_v40 }
0x1115   :  { %v3589_v25 = vadd.f32 %v3577_v21, %v6460_v3 }
0x1117   :  { %v3593_v1 = vpack.c.bf16 %v3589_v25, %v3588_v9 }
0x1119   :  { %3672 = vmatmul.bf16.vlgmr.msra.gmra.mxu1 %v3593_v1 }
0x1125   :  { %v3556_v18 = vpop.f32.mrf.mxu3  ;;  %v3579_v60 = vpop.f32.mrf.mxu0 }
0x1126   :  { %v3557_v62 = vadd.f32 %v4602_v48, %v3556_v18 }
0x1128   :  { %v3580_v49 = vadd.f32 %v3579_v60, %v3557_v62 }
0x112a   :  { %v3590_v22 = vadd.f32 %v3580_v49, %v6464_v28 }
0x112d   :  { %v3558_v45 = vpop.f32.mrf.mxu3  ;;  %v3581_v35 = vpop.f32.mrf.mxu0 }
0x112e   :  { %v3559_v41 = vadd.f32 %v4602_v48, %v3558_v45 }
0x1130   :  { %v3582_v16 = vadd.f32 %v3581_v35, %v3559_v41 }
0x1132   :  { %v3591_v53 = vadd.f32 %v3582_v16, %v6468_v12 }
0x1134   :  { %v3594_v34 = vpack.c.bf16 %v3591_v53, %v3590_v22 }
0x1136   :  { %3677 = vmatmul.bf16.gmra.mxu1 %v3594_v34 }
0x1174   :  { %v3561_v32 = vpop.f32.mrf.mxu3  ;;  %v3584_v43 = vpop.f32.mrf.mxu0 }
0x1175   :  { %v3562_v29 = vadd.f32 %v4602_v48, %v3561_v32 }
0x1177   :  { %v3585_v3 = vadd.f32 %v3584_v43, %v3562_v29 }
0x1179   :  { %v3592_v57 = vadd.f32 %v3585_v3, %v6478_v8 }
0x117b   :  { %v3595_v50 = vpack.c.bf16 %v3592_v57, %v3592_v57 }
0x117c   :  { %v3563_v59 = vpop.f32.mrf.mxu3  ;;  %v3586_v42 = vpop.f32.mrf.mxu0 }
0x117d   :  { %3682 = vmatmul.bf16.gmra.mxu1 %v3595_v50 }
0x1196   :  { %v3673_v38 = vpop.f32.mrf.mxu1 }
0x1197   :  { %v3674_v28 = vadd.f32 %v4603_v55, %v3673_v38 }
0x1199   :  { %3687 = vst.msk [vmem:[#allocation7] sm:$0xff] %vm124_vm0, %v3674_v28 }
0x119e   :  { %v3675_v12 = vpop.f32.mrf.mxu1 }
0x119f   :  { %v3676_v31 = vadd.f32 %v4603_v55, %v3675_v12 }
0x11a1   :  { %3688 = vst.msk [vmem:[#allocation7 + $0x8] sm:$0xff] %vm124_vm0, %v3676_v31 }
0x11b3   :  { %v3678_v61 = vpop.f32.mrf.mxu1 }
0x11b4   :  { %v3679_v56 = vadd.f32 %v4603_v55, %v3678_v61 }
0x11b6   :  { %3689 = vst.msk [vmem:[#allocation7 + $0x10] sm:$0xff] %vm124_vm0, %v3679_v56 }
0x11bb   :  { %v3680_v8 = vpop.f32.mrf.mxu1 }
0x11bc   :  { %v3681_v33 = vadd.f32 %v4603_v55, %v3680_v8 }
0x11be   :  { %3690 = vst.msk [vmem:[#allocation7 + $0x18] sm:$0xff] %vm124_vm0, %v3681_v33 }
0x11fa   :  { %v3683_v39 = vpop.f32.mrf.mxu1 }
0x11fb   :  { %v3684_v54 = vadd.f32 %v4603_v55, %v3683_v39 }
0x11fd   :  { %3691 = vst.msk [vmem:[#allocation7 + $0x20] sm:$0xff] %vm124_vm0, %v3684_v54 }
0x11fe   :  { %3704 = dma.vmem_to_hbm [thread:$0]  %s3697_s10, 640, %s3699_s2, [#allocation4], %s4930_s24, %s4930_s24, %s4931_s25  }
0x1202   :  { %v3685_v5 = vpop.f32.mrf.mxu1 }
0x1203   :  { %4927 = dma.done.wait [#allocation4], 640  }
0x1204   :  { %4928 = vsyncadd [#allocation4], 4294966656 }
0x1205   :  { %3709 = vsyncpa [#allocation3], 1 }
0x1206   :  { %3710 = vsyncpa [#allocation6], 1 }
0x1207   :  { %3711 = vsyncpa [#allocation4], 1 }

</bundles_post_ra>
